<compile_context>
chip_gen: v7x
topology: tpu7x:2x2x1
jax: 0.10.0
libtpu: 0.0.40
codegen_flags: <defaults>
</compile_context>

<pallas_src>
import functools

import jax
import jax.numpy as jnp
from jax.experimental import pallas as pl
from jax.experimental.pallas import tpu as pltpu


# ----------------------------------------------------------------------------
# Fused kernel: squeeze + level0 (x8 sub-points) + squeeze + level1 + mean head
# Layout: channels on sublanes, final output points on lanes (lane dense).
# ----------------------------------------------------------------------------
def _fused_kernel(x_ref,
                  w0_ref, w1s0_ref, b1s0_ref, w2a0_ref, b2a0_ref,
                  w2b0_ref, b2b0_ref, wc1a_ref, wc1b_ref,
                  w1s1_ref, b1s1_ref, w2a1_ref, b2a1_ref, w2b1_ref, b2b1_ref,
                  hda_ref, hdb_ref, o_ref):
    f32 = jnp.float32
    bf16 = jnp.bfloat16

    x = x_ref[...]                                               # (192, TM) bf16

    # ---- Level 0 conv1x1 on all 8 sub-points: block-diag weight, output rows
    #      permuted so the 8 conditioning quarters are u[:48] (8-aligned).
    u = jnp.dot(w0_ref[...], x, preferred_element_type=f32)     # (192, TM) f32
    s1 = w1s0_ref.shape[1]                                       # 48
    u1 = u[:s1, :]                                               # conditioning
    u2 = u[s1:, :]                                               # transformed
    u1b = u1.astype(bf16)

    # ---- Level 0 couplings: both first-layer subnets stacked + block-diag.
    h = jnp.dot(w1s0_ref[...], u1b, preferred_element_type=f32) + b1s0_ref[...]
    h = jnp.maximum(h, 0.0)                                      # (512, TM)
    nh = h.shape[0] // 2
    st_a = (jnp.dot(w2a0_ref[...], h[:nh, :].astype(bf16),
                    preferred_element_type=f32) + b2a0_ref[...])
    ns = st_a.shape[0] // 2                                      # 144
    v2 = u2 * jnp.exp(jnp.tanh(st_a[:ns, :])) + st_a[ns:, :]     # coupling 1
    st_b = (jnp.dot(w2b0_ref[...], h[nh:, :].astype(bf16),
                    preferred_element_type=f32) + b2b0_ref[...])
    z2 = v2 * jnp.exp(jnp.tanh(st_b[:ns, :])) + st_b[ns:, :]     # coupling 2

    # ---- Level 1 conv1x1: the squeeze is folded into column-gathered weights,
    #      so it consumes u1/z2 directly (no in-kernel regroup / concatenate).
    ul1 = (jnp.dot(wc1a_ref[...], u1b, preferred_element_type=f32)
           + jnp.dot(wc1b_ref[...], z2.astype(bf16),
                     preferred_element_type=f32))                # (192, TM) f32

    # ---- Level 1 couplings.
    s11 = w1s1_ref.shape[1]                                      # 48
    v1 = ul1[:s11, :]
    y2 = ul1[s11:, :]
    v1b = v1.astype(bf16)
    h1 = jnp.dot(w1s1_ref[...], v1b, preferred_element_type=f32) + b1s1_ref[...]
    h1 = jnp.maximum(h1, 0.0)                                    # (64, TM)
    nh1 = h1.shape[0] // 2
    st_a1 = (jnp.dot(w2a1_ref[...], h1[:nh1, :].astype(bf16),
                     preferred_element_type=f32) + b2a1_ref[...])
    ns1 = st_a1.shape[0] // 2                                    # 144
    y2 = y2 * jnp.exp(jnp.tanh(st_a1[:ns1, :])) + st_a1[ns1:, :]
    st_b1 = (jnp.dot(w2b1_ref[...], h1[nh1:, :].astype(bf16),
                     preferred_element_type=f32) + b2b1_ref[...])
    z21 = y2 * jnp.exp(jnp.tanh(st_b1[:ns1, :])) + st_b1[ns1:, :]

    # ---- Grouped channel-mean head (f32 dots; only 8 output rows).
    o_ref[...] = (jnp.dot(hda_ref[...], v1, preferred_element_type=f32)
                  + jnp.dot(hdb_ref[...], z21, preferred_element_type=f32))


# ----------------------------------------------------------------------------
# Parameters (original PyTorch-style layout)
# ----------------------------------------------------------------------------
def init_params(key, in_nc=3, n_levels=2, dimensions=3, hidden=32):
    params = []
    c = in_nc
    for lvl in range(n_levels):
        c = c * (2 ** dimensions)
        split1 = c // 4
        split2 = 3 * c // 4
        klvl = jax.random.fold_in(key, lvl)
        kw, kc1, kc2 = jax.random.split(klvl, 3)

        def make_coupling(kk):
            ka, kb = jax.random.split(kk)
            return dict(
                w1=jax.random.normal(ka, (split1, hidden), jnp.float32) * 0.1,
                b1=jnp.zeros((1, hidden), jnp.float32),
                w2=jax.random.normal(kb, (hidden, 2 * split2), jnp.float32) * 0.1,
                b2=jnp.zeros((1, 2 * split2), jnp.float32),
            )

        params.append(dict(
            conv_w=jax.random.normal(kw, (c, c), jnp.float32) / jnp.sqrt(float(c)),
            coup1=make_coupling(kc1),
            coup2=make_coupling(kc2),
            split1=split1,
        ))
    return params, c


# ----------------------------------------------------------------------------
# One-time prep: block-diag / permuted / column-gathered weights (bf16 MXU
# operands, f32 biases).  Runs once outside the per-call path.
# ----------------------------------------------------------------------------
def prepare_fused_params(params, out_nc, dimensions=3):
    assert len(params) == 2, "fused kernel covers exactly 2 levels"
    f = 2 ** dimensions                      # sub-points of level 0 per output
    bf16 = jnp.bfloat16
    p0, p1 = params

    # ---- level 0, expanded over the f sub-points ----------------------------
    c0 = p0["conv_w"].shape[0]               # 24
    s1_0 = p0["split1"]                      # 6
    s2_0 = c0 - s1_0                         # 18
    eye_f = jnp.eye(f, dtype=jnp.float32)

    w0_blk = jnp.kron(eye_f, p0["conv_w"].T)                       # (192, 192)
    rows_u1 = [c0 * j + a for j in range(f) for a in range(s1_0)]
    rows_u2 = [c0 * j + s1_0 + b for j in range(f) for b in range(s2_0)]
    w0_fused = w0_blk[jnp.array(rows_u1 + rows_u2), :]

    def expand_coupling(cp):
        w1 = jnp.kron(eye_f, cp["w1"].T)                           # (8H, 48)
        b1 = jnp.tile(cp["b1"].T, (f, 1))                          # (8H, 1)
        w2_blk = jnp.kron(eye_f, cp["w2"].T)                       # (288, 8H)
        rows_s = [2 * s2_0 * j + b for j in range(f) for b in range(s2_0)]
        rows_t = [2 * s2_0 * j + s2_0 + b for j in range(f) for b in range(s2_0)]
        w2 = w2_blk[jnp.array(rows_s + rows_t), :]
        b2 = jnp.concatenate([jnp.tile(cp["b2"][0, :s2_0], f),
                              jnp.tile(cp["b2"][0, s2_0:], f)])[:, None]
        return w1, b1, w2, b2

    w1a0, b1a0, w2a0, b2a0 = expand_coupling(p0["coup1"])
    w1b0, b1b0, w2b0, b2b0 = expand_coupling(p0["coup2"])
    w1s0 = jnp.concatenate([w1a0, w1b0], axis=0)                   # (512, 48)
    b1s0 = jnp.concatenate([b1a0, b1b0], axis=0)                   # (512, 1)

    # ---- level 1: squeeze folded into column gathers -------------------------
    c1 = p1["conv_w"].shape[0]               # 192
    s1_1 = p1["split1"]                      # 48
    cols_u1 = [c0 * j + a for j in range(f) for a in range(s1_0)]
    cols_z2 = [c0 * j + s1_0 + b for j in range(f) for b in range(s2_0)]
    wc1 = p1["conv_w"].T
    wc1a = wc1[:, jnp.array(cols_u1)]                              # (192, 48)
    wc1b = wc1[:, jnp.array(cols_z2)]                              # (192, 144)

    cp1, cp2 = p1["coup1"], p1["coup2"]
    w1s1 = jnp.concatenate([cp1["w1"], cp2["w1"]], axis=1).T       # (64, 48)
    b1s1 = jnp.concatenate([cp1["b1"], cp2["b1"]], axis=1).T       # (64, 1)

    # ---- grouped channel-mean head (stays f32: only out_nc rows) ------------
    assert c1 % out_nc == 0
    groups = c1 // out_nc
    head = jnp.tile(jnp.eye(out_nc, dtype=jnp.float32), (1, groups)) / groups

    def b(x):
        return x.astype(bf16)

    return dict(
        w0=b(w0_fused),
        w1s0=b(w1s0), b1s0=b1s0.astype(jnp.float32),
        w2a0=b(w2a0), b2a0=b2a0.astype(jnp.float32),
        w2b0=b(w2b0), b2b0=b2b0.astype(jnp.float32),
        wc1a=b(wc1a), wc1b=b(wc1b),
        w1s1=b(w1s1), b1s1=b1s1.astype(jnp.float32),
        w2a1=b(cp1["w2"].T), b2a1=cp1["b2"].T.astype(jnp.float32),
        w2b1=b(cp2["w2"].T), b2b1=cp2["b2"].T.astype(jnp.float32),
        hda=head[:, :s1_1], hdb=head[:, s1_1:],
    )


# ----------------------------------------------------------------------------
# Wrapper: one pallas_call gridded over the FINAL point axis.
# ----------------------------------------------------------------------------
def _round_up(x, m):
    return (x + m - 1) // m * m


def inv_core_fused(feats, fp, out_nc, dimensions=3, tile_cap=2048):
    """feats: (N_points, in_nc) f32.  Returns (N_points / 64, out_nc) f32."""
    f = 2 ** dimensions
    n, _ = feats.shape
    c1 = fp["w0"].shape[0]                   # raw values per final point (192)
    assert n % (f * f) == 0
    n1 = n // (f * f)

    # Free reshape (consecutive-row squeeze) + one small transpose/cast of the
    # raw features into the lane-dense (C_raw, N_final) bf16 kernel layout.
    x = feats.reshape(n1, c1).T.astype(jnp.bfloat16)

    tm = min(tile_cap, _round_up(n1, 128))   # lane tile: multiple of 128
    n1p = _round_up(n1, tm)                  # cdiv-safe: pad, never whole-extent
    if n1p != n1:
        x = jnp.pad(x, ((0, 0), (0, n1p - n1)))

    names = ["w0", "w1s0", "b1s0", "w2a0", "b2a0", "w2b0", "b2b0",
             "wc1a", "wc1b", "w1s1", "b1s1", "w2a1", "b2a1", "w2b1", "b2b1",
             "hda", "hdb"]
    wargs = [fp[k] for k in names]

    def const(shape):
        return pl.BlockSpec(shape, lambda i: (0, 0))

    out = pl.pallas_call(
        _fused_kernel,
        out_shape=jax.ShapeDtypeStruct((out_nc, n1p), jnp.float32),
        grid=(n1p // tm,),
        in_specs=[pl.BlockSpec((c1, tm), lambda i: (0, i))]
                 + [const(a.shape) for a in wargs],
        out_specs=pl.BlockSpec((out_nc, tm), lambda i: (0, i)),
        compiler_params=pltpu.CompilerParams(
            dimension_semantics=("parallel",),        # megacore-shardable (v7x)
            vmem_limit_bytes=48 * 1024 * 1024),
    )(x, *wargs)
    return out[:, :n1].T


# ----------------------------------------------------------------------------
# Pure-JAX reference (same math, same bf16 matmul operands)
# ----------------------------------------------------------------------------
def _bf16_dot(a, b):
    return jnp.dot(a.astype(jnp.bfloat16), b.astype(jnp.bfloat16),
                   preferred_element_type=jnp.float32)


def inv_core_reference(feats, params, out_nc, dimensions=3):
    x = feats
    factor = 2 ** dimensions
    for p in params:
        n, c = x.shape
        x = x.reshape(n // factor, c * factor)
        x = _bf16_dot(x, p["conv_w"])
        for cp in (p["coup1"], p["coup2"]):
            s1 = p["split1"]
            x1, x2 = x[:, :s1], x[:, s1:]
            h = jnp.maximum(_bf16_dot(x1, cp["w1"]) + cp["b1"], 0.0)
            st = _bf16_dot(h, cp["w2"]) + cp["b2"]
            s2 = x.shape[1] - s1
            s, t = st[:, :s2], st[:, s2:]
            x = jnp.concatenate([x1, x2 * jnp.exp(jnp.tanh(s)) + t], axis=1)
    n, c = x.shape
    return x.reshape(n, c // out_nc, out_nc).mean(axis=1)


if __name__ == "__main__":
    M = 8            # out_nc
    N_LEVELS = 2
    DIMS = 3
    N_POINTS = 512   # divisible by (2**DIMS)**N_LEVELS = 64
    IN_NC = 3

    key = jax.random.PRNGKey(0)
    k_feat, k_par = jax.random.split(key)

    feats = jax.random.normal(k_feat, (N_POINTS, IN_NC), jnp.float32)
    params, _final_c = init_params(k_par, in_nc=IN_NC, n_levels=N_LEVELS,
                                   dimensions=DIMS, hidden=32)

    fused_params = prepare_fused_params(params, out_nc=M, dimensions=DIMS)
    fwd = jax.jit(functools.partial(inv_core_fused, out_nc=M, dimensions=DIMS))

    y = jax.block_until_ready(fwd(feats, fused_params))

    expected_rows = N_POINTS // ((2 ** DIMS) ** N_LEVELS)
    assert y.shape == (expected_rows, M), y.shape
    assert bool(jnp.all(jnp.isfinite(y)))

    y_ref = jax.block_until_ready(
        inv_core_reference(feats, params, out_nc=M, dimensions=DIMS))
    max_err = float(jnp.max(jnp.abs(y - y_ref)))
    assert max_err < 5e-2, f"max abs err {max_err}"

    print("KERNEL_OK")
</pallas_src>

<mosaic_0001>
module attributes {stable_mosaic.version = 11 : i64} {
  func.func @_fused_kernel(%arg0: i32, %arg1: memref<192x128xbf16, #tpu.memory_space<vmem>>, %arg2: memref<192x192xbf16, #tpu.memory_space<vmem>>, %arg3: memref<512x48xbf16, #tpu.memory_space<vmem>>, %arg4: memref<512x1xf32, #tpu.memory_space<vmem>>, %arg5: memref<288x256xbf16, #tpu.memory_space<vmem>>, %arg6: memref<288x1xf32, #tpu.memory_space<vmem>>, %arg7: memref<288x256xbf16, #tpu.memory_space<vmem>>, %arg8: memref<288x1xf32, #tpu.memory_space<vmem>>, %arg9: memref<192x48xbf16, #tpu.memory_space<vmem>>, %arg10: memref<192x144xbf16, #tpu.memory_space<vmem>>, %arg11: memref<64x48xbf16, #tpu.memory_space<vmem>>, %arg12: memref<64x1xf32, #tpu.memory_space<vmem>>, %arg13: memref<288x32xbf16, #tpu.memory_space<vmem>>, %arg14: memref<288x1xf32, #tpu.memory_space<vmem>>, %arg15: memref<288x32xbf16, #tpu.memory_space<vmem>>, %arg16: memref<288x1xf32, #tpu.memory_space<vmem>>, %arg17: memref<8x48xf32, #tpu.memory_space<vmem>>, %arg18: memref<8x144xf32, #tpu.memory_space<vmem>>, %arg19: memref<8x128xf32, #tpu.memory_space<vmem>>) attributes {dimension_semantics = [#tpu.dimension_semantics<parallel>], iteration_bounds = array<i64: 1>, scalar_prefetch = 0 : i64, scratch_operands = 0 : i64, tpu.core_type = #tpu.core_type<tc>, window_params = [{transform_indices = @transform_0, window_bounds = array<i64: 192, 128>}, {pipeline_mode = #tpu.pipeline_mode<synchronous>, transform_indices = @transform_1, window_bounds = array<i64: 192, 192>}, {pipeline_mode = #tpu.pipeline_mode<synchronous>, transform_indices = @transform_2, window_bounds = array<i64: 512, 48>}, {pipeline_mode = #tpu.pipeline_mode<synchronous>, transform_indices = @transform_3, window_bounds = array<i64: 512, 1>}, {pipeline_mode = #tpu.pipeline_mode<synchronous>, transform_indices = @transform_4, window_bounds = array<i64: 288, 256>}, {pipeline_mode = #tpu.pipeline_mode<synchronous>, transform_indices = @transform_5, window_bounds = array<i64: 288, 1>}, {pipeline_mode = #tpu.pipeline_mode<synchronous>, transform_indices = @transform_6, window_bounds = array<i64: 288, 256>}, {pipeline_mode = #tpu.pipeline_mode<synchronous>, transform_indices = @transform_7, window_bounds = array<i64: 288, 1>}, {pipeline_mode = #tpu.pipeline_mode<synchronous>, transform_indices = @transform_8, window_bounds = array<i64: 192, 48>}, {pipeline_mode = #tpu.pipeline_mode<synchronous>, transform_indices = @transform_9, window_bounds = array<i64: 192, 144>}, {pipeline_mode = #tpu.pipeline_mode<synchronous>, transform_indices = @transform_10, window_bounds = array<i64: 64, 48>}, {pipeline_mode = #tpu.pipeline_mode<synchronous>, transform_indices = @transform_11, window_bounds = array<i64: 64, 1>}, {pipeline_mode = #tpu.pipeline_mode<synchronous>, transform_indices = @transform_12, window_bounds = array<i64: 288, 32>}, {pipeline_mode = #tpu.pipeline_mode<synchronous>, transform_indices = @transform_13, window_bounds = array<i64: 288, 1>}, {pipeline_mode = #tpu.pipeline_mode<synchronous>, transform_indices = @transform_14, window_bounds = array<i64: 288, 32>}, {pipeline_mode = #tpu.pipeline_mode<synchronous>, transform_indices = @transform_15, window_bounds = array<i64: 288, 1>}, {pipeline_mode = #tpu.pipeline_mode<synchronous>, transform_indices = @transform_16, window_bounds = array<i64: 8, 48>}, {pipeline_mode = #tpu.pipeline_mode<synchronous>, transform_indices = @transform_17, window_bounds = array<i64: 8, 144>}, {transform_indices = @transform_18, window_bounds = array<i64: 8, 128>}]} {
    %c0 = arith.constant 0 : index
    %c0_0 = arith.constant 0 : index
    %0 = vector.load %arg1[%c0, %c0_0] : memref<192x128xbf16, #tpu.memory_space<vmem>>, vector<192x128xbf16>
    %c0_1 = arith.constant 0 : index
    %c0_2 = arith.constant 0 : index
    %1 = vector.load %arg2[%c0_1, %c0_2] : memref<192x192xbf16, #tpu.memory_space<vmem>>, vector<192x192xbf16>
    %cst = arith.constant dense<0.000000e+00> : vector<192x128xf32>
    %2 = tpu.matmul %1, %0, %cst {dimension_numbers = #tpu.dot_dimension_numbers<[1], [0], [0], [1], [0, 0, 1, 1], [], []>} : vector<192x192xbf16>, vector<192x128xbf16>, vector<192x128xf32> -> vector<192x128xf32>
    %3 = vector.extract_strided_slice %2 {offsets = [0, 0], sizes = [48, 128], strides = [1, 1]} : vector<192x128xf32> to vector<48x128xf32>
    %4 = vector.extract_strided_slice %2 {offsets = [48, 0], sizes = [144, 128], strides = [1, 1]} : vector<192x128xf32> to vector<144x128xf32>
    %5 = arith.truncf %3 : vector<48x128xf32> to vector<48x128xbf16>
    %c0_3 = arith.constant 0 : index
    %c0_4 = arith.constant 0 : index
    %6 = vector.load %arg3[%c0_3, %c0_4] : memref<512x48xbf16, #tpu.memory_space<vmem>>, vector<512x48xbf16>
    %cst_5 = arith.constant dense<0.000000e+00> : vector<512x128xf32>
    %7 = tpu.matmul %6, %5, %cst_5 {dimension_numbers = #tpu.dot_dimension_numbers<[1], [0], [0], [1], [0, 0, 1, 1], [], []>} : vector<512x48xbf16>, vector<48x128xbf16>, vector<512x128xf32> -> vector<512x128xf32>
    %c0_6 = arith.constant 0 : index
    %c0_7 = arith.constant 0 : index
    %8 = vector.load %arg4[%c0_6, %c0_7] : memref<512x1xf32, #tpu.memory_space<vmem>>, vector<512x1xf32>
    %9 = vector.broadcast %8 : vector<512x1xf32> to vector<512x128xf32>
    %10 = arith.addf %7, %9 : vector<512x128xf32>
    %cst_8 = arith.constant 0.000000e+00 : f32
    %11 = vector.broadcast %cst_8 : f32 to vector<512x128xf32>
    %12 = arith.maximumf %10, %11 : vector<512x128xf32>
    %c0_9 = arith.constant 0 : index
    %c0_10 = arith.constant 0 : index
    %13 = vector.load %arg5[%c0_9, %c0_10] : memref<288x256xbf16, #tpu.memory_space<vmem>>, vector<288x256xbf16>
    %14 = vector.extract_strided_slice %12 {offsets = [0, 0], sizes = [256, 128], strides = [1, 1]} : vector<512x128xf32> to vector<256x128xf32>
    %15 = arith.truncf %14 : vector<256x128xf32> to vector<256x128xbf16>
    %cst_11 = arith.constant dense<0.000000e+00> : vector<288x128xf32>
    %16 = tpu.matmul %13, %15, %cst_11 {dimension_numbers = #tpu.dot_dimension_numbers<[1], [0], [0], [1], [0, 0, 1, 1], [], []>} : vector<288x256xbf16>, vector<256x128xbf16>, vector<288x128xf32> -> vector<288x128xf32>
    %c0_12 = arith.constant 0 : index
    %c0_13 = arith.constant 0 : index
    %17 = vector.load %arg6[%c0_12, %c0_13] : memref<288x1xf32, #tpu.memory_space<vmem>>, vector<288x1xf32>
    %18 = vector.broadcast %17 : vector<288x1xf32> to vector<288x128xf32>
    %19 = arith.addf %16, %18 : vector<288x128xf32>
    %20 = vector.extract_strided_slice %19 {offsets = [0, 0], sizes = [144, 128], strides = [1, 1]} : vector<288x128xf32> to vector<144x128xf32>
    %21 = math.tanh %20 : vector<144x128xf32>
    %22 = math.exp %21 : vector<144x128xf32>
    %23 = arith.mulf %4, %22 : vector<144x128xf32>
    %24 = vector.extract_strided_slice %19 {offsets = [144, 0], sizes = [144, 128], strides = [1, 1]} : vector<288x128xf32> to vector<144x128xf32>
    %25 = arith.addf %23, %24 : vector<144x128xf32>
    %c0_14 = arith.constant 0 : index
    %c0_15 = arith.constant 0 : index
    %26 = vector.load %arg7[%c0_14, %c0_15] : memref<288x256xbf16, #tpu.memory_space<vmem>>, vector<288x256xbf16>
    %27 = vector.extract_strided_slice %12 {offsets = [256, 0], sizes = [256, 128], strides = [1, 1]} : vector<512x128xf32> to vector<256x128xf32>
    %28 = arith.truncf %27 : vector<256x128xf32> to vector<256x128xbf16>
    %cst_16 = arith.constant dense<0.000000e+00> : vector<288x128xf32>
    %29 = tpu.matmul %26, %28, %cst_16 {dimension_numbers = #tpu.dot_dimension_numbers<[1], [0], [0], [1], [0, 0, 1, 1], [], []>} : vector<288x256xbf16>, vector<256x128xbf16>, vector<288x128xf32> -> vector<288x128xf32>
    %c0_17 = arith.constant 0 : index
    %c0_18 = arith.constant 0 : index
    %30 = vector.load %arg8[%c0_17, %c0_18] : memref<288x1xf32, #tpu.memory_space<vmem>>, vector<288x1xf32>
    %31 = vector.broadcast %30 : vector<288x1xf32> to vector<288x128xf32>
    %32 = arith.addf %29, %31 : vector<288x128xf32>
    %33 = vector.extract_strided_slice %32 {offsets = [0, 0], sizes = [144, 128], strides = [1, 1]} : vector<288x128xf32> to vector<144x128xf32>
    %34 = math.tanh %33 : vector<144x128xf32>
    %35 = math.exp %34 : vector<144x128xf32>
    %36 = arith.mulf %25, %35 : vector<144x128xf32>
    %37 = vector.extract_strided_slice %32 {offsets = [144, 0], sizes = [144, 128], strides = [1, 1]} : vector<288x128xf32> to vector<144x128xf32>
    %38 = arith.addf %36, %37 : vector<144x128xf32>
    %c0_19 = arith.constant 0 : index
    %c0_20 = arith.constant 0 : index
    %39 = vector.load %arg9[%c0_19, %c0_20] : memref<192x48xbf16, #tpu.memory_space<vmem>>, vector<192x48xbf16>
    %cst_21 = arith.constant dense<0.000000e+00> : vector<192x128xf32>
    %40 = tpu.matmul %39, %5, %cst_21 {dimension_numbers = #tpu.dot_dimension_numbers<[1], [0], [0], [1], [0, 0, 1, 1], [], []>} : vector<192x48xbf16>, vector<48x128xbf16>, vector<192x128xf32> -> vector<192x128xf32>
    %c0_22 = arith.constant 0 : index
    %c0_23 = arith.constant 0 : index
    %41 = vector.load %arg10[%c0_22, %c0_23] : memref<192x144xbf16, #tpu.memory_space<vmem>>, vector<192x144xbf16>
    %42 = arith.truncf %38 : vector<144x128xf32> to vector<144x128xbf16>
    %cst_24 = arith.constant dense<0.000000e+00> : vector<192x128xf32>
    %43 = tpu.matmul %41, %42, %cst_24 {dimension_numbers = #tpu.dot_dimension_numbers<[1], [0], [0], [1], [0, 0, 1, 1], [], []>} : vector<192x144xbf16>, vector<144x128xbf16>, vector<192x128xf32> -> vector<192x128xf32>
    %44 = arith.addf %40, %43 : vector<192x128xf32>
    %45 = vector.extract_strided_slice %44 {offsets = [0, 0], sizes = [48, 128], strides = [1, 1]} : vector<192x128xf32> to vector<48x128xf32>
    %46 = vector.extract_strided_slice %44 {offsets = [48, 0], sizes = [144, 128], strides = [1, 1]} : vector<192x128xf32> to vector<144x128xf32>
    %47 = arith.truncf %45 : vector<48x128xf32> to vector<48x128xbf16>
    %c0_25 = arith.constant 0 : index
    %c0_26 = arith.constant 0 : index
    %48 = vector.load %arg11[%c0_25, %c0_26] : memref<64x48xbf16, #tpu.memory_space<vmem>>, vector<64x48xbf16>
    %cst_27 = arith.constant dense<0.000000e+00> : vector<64x128xf32>
    %49 = tpu.matmul %48, %47, %cst_27 {dimension_numbers = #tpu.dot_dimension_numbers<[1], [0], [0], [1], [0, 0, 1, 1], [], []>} : vector<64x48xbf16>, vector<48x128xbf16>, vector<64x128xf32> -> vector<64x128xf32>
    %c0_28 = arith.constant 0 : index
    %c0_29 = arith.constant 0 : index
    %50 = vector.load %arg12[%c0_28, %c0_29] : memref<64x1xf32, #tpu.memory_space<vmem>>, vector<64x1xf32>
    %51 = vector.broadcast %50 : vector<64x1xf32> to vector<64x128xf32>
    %52 = arith.addf %49, %51 : vector<64x128xf32>
    %cst_30 = arith.constant 0.000000e+00 : f32
    %53 = vector.broadcast %cst_30 : f32 to vector<64x128xf32>
    %54 = arith.maximumf %52, %53 : vector<64x128xf32>
    %c0_31 = arith.constant 0 : index
    %c0_32 = arith.constant 0 : index
    %55 = vector.load %arg13[%c0_31, %c0_32] : memref<288x32xbf16, #tpu.memory_space<vmem>>, vector<288x32xbf16>
    %56 = vector.extract_strided_slice %54 {offsets = [0, 0], sizes = [32, 128], strides = [1, 1]} : vector<64x128xf32> to vector<32x128xf32>
    %57 = arith.truncf %56 : vector<32x128xf32> to vector<32x128xbf16>
    %cst_33 = arith.constant dense<0.000000e+00> : vector<288x128xf32>
    %58 = tpu.matmul %55, %57, %cst_33 {dimension_numbers = #tpu.dot_dimension_numbers<[1], [0], [0], [1], [0, 0, 1, 1], [], []>} : vector<288x32xbf16>, vector<32x128xbf16>, vector<288x128xf32> -> vector<288x128xf32>
    %c0_34 = arith.constant 0 : index
    %c0_35 = arith.constant 0 : index
    %59 = vector.load %arg14[%c0_34, %c0_35] : memref<288x1xf32, #tpu.memory_space<vmem>>, vector<288x1xf32>
    %60 = vector.broadcast %59 : vector<288x1xf32> to vector<288x128xf32>
    %61 = arith.addf %58, %60 : vector<288x128xf32>
    %62 = vector.extract_strided_slice %61 {offsets = [0, 0], sizes = [144, 128], strides = [1, 1]} : vector<288x128xf32> to vector<144x128xf32>
    %63 = math.tanh %62 : vector<144x128xf32>
    %64 = math.exp %63 : vector<144x128xf32>
    %65 = arith.mulf %46, %64 : vector<144x128xf32>
    %66 = vector.extract_strided_slice %61 {offsets = [144, 0], sizes = [144, 128], strides = [1, 1]} : vector<288x128xf32> to vector<144x128xf32>
    %67 = arith.addf %65, %66 : vector<144x128xf32>
    %c0_36 = arith.constant 0 : index
    %c0_37 = arith.constant 0 : index
    %68 = vector.load %arg15[%c0_36, %c0_37] : memref<288x32xbf16, #tpu.memory_space<vmem>>, vector<288x32xbf16>
    %69 = vector.extract_strided_slice %54 {offsets = [32, 0], sizes = [32, 128], strides = [1, 1]} : vector<64x128xf32> to vector<32x128xf32>
    %70 = arith.truncf %69 : vector<32x128xf32> to vector<32x128xbf16>
    %cst_38 = arith.constant dense<0.000000e+00> : vector<288x128xf32>
    %71 = tpu.matmul %68, %70, %cst_38 {dimension_numbers = #tpu.dot_dimension_numbers<[1], [0], [0], [1], [0, 0, 1, 1], [], []>} : vector<288x32xbf16>, vector<32x128xbf16>, vector<288x128xf32> -> vector<288x128xf32>
    %c0_39 = arith.constant 0 : index
    %c0_40 = arith.constant 0 : index
    %72 = vector.load %arg16[%c0_39, %c0_40] : memref<288x1xf32, #tpu.memory_space<vmem>>, vector<288x1xf32>
    %73 = vector.broadcast %72 : vector<288x1xf32> to vector<288x128xf32>
    %74 = arith.addf %71, %73 : vector<288x128xf32>
    %75 = vector.extract_strided_slice %74 {offsets = [0, 0], sizes = [144, 128], strides = [1, 1]} : vector<288x128xf32> to vector<144x128xf32>
    %76 = math.tanh %75 : vector<144x128xf32>
    %77 = math.exp %76 : vector<144x128xf32>
    %78 = arith.mulf %67, %77 : vector<144x128xf32>
    %79 = vector.extract_strided_slice %74 {offsets = [144, 0], sizes = [144, 128], strides = [1, 1]} : vector<288x128xf32> to vector<144x128xf32>
    %80 = arith.addf %78, %79 : vector<144x128xf32>
    %c0_41 = arith.constant 0 : index
    %c0_42 = arith.constant 0 : index
    %81 = vector.load %arg17[%c0_41, %c0_42] : memref<8x48xf32, #tpu.memory_space<vmem>>, vector<8x48xf32>
    %cst_43 = arith.constant dense<0.000000e+00> : vector<8x128xf32>
    %82 = tpu.matmul %81, %45, %cst_43 {dimension_numbers = #tpu.dot_dimension_numbers<[1], [0], [0], [1], [0, 0, 1, 1], [], []>} : vector<8x48xf32>, vector<48x128xf32>, vector<8x128xf32> -> vector<8x128xf32>
    %c0_44 = arith.constant 0 : index
    %c0_45 = arith.constant 0 : index
    %83 = vector.load %arg18[%c0_44, %c0_45] : memref<8x144xf32, #tpu.memory_space<vmem>>, vector<8x144xf32>
    %cst_46 = arith.constant dense<0.000000e+00> : vector<8x128xf32>
    %84 = tpu.matmul %83, %80, %cst_46 {dimension_numbers = #tpu.dot_dimension_numbers<[1], [0], [0], [1], [0, 0, 1, 1], [], []>} : vector<8x144xf32>, vector<144x128xf32>, vector<8x128xf32> -> vector<8x128xf32>
    %85 = arith.addf %82, %84 : vector<8x128xf32>
    %c0_47 = arith.constant 0 : index
    %c0_48 = arith.constant 0 : index
    %86 = vector.load %arg19[%c0_47, %c0_48] : memref<8x128xf32, #tpu.memory_space<vmem>>, vector<8x128xf32>
    tpu.vector_store %arg19[%c0_47, %c0_48], %85 {strides = array<i32>} : memref<8x128xf32, #tpu.memory_space<vmem>>, vector<8x128xf32>,
    return
  }
  func.func @transform_0(%arg0: i32) -> (i32, i32) {
    %c0_i32 = arith.constant 0 : i32
    %c0_i32_0 = arith.constant 0 : i32
    return %c0_i32, %arg0 : i32, i32
  }
  func.func @transform_1(%arg0: i32) -> (i32, i32) {
    %c0_i32 = arith.constant 0 : i32
    %c0_i32_0 = arith.constant 0 : i32
    %c0_i32_1 = arith.constant 0 : i32
    return %c0_i32, %c0_i32_0 : i32, i32
  }
  func.func @transform_2(%arg0: i32) -> (i32, i32) {
    %c0_i32 = arith.constant 0 : i32
    %c0_i32_0 = arith.constant 0 : i32
    %c0_i32_1 = arith.constant 0 : i32
    return %c0_i32, %c0_i32_0 : i32, i32
  }
  func.func @transform_3(%arg0: i32) -> (i32, i32) {
    %c0_i32 = arith.constant 0 : i32
    %c0_i32_0 = arith.constant 0 : i32
    %c0_i32_1 = arith.constant 0 : i32
    return %c0_i32, %c0_i32_0 : i32, i32
  }
  func.func @transform_4(%arg0: i32) -> (i32, i32) {
    %c0_i32 = arith.constant 0 : i32
    %c0_i32_0 = arith.constant 0 : i32
    %c0_i32_1 = arith.constant 0 : i32
    return %c0_i32, %c0_i32_0 : i32, i32
  }
  func.func @transform_5(%arg0: i32) -> (i32, i32) {
    %c0_i32 = arith.constant 0 : i32
    %c0_i32_0 = arith.constant 0 : i32
    %c0_i32_1 = arith.constant 0 : i32
    return %c0_i32, %c0_i32_0 : i32, i32
  }
  func.func @transform_6(%arg0: i32) -> (i32, i32) {
    %c0_i32 = arith.constant 0 : i32
    %c0_i32_0 = arith.constant 0 : i32
    %c0_i32_1 = arith.constant 0 : i32
    return %c0_i32, %c0_i32_0 : i32, i32
  }
  func.func @transform_7(%arg0: i32) -> (i32, i32) {
    %c0_i32 = arith.constant 0 : i32
    %c0_i32_0 = arith.constant 0 : i32
    %c0_i32_1 = arith.constant 0 : i32
    return %c0_i32, %c0_i32_0 : i32, i32
  }
  func.func @transform_8(%arg0: i32) -> (i32, i32) {
    %c0_i32 = arith.constant 0 : i32
    %c0_i32_0 = arith.constant 0 : i32
    %c0_i32_1 = arith.constant 0 : i32
    return %c0_i32, %c0_i32_0 : i32, i32
  }
  func.func @transform_9(%arg0: i32) -> (i32, i32) {
    %c0_i32 = arith.constant 0 : i32
    %c0_i32_0 = arith.constant 0 : i32
    %c0_i32_1 = arith.constant 0 : i32
    return %c0_i32, %c0_i32_0 : i32, i32
  }
  func.func @transform_10(%arg0: i32) -> (i32, i32) {
    %c0_i32 = arith.constant 0 : i32
    %c0_i32_0 = arith.constant 0 : i32
    %c0_i32_1 = arith.constant 0 : i32
    return %c0_i32, %c0_i32_0 : i32, i32
  }
  func.func @transform_11(%arg0: i32) -> (i32, i32) {
    %c0_i32 = arith.constant 0 : i32
    %c0_i32_0 = arith.constant 0 : i32
    %c0_i32_1 = arith.constant 0 : i32
    return %c0_i32, %c0_i32_0 : i32, i32
  }
  func.func @transform_12(%arg0: i32) -> (i32, i32) {
    %c0_i32 = arith.constant 0 : i32
    %c0_i32_0 = arith.constant 0 : i32
    %c0_i32_1 = arith.constant 0 : i32
    return %c0_i32, %c0_i32_0 : i32, i32
  }
  func.func @transform_13(%arg0: i32) -> (i32, i32) {
    %c0_i32 = arith.constant 0 : i32
    %c0_i32_0 = arith.constant 0 : i32
    %c0_i32_1 = arith.constant 0 : i32
    return %c0_i32, %c0_i32_0 : i32, i32
  }
  func.func @transform_14(%arg0: i32) -> (i32, i32) {
    %c0_i32 = arith.constant 0 : i32
    %c0_i32_0 = arith.constant 0 : i32
    %c0_i32_1 = arith.constant 0 : i32
    return %c0_i32, %c0_i32_0 : i32, i32
  }
  func.func @transform_15(%arg0: i32) -> (i32, i32) {
    %c0_i32 = arith.constant 0 : i32
    %c0_i32_0 = arith.constant 0 : i32
    %c0_i32_1 = arith.constant 0 : i32
    return %c0_i32, %c0_i32_0 : i32, i32
  }
  func.func @transform_16(%arg0: i32) -> (i32, i32) {
    %c0_i32 = arith.constant 0 : i32
    %c0_i32_0 = arith.constant 0 : i32
    %c0_i32_1 = arith.constant 0 : i32
    return %c0_i32, %c0_i32_0 : i32, i32
  }
  func.func @transform_17(%arg0: i32) -> (i32, i32) {
    %c0_i32 = arith.constant 0 : i32
    %c0_i32_0 = arith.constant 0 : i32
    %c0_i32_1 = arith.constant 0 : i32
    return %c0_i32, %c0_i32_0 : i32, i32
  }
  func.func @transform_18(%arg0: i32) -> (i32, i32) {
    %c0_i32 = arith.constant 0 : i32
    %c0_i32_0 = arith.constant 0 : i32
    return %c0_i32, %arg0 : i32, i32
  }
}

</mosaic_0001>

<bundles_post_ra>
// kernel: inv_core_fused.1
= control target key start
LH: loop header
LB: loop body
LE: loop exit
PB: predicated region body
PF: predicated region fallthrough
CT: control target
= control target key end

     0   :  { %v8957_v0 = vmov 0   ;;  %vm288_vm0 = vcmask 523264   ;;  %vm1065_vm1 = vcmask 392192   ;;  %vm3110_vm2 = vcmask 130048   ;;  %s8935_s3 = inlined_call_operand.vmem [shape: f32[512,1], index: 3, kind: input, shape index: {}]   ;;  %s8936_s0 = inlined_call_operand.vmem [shape: bf16[192,128], index: 0, kind: input, shape index: {}]   ;;  %s8937_s1 = inlined_call_operand.vmem [shape: bf16[192,192], index: 1, kind: input, shape index: {}]   ;;  %s8938_s5 = inlined_call_operand.vmem [shape: f32[288,1], index: 5, kind: input, shape index: {}]   ;;  %s8939_s7 = inlined_call_operand.vmem [shape: f32[288,1], index: 7, kind: input, shape index: {}]   ;;  %s8940_s2 = inlined_call_operand.vmem [shape: bf16[512,48], index: 2, kind: input, shape index: {}]   ;;  %s8941_s11 = inlined_call_operand.vmem [shape: f32[64,1], index: 11, kind: input, shape index: {}]   ;;  %s8942_s13 = inlined_call_operand.vmem [shape: f32[288,1], index: 13, kind: input, shape index: {}]   ;;  %s8943_s15 = inlined_call_operand.vmem [shape: f32[288,1], index: 15, kind: input, shape index: {}]   ;;  %s8944_s4 = inlined_call_operand.vmem [shape: bf16[288,256], index: 4, kind: input, shape index: {}]   ;;  %s8945_s6 = inlined_call_operand.vmem [shape: bf16[288,256], index: 6, kind: input, shape index: {}]   ;;  %s8946_s8 = inlined_call_operand.vmem [shape: bf16[192,48], index: 8, kind: input, shape index: {}]   ;;  %s8947_s9 = inlined_call_operand.vmem [shape: bf16[192,144], index: 9, kind: input, shape index: {}]   ;;  %s8948_s10 = inlined_call_operand.vmem [shape: bf16[64,48], index: 10, kind: input, shape index: {}]   ;;  %s8949_s12 = inlined_call_operand.vmem [shape: bf16[288,32], index: 12, kind: input, shape index: {}]   ;;  %s8950_s14 = inlined_call_operand.vmem [shape: bf16[288,32], index: 14, kind: input, shape index: {}]   ;;  %s8951_s17 = inlined_call_operand.vmem [shape: f32[8,144], index: 17, kind: input, shape index: {}]   ;;  %s8952_s16 = inlined_call_operand.vmem [shape: f32[8,48], index: 16, kind: input, shape index: {}]   ;;  %s8953_s18 = inlined_call_operand.vmem [shape: f32[8,128], index: 18, kind: output, shape index: {}]  }
   0x1   :  { %8970 = sst [smem:[#allocation76_spill]] %s8935_s3  ;;  %5832 = vset.pattern.permute.xlu1 %v8957_v0  ;;  %5831 = vset.pattern.permute.xlu0 %v8957_v0  ;;  %vm4009_vm3 = vcmask 261120   ;;  %vm6399_vm4 = vmmov 0  }
   0x2   :  { %8971 = sst [smem:[#allocation77_spill]] %s8936_s0  ;;  %s8973_s29 = sld [smem:[#allocation76_spill]]  ;;  %325 = vmatprep.subr.bf16.mxu0 %v8957_v0 }
   0x3   :  { %8972 = sst [smem:[#allocation78_spill]] %s8937_s1  ;;  %s8974_s20 = sld [smem:[#allocation77_spill]] }
   0x4   :  { %s8975_s26 = sld [smem:[#allocation78_spill]] }
   0x8   :  { %v523_v1 = vld [vmem:[%s8973_s29 + $0x10] sm:$0xff]  ;;  %v521_v2 = vld [vmem:[%s8973_s29] sm:$0xff]  ;;  %v524_v4 = vld [vmem:[%s8973_s29 + $0x18] sm:$0xff] }
   0x9   :  { %597 = vperm.xlu1 %5832, %v523_v1   ;;  %587 = vperm.xlu0 %5831, %v521_v2   ;;  %v5833_v3 = vld [vmem:[%s8974_s20] sm:$0xff]   ;;  %v522_v5 = vld [vmem:[%s8973_s29 + $0x8] sm:$0xff]  ;;  %v5835_v9 = vld [vmem:[%s8974_s20 + $0x10] sm:$0xff]  }
   0xa   :  { %326 = vmatpush1.bf16.msra.mxu0 %v5833_v3  ;;  %v5834_v6 = vld [vmem:[%s8974_s20 + $0x8] sm:$0xff]   ;;  %v553_v8 = vld [vmem:[%s8973_s29 + $0x100] sm:$0xff]  ;;  %v5836_v12 = vld [vmem:[%s8974_s20 + $0x18] sm:$0xff]  }
   0xb   :  { %327 = vmatprep.subr.bf16.mxu0 %v8957_v0  ;;  %v554_v7 = vld [vmem:[%s8973_s29 + $0x108] sm:$0xff]  ;;  %v525_v11 = vld [vmem:[%s8973_s29 + $0x20] sm:$0xff]  ;;  %v556_v13 = vld [vmem:[%s8973_s29 + $0x118] sm:$0xff] }
   0xc   :  { %v526_v10 = vld [vmem:[%s8973_s29 + $0x28] sm:$0xff]  ;;  %v555_v14 = vld [vmem:[%s8973_s29 + $0x110] sm:$0xff]  ;;  %v5837_v15 = vld [vmem:[%s8974_s20 + $0x20] sm:$0xff]  }
   0xd   :  { %602 = vperm.xlu1 %5832, %v524_v4   ;;  %592 = vperm.xlu0 %5831, %v522_v5   ;;  %v528_v16 = vld [vmem:[%s8973_s29 + $0x38] sm:$0xff]  ;;  %v527_v17 = vld [vmem:[%s8973_s29 + $0x30] sm:$0xff]  ;;  %v5838_v18 = vld [vmem:[%s8974_s20 + $0x28] sm:$0xff]  }
   0xe   :  { %328 = vmatpush1.bf16.msra.mxu0 %v5834_v6  ;;  %v5847_v19 = vld [vmem:[%s8975_s26 + $0x4] ss:$8 sps:$4 sm:$0xff]   ;;  %v5839_v22 = vld [vmem:[%s8974_s20 + $0x30] sm:$0xff]   ;;  %v5840_v25 = vld [vmem:[%s8974_s20 + $0x38] sm:$0xff]  }
   0xf   :  { %329 = vmatprep.subr.bf16.mxu0 %v8957_v0  ;;  %v558_v20 = vld [vmem:[%s8973_s29 + $0x128] sm:$0xff]  ;;  %v557_v21 = vld [vmem:[%s8973_s29 + $0x120] sm:$0xff]  ;;  %5186 = vmatprep.mubr.msk.bf16.mxu0 %vm288_vm0, %v5847_v19  ;;  %v560_v26 = vld [vmem:[%s8973_s29 + $0x138] sm:$0xff] }
  0x10   :  { %v530_v23 = vld [vmem:[%s8973_s29 + $0x48] sm:$0xff]  ;;  %v529_v24 = vld [vmem:[%s8973_s29 + $0x40] sm:$0xff]  ;;  %v559_v27 = vld [vmem:[%s8973_s29 + $0x130] sm:$0xff] }
  0x11   :  { %752 = vperm.xlu1 %5832, %v554_v7   ;;  %747 = vperm.xlu0 %5831, %v553_v8   ;;  %v5841_v28 = vld [vmem:[%s8974_s20 + $0x40] sm:$0xff]   ;;  %v532_v29 = vld [vmem:[%s8973_s29 + $0x58] sm:$0xff]  ;;  %v531_v30 = vld [vmem:[%s8973_s29 + $0x50] sm:$0xff] }
  0x12   :  { %330 = vmatpush1.bf16.msra.mxu0 %v5835_v9  ;;  %v5842_v31 = vld [vmem:[%s8974_s20 + $0x48] sm:$0xff]   ;;  %v561_v33 = vld [vmem:[%s8973_s29 + $0x140] sm:$0xff]  ;;  %v5843_v34 = vld [vmem:[%s8974_s20 + $0x50] sm:$0xff]  }
  0x13   :  { %331 = vmatprep.subr.bf16.mxu0 %v8957_v0  ;;  %v562_v32 = vld [vmem:[%s8973_s29 + $0x148] sm:$0xff]  ;;  %v533_v36 = vld [vmem:[%s8973_s29 + $0x60] sm:$0xff]  ;;  %v5844_v37 = vld [vmem:[%s8974_s20 + $0x58] sm:$0xff]  }
  0x14   :  { %v534_v35 = vld [vmem:[%s8973_s29 + $0x68] sm:$0xff]  ;;  %v564_v38 = vld [vmem:[%s8973_s29 + $0x158] sm:$0xff]  ;;  %v563_v39 = vld [vmem:[%s8973_s29 + $0x150] sm:$0xff] }
  0x15   :  { %612 = vperm.xlu1 %5832, %v526_v10   ;;  %607 = vperm.xlu0 %5831, %v525_v11   ;;  %v5845_v40 = vld [vmem:[%s8975_s26] ss:$8 sps:$4 sm:$0xff]   ;;  %v5848_v41 = vld [vmem:[%s8975_s26 + $0x14] ss:$8 sps:$4 sm:$0xff]   ;;  %v5850_v46 = vld [vmem:[%s8975_s26 + $0x10] ss:$8 sps:$4 sm:$0xff]  }
  0x16   :  { %332 = vmatpush1.bf16.msra.mxu0 %v5836_v12  ;;  %v536_v42 = vld [vmem:[%s8973_s29 + $0x78] sm:$0xff]  ;;  %v535_v43 = vld [vmem:[%s8973_s29 + $0x70] sm:$0xff]  ;;  %v566_v44 = vld [vmem:[%s8973_s29 + $0x168] sm:$0xff] }
  0x17   :  { %333 = vmatprep.subr.bf16.mxu0 %v8957_v0  ;;  %v565_v45 = vld [vmem:[%s8973_s29 + $0x160] sm:$0xff]  ;;  %v538_v48 = vld [vmem:[%s8973_s29 + $0x88] sm:$0xff]  ;;  %v568_v50 = vld [vmem:[%s8973_s29 + $0x178] sm:$0xff] }
  0x18   :  { %v5851_v47 = vld [vmem:[%s8975_s26 + $0x24] ss:$8 sps:$4 sm:$0xff]   ;;  %v567_v51 = vld [vmem:[%s8973_s29 + $0x170] sm:$0xff]  ;;  %v5853_v52 = vld [vmem:[%s8975_s26 + $0x20] ss:$8 sps:$4 sm:$0xff]  }
  0x19   :  { %762 = vperm.xlu1 %5832, %v556_v13   ;;  %757 = vperm.xlu0 %5831, %v555_v14   ;;  %v537_v49 = vld [vmem:[%s8973_s29 + $0x80] sm:$0xff]  ;;  %v540_v53 = vld [vmem:[%s8973_s29 + $0x98] sm:$0xff]  ;;  %v539_v54 = vld [vmem:[%s8973_s29 + $0x90] sm:$0xff] }
  0x1a   :  { %334 = vmatpush1.bf16.msra.mxu0 %v5837_v15  ;;  %v570_v55 = vld [vmem:[%s8973_s29 + $0x188] sm:$0xff]  ;;  %v569_v56 = vld [vmem:[%s8973_s29 + $0x180] sm:$0xff]  ;;  %v572_v59 = vld [vmem:[%s8973_s29 + $0x198] sm:$0xff] }
  0x1b   :  { %335 = vmatprep.subr.bf16.mxu0 %v8957_v0  ;;  %v542_v57 = vld [vmem:[%s8973_s29 + $0xa8] sm:$0xff]  ;;  %v541_v58 = vld [vmem:[%s8973_s29 + $0xa0] sm:$0xff]  ;;  %v571_v60 = vld [vmem:[%s8973_s29 + $0x190] sm:$0xff] }
  0x1c   :  { %v544_v61 = vld [vmem:[%s8973_s29 + $0xb8] sm:$0xff]  ;;  %v543_v62 = vld [vmem:[%s8973_s29 + $0xb0] sm:$0xff]  ;;  %v574_v63 = vld [vmem:[%s8973_s29 + $0x1a8] sm:$0xff] }
  0x1d   :  { %622 = vperm.xlu1 %5832, %v528_v16   ;;  %617 = vperm.xlu0 %5831, %v527_v17   ;;  %v573_v1 = vld [vmem:[%s8973_s29 + $0x1a0] sm:$0xff]  ;;  %v546_v2 = vld [vmem:[%s8973_s29 + $0xc8] sm:$0xff]  ;;  %v576_v4 = vld [vmem:[%s8973_s29 + $0x1b8] sm:$0xff] }
  0x1e   :  { %336 = vmatpush1.bf16.msra.mxu0 %v5838_v18  ;;  %v545_v3 = vld [vmem:[%s8973_s29 + $0xc0] sm:$0xff]  ;;  %v575_v5 = vld [vmem:[%s8973_s29 + $0x1b0] sm:$0xff]  ;;  %v548_v6 = vld [vmem:[%s8973_s29 + $0xd8] sm:$0xff] }
  0x1f   :  { %337 = vmatprep.subr.bf16.mxu0 %v8957_v0  ;;  %v547_v7 = vld [vmem:[%s8973_s29 + $0xd0] sm:$0xff]  ;;  %v578_v8 = vld [vmem:[%s8973_s29 + $0x1c8] sm:$0xff]  ;;  %v577_v9 = vld [vmem:[%s8973_s29 + $0x1c0] sm:$0xff] }
  0x20   :  { %v550_v10 = vld [vmem:[%s8973_s29 + $0xe8] sm:$0xff]  ;;  %v549_v11 = vld [vmem:[%s8973_s29 + $0xe0] sm:$0xff]  ;;  %v580_v12 = vld [vmem:[%s8973_s29 + $0x1d8] sm:$0xff] }
  0x21   :  { %772 = vperm.xlu1 %5832, %v558_v20   ;;  %767 = vperm.xlu0 %5831, %v557_v21   ;;  %v579_v13 = vld [vmem:[%s8973_s29 + $0x1d0] sm:$0xff]  ;;  %v552_v14 = vld [vmem:[%s8973_s29 + $0xf8] sm:$0xff]  ;;  %v582_v16 = vld [vmem:[%s8973_s29 + $0x1e8] sm:$0xff] }
  0x22   :  { %338 = vmatpush1.bf16.msra.mxu0 %v5839_v22  ;;  %v551_v15 = vld [vmem:[%s8973_s29 + $0xf0] sm:$0xff]  ;;  %v581_v17 = vld [vmem:[%s8973_s29 + $0x1e0] sm:$0xff]  ;;  %v584_v18 = vld [vmem:[%s8973_s29 + $0x1f8] sm:$0xff] }
  0x23   :  { %339 = vmatprep.subr.bf16.mxu0 %v8957_v0  ;;  %v583_v19 = vld [vmem:[%s8973_s29 + $0x1f0] sm:$0xff]  ;;  %v1568_v20 = vld [vmem:[%s8938_s5 + $0x8] sm:$0xff]  ;;  %v1567_v21 = vld [vmem:[%s8938_s5] sm:$0xff] }
  0x25   :  { %632 = vperm.xlu1 %5832, %v530_v23   ;;  %627 = vperm.xlu0 %5831, %v529_v24   ;;  %v1570_v24 = vld [vmem:[%s8938_s5 + $0x18] sm:$0xff] }
  0x26   :  { %340 = vmatpush1.bf16.msra.mxu0 %v5840_v25  ;;  %v1569_v25 = vld [vmem:[%s8938_s5 + $0x10] sm:$0xff] }
  0x27   :  { %341 = vmatprep.subr.bf16.mxu0 %v8957_v0 }
  0x29   :  { %782 = vperm.xlu1 %5832, %v560_v26   ;;  %777 = vperm.xlu0 %5831, %v559_v27  }
  0x2a   :  { %342 = vmatpush1.bf16.msra.mxu0 %v5841_v28  ;;  %v2283_v28 = vld [vmem:[%s8939_s7 + $0x8] sm:$0xff] }
  0x2b   :  { %343 = vmatprep.subr.bf16.mxu0 %v8957_v0 }
  0x2d   :  { %642 = vperm.xlu1 %5832, %v532_v29   ;;  %637 = vperm.xlu0 %5831, %v531_v30   ;;  %v2282_v29 = vld [vmem:[%s8939_s7] sm:$0xff] }
  0x2e   :  { %344 = vmatpush1.bf16.msra.mxu0 %v5842_v31 }
  0x2f   :  { %345 = vmatprep.subr.bf16.mxu0 %v8957_v0 }
  0x31   :  { %792 = vperm.xlu1 %5832, %v562_v32   ;;  %787 = vperm.xlu0 %5831, %v561_v33   ;;  %v1572_v32 = vld [vmem:[%s8938_s5 + $0x28] sm:$0xff]  ;;  %v1571_v33 = vld [vmem:[%s8938_s5 + $0x20] sm:$0xff] }
  0x32   :  { %346 = vmatpush1.bf16.msra.mxu0 %v5843_v34 }
  0x33   :  { %347 = vmatprep.subr.bf16.mxu0 %v8957_v0 }
  0x35   :  { %652 = vperm.xlu1 %5832, %v534_v35   ;;  %647 = vperm.xlu0 %5831, %v533_v36   ;;  %v2285_v36 = vld [vmem:[%s8939_s7 + $0x18] sm:$0xff] }
  0x36   :  { %348 = vmatpush1.bf16.msra.mxu0 %v5844_v37  ;;  %v2284_v37 = vld [vmem:[%s8939_s7 + $0x10] sm:$0xff] }
  0x37   :  { %2678 = vmatprep.subr.bf16.mxu0 %v8957_v0  ;;  %v2313_v0 = vld [vmem:[%s8939_s7 + $0xf8] sm:$0xff] }
  0x39   :  { %802 = vperm.xlu1 %5832, %v564_v38   ;;  %797 = vperm.xlu0 %5831, %v563_v39  }
  0x3a   :  { %358 = vmatmul.mubr.bf16.vlgmr.msra.gmra.mrb[0].mxu0 %v5845_v40  ;;  %v1574_v40 = vld [vmem:[%s8938_s5 + $0x38] sm:$0xff] }
  0x3b   :  { %5187 = vmatprep.mubr.msk.bf16.mxu0 %vm288_vm0, %v5848_v41  ;;  %v1573_v41 = vld [vmem:[%s8938_s5 + $0x30] sm:$0xff] }
  0x3d   :  { %662 = vperm.xlu1 %5832, %v536_v42   ;;  %657 = vperm.xlu0 %5831, %v535_v43  }
  0x41   :  { %812 = vperm.xlu1 %5832, %v566_v44   ;;  %807 = vperm.xlu0 %5831, %v565_v45   ;;  %v2287_v44 = vld [vmem:[%s8939_s7 + $0x28] sm:$0xff]  ;;  %v2286_v45 = vld [vmem:[%s8939_s7 + $0x20] sm:$0xff] }
  0x42   :  { %366 = vmatmul.mubr.bf16.gmra.mrb[4].mxu0 %v5850_v46 }
  0x43   :  { %5188 = vmatprep.mubr.msk.bf16.mxu0 %vm288_vm0, %v5851_v47 }
  0x45   :  { %672 = vperm.xlu1 %5832, %v538_v48   ;;  %667 = vperm.xlu0 %5831, %v537_v49   ;;  %v1576_v48 = vld [vmem:[%s8938_s5 + $0x48] sm:$0xff]  ;;  %v1575_v49 = vld [vmem:[%s8938_s5 + $0x40] sm:$0xff] }
  0x49   :  { %822 = vperm.xlu1 %5832, %v568_v50   ;;  %817 = vperm.xlu0 %5831, %v567_v51  }
  0x4a   :  { %374 = vmatmul.mubr.bf16.gmra.mrb[8].mxu0 %v5853_v52  ;;  %v2289_v52 = vld [vmem:[%s8939_s7 + $0x38] sm:$0xff] }
  0x4d   :  { %682 = vperm.xlu1 %5832, %v540_v53   ;;  %677 = vperm.xlu0 %5831, %v539_v54   ;;  %v5854_v53 = vld [vmem:[%s8940_s2] sm:$0xff]   ;;  %v2288_v54 = vld [vmem:[%s8939_s7 + $0x30] sm:$0xff] }
  0x4e   :  { %5586 = vmatprep.mubr.msk.bf16.mxu1 %vm1065_vm1, %v5854_v53 }
  0x51   :  { %832 = vperm.xlu1 %5832, %v570_v55   ;;  %827 = vperm.xlu0 %5831, %v569_v56  }
  0x55   :  { %692 = vperm.xlu1 %5832, %v542_v57   ;;  %687 = vperm.xlu0 %5831, %v541_v58   ;;  %v1578_v57 = vld [vmem:[%s8938_s5 + $0x58] sm:$0xff]  ;;  %v1577_v58 = vld [vmem:[%s8938_s5 + $0x50] sm:$0xff] }
  0x59   :  { %842 = vperm.xlu1 %5832, %v572_v59   ;;  %837 = vperm.xlu0 %5831, %v571_v60  }
  0x5d   :  { %702 = vperm.xlu1 %5832, %v544_v61   ;;  %697 = vperm.xlu0 %5831, %v543_v62   ;;  %v2291_v61 = vld [vmem:[%s8939_s7 + $0x48] sm:$0xff]  ;;  %v2290_v62 = vld [vmem:[%s8939_s7 + $0x40] sm:$0xff] }
  0x61   :  { %852 = vperm.xlu1 %5832, %v574_v63   ;;  %847 = vperm.xlu0 %5831, %v573_v1  }
  0x65   :  { %712 = vperm.xlu1 %5832, %v546_v2   ;;  %707 = vperm.xlu0 %5831, %v545_v3   ;;  %v1580_v2 = vld [vmem:[%s8938_s5 + $0x68] sm:$0xff]  ;;  %v1579_v3 = vld [vmem:[%s8938_s5 + $0x60] sm:$0xff] }
  0x69   :  { %862 = vperm.xlu1 %5832, %v576_v4   ;;  %857 = vperm.xlu0 %5831, %v575_v5  }
  0x6d   :  { %722 = vperm.xlu1 %5832, %v548_v6   ;;  %717 = vperm.xlu0 %5831, %v547_v7   ;;  %v2293_v6 = vld [vmem:[%s8939_s7 + $0x58] sm:$0xff]  ;;  %v2292_v7 = vld [vmem:[%s8939_s7 + $0x50] sm:$0xff] }
  0x71   :  { %872 = vperm.xlu1 %5832, %v578_v8   ;;  %867 = vperm.xlu0 %5831, %v577_v9  }
  0x75   :  { %732 = vperm.xlu1 %5832, %v550_v10   ;;  %727 = vperm.xlu0 %5831, %v549_v11   ;;  %v1586_v10 = vld [vmem:[%s8938_s5 + $0x98] sm:$0xff]  ;;  %v1585_v11 = vld [vmem:[%s8938_s5 + $0x90] sm:$0xff] }
  0x79   :  { %882 = vperm.xlu1 %5832, %v580_v12   ;;  %877 = vperm.xlu0 %5831, %v579_v13  }
  0x7d   :  { %742 = vperm.xlu1 %5832, %v552_v14   ;;  %737 = vperm.xlu0 %5831, %v551_v15   ;;  %v1582_v14 = vld [vmem:[%s8938_s5 + $0x78] sm:$0xff]  ;;  %v1581_v15 = vld [vmem:[%s8938_s5 + $0x70] sm:$0xff] }
  0x81   :  { %892 = vperm.xlu1 %5832, %v582_v16   ;;  %887 = vperm.xlu0 %5831, %v581_v17  }
  0x85   :  { %902 = vperm.xlu1 %5832, %v584_v18   ;;  %897 = vperm.xlu0 %5831, %v583_v19   ;;  %v2295_v18 = vld [vmem:[%s8939_s7 + $0x68] sm:$0xff]  ;;  %v2294_v19 = vld [vmem:[%s8939_s7 + $0x60] sm:$0xff] }
  0x88   :  { %v6766_v22 = vpop.permute.xlu1 %597  ;;  %v6768_v23 = vpop.permute.xlu0 %587 }
  0x89   :  { %1610 = vperm.xlu1 %5832, %v1568_v20   ;;  %1605 = vperm.xlu0 %5831, %v1567_v21  }
  0x8c   :  { %v6776_v26 = vpop.permute.xlu1 %602  ;;  %v6778_v27 = vpop.permute.xlu0 %592 }
  0x8d   :  { %1620 = vperm.xlu1 %5832, %v1570_v24   ;;  %1615 = vperm.xlu0 %5831, %v1569_v25   ;;  %v1588_v24 = vld [vmem:[%s8938_s5 + $0xa8] sm:$0xff]  ;;  %v1587_v25 = vld [vmem:[%s8938_s5 + $0xa0] sm:$0xff] }
  0x90   :  { %v6786_v30 = vpop.permute.xlu1 %752  ;;  %v6788_v31 = vpop.permute.xlu0 %747 }
  0x91   :  { %2325 = vperm.xlu1 %5832, %v2283_v28   ;;  %2320 = vperm.xlu0 %5831, %v2282_v29  }
  0x94   :  { %v6796_v34 = vpop.permute.xlu1 %612  ;;  %v6798_v35 = vpop.permute.xlu0 %607 }
  0x95   :  { %1630 = vperm.xlu1 %5832, %v1572_v32   ;;  %1625 = vperm.xlu0 %5831, %v1571_v33   ;;  %v2301_v32 = vld [vmem:[%s8939_s7 + $0x98] sm:$0xff]  ;;  %v2300_v33 = vld [vmem:[%s8939_s7 + $0x90] sm:$0xff] }
  0x98   :  { %v6806_v38 = vpop.permute.xlu1 %762  ;;  %v6808_v39 = vpop.permute.xlu0 %757 }
  0x99   :  { %2335 = vperm.xlu1 %5832, %v2285_v36   ;;  %2330 = vperm.xlu0 %5831, %v2284_v37  }
  0x9c   :  { %v6816_v42 = vpop.permute.xlu1 %622  ;;  %v6818_v43 = vpop.permute.xlu0 %617 }
  0x9d   :  { %1640 = vperm.xlu1 %5832, %v1574_v40   ;;  %1635 = vperm.xlu0 %5831, %v1573_v41   ;;  %v1584_v40 = vld [vmem:[%s8938_s5 + $0x88] sm:$0xff]  ;;  %v1583_v41 = vld [vmem:[%s8938_s5 + $0x80] sm:$0xff] }
  0xa0   :  { %v6826_v46 = vpop.permute.xlu1 %772  ;;  %v6828_v47 = vpop.permute.xlu0 %767 }
  0xa1   :  { %2345 = vperm.xlu1 %5832, %v2287_v44   ;;  %2340 = vperm.xlu0 %5831, %v2286_v45  }
  0xa4   :  { %v6836_v50 = vpop.permute.xlu1 %632  ;;  %v6838_v51 = vpop.permute.xlu0 %627 }
  0xa5   :  { %1650 = vperm.xlu1 %5832, %v1576_v48   ;;  %1645 = vperm.xlu0 %5831, %v1575_v49   ;;  %v2297_v48 = vld [vmem:[%s8939_s7 + $0x78] sm:$0xff]  ;;  %v2296_v49 = vld [vmem:[%s8939_s7 + $0x70] sm:$0xff] }
  0xa8   :  { %v6850_v55 = vpop.permute.xlu1 %782  ;;  %v6852_v56 = vpop.permute.xlu0 %777 }
  0xa9   :  { %2355 = vperm.xlu1 %5832, %v2289_v52   ;;  %2350 = vperm.xlu0 %5831, %v2288_v54   ;;  %v1590_v54 = vld [vmem:[%s8938_s5 + $0xb8] sm:$0xff] }
  0xac   :  { %v6860_v59 = vpop.permute.xlu1 %642  ;;  %v6862_v60 = vpop.permute.xlu0 %637 }
  0xad   :  { %1660 = vperm.xlu1 %5832, %v1578_v57   ;;  %1655 = vperm.xlu0 %5831, %v1577_v58   ;;  %v1589_v57 = vld [vmem:[%s8938_s5 + $0xb0] sm:$0xff] }
  0xb0   :  { %v6870_v63 = vpop.permute.xlu1 %792  ;;  %v6872_v1 = vpop.permute.xlu0 %787 }
  0xb1   :  { %2365 = vperm.xlu1 %5832, %v2291_v61   ;;  %2360 = vperm.xlu0 %5831, %v2290_v62   ;;  %v2303_v62 = vld [vmem:[%s8939_s7 + $0xa8] sm:$0xff] }
  0xb4   :  { %v6880_v4 = vpop.permute.xlu1 %652  ;;  %v6882_v5 = vpop.permute.xlu0 %647 }
  0xb5   :  { %1670 = vperm.xlu1 %5832, %v1580_v2   ;;  %1665 = vperm.xlu0 %5831, %v1579_v3   ;;  %v2302_v2 = vld [vmem:[%s8939_s7 + $0xa0] sm:$0xff] }
  0xb8   :  { %v6890_v8 = vpop.permute.xlu1 %802  ;;  %v6892_v9 = vpop.permute.xlu0 %797 }
  0xb9   :  { %2375 = vperm.xlu1 %5832, %v2293_v6   ;;  %2370 = vperm.xlu0 %5831, %v2292_v7   ;;  %v2299_v7 = vld [vmem:[%s8939_s7 + $0x88] sm:$0xff] }
  0xbc   :  { %v6900_v12 = vpop.permute.xlu1 %662  ;;  %v6902_v13 = vpop.permute.xlu0 %657 }
  0xbd   :  { %1700 = vperm.xlu1 %5832, %v1586_v10   ;;  %1695 = vperm.xlu0 %5831, %v1585_v11   ;;  %v2298_v10 = vld [vmem:[%s8939_s7 + $0x80] sm:$0xff] }
  0xc0   :  { %v6910_v16 = vpop.permute.xlu1 %812  ;;  %v6912_v17 = vpop.permute.xlu0 %807 }
  0xc1   :  { %8976 = vst [vmem:[#allocation2_spill] sm:$0xff] %v6910_v16  ;;  %1680 = vperm.xlu1 %5832, %v1582_v14   ;;  %1675 = vperm.xlu0 %5831, %v1581_v15   ;;  %v1592_v15 = vld [vmem:[%s8938_s5 + $0xc8] sm:$0xff] }
  0xc4   :  { %v6920_v20 = vpop.permute.xlu1 %672  ;;  %v6922_v21 = vpop.permute.xlu0 %667 }
  0xc5   :  { %2385 = vperm.xlu1 %5832, %v2295_v18   ;;  %2380 = vperm.xlu0 %5831, %v2294_v19   ;;  %v1591_v18 = vld [vmem:[%s8938_s5 + $0xc0] sm:$0xff] }
  0xc8   :  { %v6930_v28 = vpop.permute.xlu1 %822  ;;  %v6932_v29 = vpop.permute.xlu0 %817 }
  0xc9   :  { %1710 = vperm.xlu1 %5832, %v1588_v24   ;;  %1705 = vperm.xlu0 %5831, %v1587_v25   ;;  %v2305_v25 = vld [vmem:[%s8939_s7 + $0xb8] sm:$0xff] }
  0xcc   :  { %v6940_v36 = vpop.permute.xlu1 %682  ;;  %v6942_v37 = vpop.permute.xlu0 %677 }
  0xcd   :  { %2415 = vperm.xlu1 %5832, %v2301_v32   ;;  %2410 = vperm.xlu0 %5831, %v2300_v33   ;;  %v2304_v32 = vld [vmem:[%s8939_s7 + $0xb0] sm:$0xff] }
  0xd0   :  { %v6950_v44 = vpop.permute.xlu1 %832  ;;  %v6952_v45 = vpop.permute.xlu0 %827 }
  0xd1   :  { %8977 = vst [vmem:[#allocation3_spill] sm:$0xff] %v6950_v44  ;;  %8978 = vst [vmem:[#allocation4_spill] sm:$0xff] %v6952_v45  ;;  %1690 = vperm.xlu1 %5832, %v1584_v40   ;;  %1685 = vperm.xlu0 %5831, %v1583_v41   ;;  %v1594_v41 = vld [vmem:[%s8938_s5 + $0xd8] sm:$0xff] }
  0xd4   :  { %v6960_v52 = vpop.permute.xlu1 %692  ;;  %v6962_v53 = vpop.permute.xlu0 %687 }
  0xd5   :  { %2395 = vperm.xlu1 %5832, %v2297_v48   ;;  %2390 = vperm.xlu0 %5831, %v2296_v49   ;;  %v1593_v48 = vld [vmem:[%s8938_s5 + $0xd0] sm:$0xff] }
  0xd8   :  { %v6970_v58 = vpop.permute.xlu1 %842  ;;  %v6972_v61 = vpop.permute.xlu0 %837 }
  0xd9   :  { %8979 = vst [vmem:[#allocation5_spill] sm:$0xff] %v6970_v58  ;;  %8980 = vst [vmem:[#allocation6_spill] sm:$0xff] %v6972_v61  ;;  %1720 = vperm.xlu1 %5832, %v1590_v54   ;;  %1715 = vperm.xlu0 %5831, %v1589_v57   ;;  %v2307_v54 = vld [vmem:[%s8939_s7 + $0xc8] sm:$0xff]  ;;  %v2306_v57 = vld [vmem:[%s8939_s7 + $0xc0] sm:$0xff] }
  0xdc   :  { %v6980_v3 = vpop.permute.xlu1 %702  ;;  %v6982_v6 = vpop.permute.xlu0 %697 }
  0xdd   :  { %2425 = vperm.xlu1 %5832, %v2303_v62   ;;  %2420 = vperm.xlu0 %5831, %v2302_v2   ;;  %v1596_v2 = vld [vmem:[%s8938_s5 + $0xe8] sm:$0xff] }
  0xe0   :  { %v6990_v11 = vpop.permute.xlu1 %852  ;;  %v6992_v14 = vpop.permute.xlu0 %847 }
  0xe1   :  { %8981 = vst [vmem:[#allocation7_spill] sm:$0xff] %v6990_v11  ;;  %8982 = vst [vmem:[#allocation8_spill] sm:$0xff] %v6992_v14  ;;  %2405 = vperm.xlu1 %5832, %v2299_v7   ;;  %2400 = vperm.xlu0 %5831, %v2298_v10   ;;  %v1595_v7 = vld [vmem:[%s8938_s5 + $0xe0] sm:$0xff] }
  0xe4   :  { %v7000_v19 = vpop.permute.xlu1 %712  ;;  %v7002_v24 = vpop.permute.xlu0 %707 }
  0xe5   :  { %1730 = vperm.xlu1 %5832, %v1592_v15   ;;  %1725 = vperm.xlu0 %5831, %v1591_v18   ;;  %v2309_v18 = vld [vmem:[%s8939_s7 + $0xd8] sm:$0xff] }
  0xe8   :  { %v7010_v33 = vpop.permute.xlu1 %862  ;;  %v7012_v40 = vpop.permute.xlu0 %857 }
  0xe9   :  { %8983 = vst [vmem:[#allocation9_spill] sm:$0xff] %v7010_v33  ;;  %8984 = vst [vmem:[#allocation10_spill] sm:$0xff] %v7012_v40  ;;  %2435 = vperm.xlu1 %5832, %v2305_v25   ;;  %2430 = vperm.xlu0 %5831, %v2304_v32   ;;  %v2308_v25 = vld [vmem:[%s8939_s7 + $0xd0] sm:$0xff] }
  0xec   :  { %v7020_v49 = vpop.permute.xlu1 %722  ;;  %v7028_v62 = vpop.permute.xlu0 %717 }
  0xed   :  { %1740 = vperm.xlu1 %5832, %v1594_v41   ;;  %1735 = vperm.xlu0 %5831, %v1593_v48   ;;  %v1598_v41 = vld [vmem:[%s8938_s5 + $0xf8] sm:$0xff]  ;;  %v1597_v48 = vld [vmem:[%s8938_s5 + $0xf0] sm:$0xff] }
  0xf0   :  { %v7036_v10 = vpop.permute.xlu1 %872  ;;  %v7038_v15 = vpop.permute.xlu0 %867 }
  0xf1   :  { %2445 = vperm.xlu1 %5832, %v2307_v54   ;;  %2440 = vperm.xlu0 %5831, %v2306_v57   ;;  %8985 = vst [vmem:[#allocation11_spill] sm:$0xff] %v7036_v10  ;;  %8986 = vst [vmem:[#allocation12_spill] sm:$0xff] %v7038_v15  ;;  %v2311_v57 = vld [vmem:[%s8939_s7 + $0xe8] sm:$0xff]  ;;  %v1602_v10 = vld [vmem:[%s8938_s5 + $0x118] sm:$0xff] }
  0xf4   :  { %v7046_v32 = vpop.permute.xlu1 %732  ;;  %v7054_v54 = vpop.permute.xlu0 %727 }
  0xf5   :  { %1750 = vperm.xlu1 %5832, %v1596_v2   ;;  %1745 = vperm.xlu0 %5831, %v1595_v7   ;;  %v2310_v2 = vld [vmem:[%s8939_s7 + $0xe0] sm:$0xff] }
  0xf8   :  { %v7062_v7 = vpop.permute.xlu1 %882 }
  0xf9   :  { %2455 = vperm.xlu1 %5832, %v2309_v18   ;;  %2450 = vperm.xlu0 %5831, %v2308_v25   ;;  %8987 = vst [vmem:[#allocation13_spill] sm:$0xff] %v7062_v7  ;;  %v7064_v18 = vpop.permute.xlu0 %877  ;;  %v1600_v25 = vld [vmem:[%s8938_s5 + $0x108] sm:$0xff] }
  0xfa   :  { %8988 = vst [vmem:[#allocation14_spill] sm:$0xff] %v7064_v18 }
  0xfd   :  { %1760 = vperm.xlu1 %5832, %v1598_v41   ;;  %1755 = vperm.xlu0 %5831, %v1597_v48   ;;  %v1599_v41 = vld [vmem:[%s8938_s5 + $0x100] sm:$0xff]  ;;  %v7072_v48 = vpop.permute.xlu1 %742 }
 0x101   :  { %2465 = vperm.xlu1 %5832, %v2311_v57   ;;  %2460 = vperm.xlu0 %5831, %v2310_v2   ;;  %v2312_v57 = vld [vmem:[%s8939_s7 + $0xf0] sm:$0xff]  ;;  %v7080_v2 = vpop.permute.xlu0 %737 }
 0x105   :  { %1770 = vperm.xlu1 %5832, %v1600_v25   ;;  %1765 = vperm.xlu0 %5831, %v1599_v41   ;;  %v1601_v25 = vld [vmem:[%s8938_s5 + $0x110] sm:$0xff]  ;;  %v7088_v41 = vpop.permute.xlu1 %892  ;;  %v7090_v7 = vpop.permute.xlu0 %887 }
 0x106   :  { %8989 = vst [vmem:[#allocation15_spill] sm:$0xff] %v7088_v41  ;;  %8990 = vst [vmem:[#allocation16_spill] sm:$0xff] %v7090_v7 }
 0x109   :  { %2475 = vperm.xlu1 %5832, %v2313_v0   ;;  %2470 = vperm.xlu0 %5831, %v2312_v57   ;;  %v2315_v0 = vld [vmem:[%s8939_s7 + $0x108] sm:$0xff]  ;;  %v2314_v57 = vld [vmem:[%s8939_s7 + $0x100] sm:$0xff]  ;;  %v7100_v41 = vpop.permute.xlu1 %902 }
 0x10a   :  { %8992 = vst [vmem:[#allocation18_spill] sm:$0xff] %v7100_v41 }
 0x10d   :  { %1780 = vperm.xlu1 %5832, %v1602_v10   ;;  %1775 = vperm.xlu0 %5831, %v1601_v25   ;;  %v359_v15 = vpop.f32.mrb[0].mxu0  ;;  %v2317_v10 = vld [vmem:[%s8939_s7 + $0x118] sm:$0xff]  ;;  %v7109_v25 = vpop.permute.xlu0 %897 }
 0x10e   :  { %v361_v18 = vpop.f32.mrb[1].mxu0  ;;  %8993 = vst [vmem:[#allocation19_spill] sm:$0xff] %v7109_v25  ;;  %v7118_v41 = vpop.permute.xlu1 %1610 }
 0x10f   :  { %v362_v11 = vpop.f32.mrb[2].mxu0  ;;  %v2316_v18 = vld [vmem:[%s8939_s7 + $0x110] sm:$0xff]  ;;  %8994 = vst [vmem:[#allocation20_spill] sm:$0xff] %v7118_v41 }
 0x110   :  { %v7098_v33 = vpack.c.bf16 %v362_v11, %v359_v15  ;;  %v364_v14 = vpop.f32.mrb[3].mxu0  ;;  %v3513_v15 = vld [vmem:[%s8941_s11 + $0x8] sm:$0xff] }
 0x111   :  { %2485 = vperm.xlu1 %5832, %v2315_v0   ;;  %2480 = vperm.xlu0 %5831, %v2314_v57   ;;  %v3512_v0 = vld [vmem:[%s8941_s11] sm:$0xff]  ;;  %v7122_v25 = vpop.permute.xlu0 %1605 }
 0x112   :  { %8991 = vst [vmem:[#allocation17_spill] sm:$0xff] %v7098_v33  ;;  %5580 = vmatprep.subr.bf16.mxu1 %v7098_v33  ;;  %8996 = vst [vmem:[#allocation22_spill] sm:$0xff] %v7122_v25 }
 0x113   :  { %5581 = vmatpush3.bf16.msra.mxu1 %v7098_v33 }
 0x115   :  { %2495 = vperm.xlu1 %5832, %v2317_v10   ;;  %2490 = vperm.xlu0 %5831, %v2316_v18   ;;  %v367_v11 = vpop.f32.mrb[4].mxu0  ;;  %v3515_v10 = vld [vmem:[%s8941_s11 + $0x18] sm:$0xff]  ;;  %v3514_v18 = vld [vmem:[%s8941_s11 + $0x10] sm:$0xff] }
 0x116   :  { %v369_v14 = vpop.f32.mrb[5].mxu0 }
 0x117   :  { %v370_v57 = vpop.f32.mrb[6].mxu0  ;;  %v7132_v14 = vpop.permute.xlu1 %1620 }
 0x118   :  { %v7120_v7 = vpack.c.bf16 %v370_v57, %v367_v11  ;;  %v372_v33 = vpop.f32.mrb[7].mxu0  ;;  %8997 = vst [vmem:[#allocation23_spill] sm:$0xff] %v7132_v14  ;;  %v7140_v57 = vpop.permute.xlu0 %1615  ;;  %v3703_v14 = vld [vmem:[%s8942_s13] sm:$0xff] }
 0x119   :  { %3527 = vperm.xlu1 %5832, %v3513_v15   ;;  %3522 = vperm.xlu0 %5831, %v3512_v0   ;;  %v3517_v15 = vld [vmem:[%s8941_s11 + $0x28] sm:$0xff]  ;;  %v3516_v0 = vld [vmem:[%s8941_s11 + $0x20] sm:$0xff]  ;;  %8998 = vst [vmem:[#allocation24_spill] sm:$0xff] %v7140_v57 }
 0x11a   :  { %8995 = vst [vmem:[#allocation21_spill] sm:$0xff] %v7120_v7  ;;  %5582 = vmatprep.subr.bf16.mxu1 %v7120_v7 }
 0x11b   :  { %5583 = vmatpush3.bf16.msra.mxu1 %v7120_v7 }
 0x11d   :  { %3537 = vperm.xlu1 %5832, %v3515_v10   ;;  %3532 = vperm.xlu0 %5831, %v3514_v18   ;;  %v375_v11 = vpop.f32.mrb[8].mxu0  ;;  %v3519_v10 = vld [vmem:[%s8941_s11 + $0x38] sm:$0xff]  ;;  %v3518_v18 = vld [vmem:[%s8941_s11 + $0x30] sm:$0xff] }
 0x11e   :  { %v377_v33 = vpop.f32.mrb[9].mxu0 }
 0x11f   :  { %v378_v41 = vpop.f32.mrb[10].mxu0  ;;  %v5855_v33 = vld [vmem:[%s8940_s2 + $0x8] sm:$0xff]  }
 0x120   :  { %v7142_v25 = vpack.c.bf16 %v378_v41, %v375_v11  ;;  %v380_v7 = vpop.f32.mrb[11].mxu0  ;;  %v9000_v41 = vmov 0   ;;  %v7159_v11 = vpop.permute.xlu1 %2325 }
 0x121   :  { %3547 = vperm.xlu1 %5832, %v3517_v15   ;;  %3542 = vperm.xlu0 %5831, %v3516_v0   ;;  %v5856_v7 = vld [vmem:[%s8940_s2 + $0x10] sm:$0xff]   ;;  %9001 = vst [vmem:[#allocation26_spill] sm:$0xff] %v7159_v11  ;;  %v7161_v15 = vpop.permute.xlu0 %2320  ;;  %v3704_v0 = vld [vmem:[%s8942_s13 + $0x8] sm:$0xff]  ;;  %v3706_v11 = vld [vmem:[%s8942_s13 + $0x18] sm:$0xff] }
 0x122   :  { %8999 = vst [vmem:[#allocation25_spill] sm:$0xff] %v7142_v25  ;;  %5584 = vmatprep.subr.bf16.mxu1 %v7142_v25  ;;  %9002 = vst [vmem:[#allocation27_spill] sm:$0xff] %v7161_v15 }
 0x123   :  { %5585 = vmatpush3.bf16.msra.mxu1 %v7142_v25 }
 0x124   :  { %1963 = vmatprep.subr.bf16.mxu1 %v9000_v41 }
 0x125   :  { %3557 = vperm.xlu1 %5832, %v3519_v10   ;;  %3552 = vperm.xlu0 %5831, %v3518_v18   ;;  %v3705_v10 = vld [vmem:[%s8942_s13 + $0x10] sm:$0xff]  ;;  %v5857_v18 = vld [vmem:[%s8940_s2 + $0x18] sm:$0xff]   ;;  %v7182_v15 = vpop.permute.xlu0 %1625 }
 0x126   :  { %5587 = vmatmul.mubr.msk.bf16.vlgmr.msra.gmra.mrb[0].mxu1 %vm1065_vm1, %v5855_v33  ;;  %v7180_v33 = vpop.permute.xlu1 %1630  ;;  %9004 = vst [vmem:[#allocation29_spill] sm:$0xff] %v7182_v15 }
 0x127   :  { %5590 = vmatprep.mubr.msk.bf16.mxu1 %vm1065_vm1, %v5856_v7  ;;  %9003 = vst [vmem:[#allocation28_spill] sm:$0xff] %v7180_v33  ;;  %v4370_v7 = vld [vmem:[%s8943_s15 + $0x8] sm:$0xff] }
 0x129   :  { %3746 = vperm.xlu1 %5832, %v3704_v0   ;;  %3741 = vperm.xlu0 %5831, %v3703_v14   ;;  %v5858_v14 = vld [vmem:[%s8940_s2 + $0x20] sm:$0xff]   ;;  %v7197_v15 = vpop.permute.xlu0 %2330 }
 0x12a   :  { %v4369_v0 = vld [vmem:[%s8943_s15] sm:$0xff]  ;;  %v7195_v33 = vpop.permute.xlu1 %2335  ;;  %9006 = vst [vmem:[#allocation31_spill] sm:$0xff] %v7197_v15 }
 0x12b   :  { %9005 = vst [vmem:[#allocation30_spill] sm:$0xff] %v7195_v33 }
 0x12d   :  { %3756 = vperm.xlu1 %5832, %v3706_v11   ;;  %3751 = vperm.xlu0 %5831, %v3705_v10   ;;  %v3708_v11 = vld [vmem:[%s8942_s13 + $0x28] sm:$0xff]  ;;  %v3707_v10 = vld [vmem:[%s8942_s13 + $0x20] sm:$0xff]  ;;  %v7220_v15 = vpop.permute.xlu0 %1635 }
 0x12e   :  { %5591 = vmatmul.mubr.msk.bf16.gmra.mrb[4].mxu1 %vm1065_vm1, %v5857_v18  ;;  %v5859_v18 = vld [vmem:[%s8940_s2 + $0x28] sm:$0xff]   ;;  %v7218_v33 = vpop.permute.xlu1 %1640  ;;  %9008 = vst [vmem:[#allocation33_spill] sm:$0xff] %v7220_v15 }
 0x12f   :  { %5594 = vmatprep.mubr.msk.bf16.mxu1 %vm1065_vm1, %v5858_v14  ;;  %v5860_v14 = vld [vmem:[%s8940_s2 + $0x30] sm:$0xff]   ;;  %9007 = vst [vmem:[#allocation32_spill] sm:$0xff] %v7218_v33  ;;  %v5862_v33 = vld [vmem:[%s8940_s2 + $0x40] sm:$0xff]  }
 0x131   :  { %4412 = vperm.xlu1 %5832, %v4370_v7   ;;  %4407 = vperm.xlu0 %5831, %v4369_v0   ;;  %v4372_v7 = vld [vmem:[%s8943_s15 + $0x18] sm:$0xff]  ;;  %v4371_v0 = vld [vmem:[%s8943_s15 + $0x10] sm:$0xff] }
 0x132   :  { %v7235_v15 = vpop.permute.xlu1 %2345 }
 0x133   :  { %9009 = vst [vmem:[#allocation34_spill] sm:$0xff] %v7235_v15  ;;  %v3712_v15 = vld [vmem:[%s8942_s13 + $0x48] sm:$0xff] }
 0x135   :  { %3766 = vperm.xlu1 %5832, %v3708_v11   ;;  %3761 = vperm.xlu0 %5831, %v3707_v10   ;;  %v3710_v11 = vld [vmem:[%s8942_s13 + $0x38] sm:$0xff]  ;;  %v3709_v10 = vld [vmem:[%s8942_s13 + $0x30] sm:$0xff] }
 0x136   :  { %5595 = vmatmul.mubr.msk.bf16.gmra.mrb[8].mxu1 %vm1065_vm1, %v5859_v18  ;;  %v5861_v18 = vld [vmem:[%s8940_s2 + $0x38] sm:$0xff]  }
 0x137   :  { %5598 = vmatprep.mubr.msk.bf16.mxu1 %vm1065_vm1, %v5860_v14  ;;  %v7237_v14 = vpop.permute.xlu0 %2340 }
 0x138   :  { %9010 = vst [vmem:[#allocation35_spill] sm:$0xff] %v7237_v14 }
 0x139   :  { %4422 = vperm.xlu1 %5832, %v4372_v7   ;;  %4417 = vperm.xlu0 %5831, %v4371_v0   ;;  %v4374_v7 = vld [vmem:[%s8943_s15 + $0x28] sm:$0xff]  ;;  %v4373_v0 = vld [vmem:[%s8943_s15 + $0x20] sm:$0xff] }
 0x13b   :  { %v7258_v14 = vpop.permute.xlu0 %1645 }
 0x13c   :  { %9012 = vst [vmem:[#allocation37_spill] sm:$0xff] %v7258_v14 }
 0x13d   :  { %3776 = vperm.xlu1 %5832, %v3710_v11   ;;  %3771 = vperm.xlu0 %5831, %v3709_v10   ;;  %v3711_v11 = vld [vmem:[%s8942_s13 + $0x40] sm:$0xff]  ;;  %v5863_v10 = vld [vmem:[%s8940_s2 + $0x48] sm:$0xff]  }
 0x13e   :  { %5599 = vmatmul.mubr.msk.bf16.gmra.mrb[12].mxu1 %vm1065_vm1, %v5861_v18  ;;  %v7256_v18 = vpop.permute.xlu1 %1650 }
 0x13f   :  { %5602 = vmatprep.mubr.msk.bf16.mxu1 %vm1065_vm1, %v5862_v33  ;;  %9011 = vst [vmem:[#allocation36_spill] sm:$0xff] %v7256_v18  ;;  %v5864_v33 = vld [vmem:[%s8940_s2 + $0x50] sm:$0xff]   ;;  %v7273_v14 = vpop.permute.xlu0 %2350 }
 0x140   :  { %9014 = vst [vmem:[#allocation39_spill] sm:$0xff] %v7273_v14 }
 0x141   :  { %4432 = vperm.xlu1 %5832, %v4374_v7   ;;  %4427 = vperm.xlu0 %5831, %v4373_v0   ;;  %v4376_v7 = vld [vmem:[%s8943_s15 + $0x38] sm:$0xff]  ;;  %v4375_v0 = vld [vmem:[%s8943_s15 + $0x30] sm:$0xff] }
 0x142   :  { %v7271_v18 = vpop.permute.xlu1 %2355 }
 0x143   :  { %9013 = vst [vmem:[#allocation38_spill] sm:$0xff] %v7271_v18  ;;  %v7296_v14 = vpop.permute.xlu0 %1655 }
 0x144   :  { %9016 = vst [vmem:[#allocation41_spill] sm:$0xff] %v7296_v14 }
 0x145   :  { %3786 = vperm.xlu1 %5832, %v3712_v15   ;;  %3781 = vperm.xlu0 %5831, %v3711_v11   ;;  %v3714_v15 = vld [vmem:[%s8942_s13 + $0x58] sm:$0xff]  ;;  %v3713_v11 = vld [vmem:[%s8942_s13 + $0x50] sm:$0xff] }
 0x146   :  { %5603 = vmatmul.mubr.msk.bf16.gmra.mrb[16].mxu1 %vm1065_vm1, %v5863_v10  ;;  %v5865_v10 = vld [vmem:[%s8940_s2 + $0x58] sm:$0xff]   ;;  %v7294_v18 = vpop.permute.xlu1 %1660 }
 0x147   :  { %5606 = vmatprep.mubr.msk.bf16.mxu1 %vm1065_vm1, %v5864_v33  ;;  %v5866_v33 = vld [vmem:[%s8940_s2 + $0x60] sm:$0xff]   ;;  %9015 = vst [vmem:[#allocation40_spill] sm:$0xff] %v7294_v18  ;;  %v5868_v18 = vld [vmem:[%s8940_s2 + $0x70] sm:$0xff]  }
 0x149   :  { %4442 = vperm.xlu1 %5832, %v4376_v7   ;;  %4437 = vperm.xlu0 %5831, %v4375_v0   ;;  %v4378_v7 = vld [vmem:[%s8943_s15 + $0x48] sm:$0xff]  ;;  %v4377_v0 = vld [vmem:[%s8943_s15 + $0x40] sm:$0xff] }
 0x14a   :  { %v7311_v14 = vpop.permute.xlu1 %2365 }
 0x14b   :  { %9017 = vst [vmem:[#allocation42_spill] sm:$0xff] %v7311_v14  ;;  %v3722_v14 = vld [vmem:[%s8942_s13 + $0x98] sm:$0xff] }
 0x14d   :  { %3796 = vperm.xlu1 %5832, %v3714_v15   ;;  %3791 = vperm.xlu0 %5831, %v3713_v11   ;;  %v3716_v15 = vld [vmem:[%s8942_s13 + $0x68] sm:$0xff]  ;;  %v3715_v11 = vld [vmem:[%s8942_s13 + $0x60] sm:$0xff] }
 0x14e   :  { %5607 = vmatmul.mubr.msk.bf16.gmra.mrb[20].mxu1 %vm1065_vm1, %v5865_v10  ;;  %v5867_v10 = vld [vmem:[%s8940_s2 + $0x68] sm:$0xff]  }
 0x14f   :  { %5610 = vmatprep.mubr.msk.bf16.mxu1 %vm1065_vm1, %v5866_v33  ;;  %v7313_v33 = vpop.permute.xlu0 %2360 }
 0x150   :  { %9018 = vst [vmem:[#allocation43_spill] sm:$0xff] %v7313_v33 }
 0x151   :  { %4452 = vperm.xlu1 %5832, %v4378_v7   ;;  %4447 = vperm.xlu0 %5831, %v4377_v0   ;;  %v4380_v7 = vld [vmem:[%s8943_s15 + $0x58] sm:$0xff]  ;;  %v4379_v0 = vld [vmem:[%s8943_s15 + $0x50] sm:$0xff] }
 0x153   :  { %v7334_v33 = vpop.permute.xlu0 %1665 }
 0x154   :  { %9020 = vst [vmem:[#allocation45_spill] sm:$0xff] %v7334_v33 }
 0x155   :  { %3806 = vperm.xlu1 %5832, %v3716_v15   ;;  %3801 = vperm.xlu0 %5831, %v3715_v11   ;;  %v3721_v15 = vld [vmem:[%s8942_s13 + $0x90] sm:$0xff]  ;;  %v5869_v11 = vld [vmem:[%s8940_s2 + $0x78] sm:$0xff]  }
 0x156   :  { %5611 = vmatmul.mubr.msk.bf16.gmra.mrb[24].mxu1 %vm1065_vm1, %v5867_v10  ;;  %v7332_v10 = vpop.permute.xlu1 %1670 }
 0x157   :  { %5614 = vmatprep.mubr.msk.bf16.mxu1 %vm1065_vm1, %v5868_v18  ;;  %9019 = vst [vmem:[#allocation44_spill] sm:$0xff] %v7332_v10  ;;  %v5870_v18 = vld [vmem:[%s8940_s2 + $0x80] sm:$0xff]   ;;  %v7349_v33 = vpop.permute.xlu0 %2370 }
 0x158   :  { %9022 = vst [vmem:[#allocation47_spill] sm:$0xff] %v7349_v33 }
 0x159   :  { %4462 = vperm.xlu1 %5832, %v4380_v7   ;;  %4457 = vperm.xlu0 %5831, %v4379_v0   ;;  %v3718_v7 = vld [vmem:[%s8942_s13 + $0x78] sm:$0xff]  ;;  %v3717_v0 = vld [vmem:[%s8942_s13 + $0x70] sm:$0xff] }
 0x15a   :  { %v7347_v10 = vpop.permute.xlu1 %2375 }
 0x15b   :  { %9021 = vst [vmem:[#allocation46_spill] sm:$0xff] %v7347_v10  ;;  %v7372_v33 = vpop.permute.xlu0 %1695 }
 0x15c   :  { %9024 = vst [vmem:[#allocation49_spill] sm:$0xff] %v7372_v33 }
 0x15d   :  { %3836 = vperm.xlu1 %5832, %v3722_v14   ;;  %3831 = vperm.xlu0 %5831, %v3721_v15   ;;  %v4382_v14 = vld [vmem:[%s8943_s15 + $0x68] sm:$0xff]  ;;  %v4381_v15 = vld [vmem:[%s8943_s15 + $0x60] sm:$0xff] }
 0x15e   :  { %5615 = vmatmul.mubr.msk.bf16.gmra.mrb[28].mxu1 %vm1065_vm1, %v5869_v11  ;;  %v5871_v11 = vld [vmem:[%s8940_s2 + $0x88] sm:$0xff]   ;;  %v7370_v10 = vpop.permute.xlu1 %1700 }
 0x15f   :  { %5618 = vmatprep.mubr.msk.bf16.mxu1 %vm1065_vm1, %v5870_v18  ;;  %v5872_v18 = vld [vmem:[%s8940_s2 + $0x90] sm:$0xff]   ;;  %9023 = vst [vmem:[#allocation48_spill] sm:$0xff] %v7370_v10  ;;  %v5874_v10 = vld [vmem:[%s8940_s2 + $0xa0] sm:$0xff]  }
 0x161   :  { %3816 = vperm.xlu1 %5832, %v3718_v7   ;;  %3811 = vperm.xlu0 %5831, %v3717_v0   ;;  %v3724_v7 = vld [vmem:[%s8942_s13 + $0xa8] sm:$0xff]  ;;  %v3723_v0 = vld [vmem:[%s8942_s13 + $0xa0] sm:$0xff] }
 0x162   :  { %v7387_v33 = vpop.permute.xlu1 %1680 }
 0x163   :  { %9025 = vst [vmem:[#allocation50_spill] sm:$0xff] %v7387_v33  ;;  %v4384_v33 = vld [vmem:[%s8943_s15 + $0x78] sm:$0xff] }
 0x165   :  { %4472 = vperm.xlu1 %5832, %v4382_v14   ;;  %4467 = vperm.xlu0 %5831, %v4381_v15   ;;  %v4388_v14 = vld [vmem:[%s8943_s15 + $0x98] sm:$0xff]  ;;  %v4387_v15 = vld [vmem:[%s8943_s15 + $0x90] sm:$0xff] }
 0x166   :  { %5619 = vmatmul.mubr.msk.bf16.gmra.mrb[32].mxu1 %vm1065_vm1, %v5871_v11  ;;  %v5873_v11 = vld [vmem:[%s8940_s2 + $0x98] sm:$0xff]  }
 0x167   :  { %5622 = vmatprep.mubr.msk.bf16.mxu1 %vm1065_vm1, %v5872_v18  ;;  %v7389_v18 = vpop.permute.xlu0 %1675 }
 0x168   :  { %9026 = vst [vmem:[#allocation51_spill] sm:$0xff] %v7389_v18 }
 0x169   :  { %3846 = vperm.xlu1 %5832, %v3724_v7   ;;  %3841 = vperm.xlu0 %5831, %v3723_v0   ;;  %v3720_v7 = vld [vmem:[%s8942_s13 + $0x88] sm:$0xff]  ;;  %v3719_v0 = vld [vmem:[%s8942_s13 + $0x80] sm:$0xff] }
 0x16b   :  { %v7410_v18 = vpop.permute.xlu0 %2380 }
 0x16c   :  { %9028 = vst [vmem:[#allocation53_spill] sm:$0xff] %v7410_v18 }
 0x16d   :  { %4502 = vperm.xlu1 %5832, %v4388_v14   ;;  %4497 = vperm.xlu0 %5831, %v4387_v15   ;;  %v4383_v14 = vld [vmem:[%s8943_s15 + $0x70] sm:$0xff]  ;;  %v5875_v15 = vld [vmem:[%s8940_s2 + $0xa8] sm:$0xff]  }
 0x16e   :  { %5623 = vmatmul.mubr.msk.bf16.gmra.mrb[36].mxu1 %vm1065_vm1, %v5873_v11  ;;  %v7408_v11 = vpop.permute.xlu1 %2385 }
 0x16f   :  { %5626 = vmatprep.mubr.msk.bf16.mxu1 %vm1065_vm1, %v5874_v10  ;;  %9027 = vst [vmem:[#allocation52_spill] sm:$0xff] %v7408_v11  ;;  %v5876_v10 = vld [vmem:[%s8940_s2 + $0xb0] sm:$0xff]   ;;  %v7425_v18 = vpop.permute.xlu0 %1705 }
 0x170   :  { %9030 = vst [vmem:[#allocation55_spill] sm:$0xff] %v7425_v18 }
 0x171   :  { %3826 = vperm.xlu1 %5832, %v3720_v7   ;;  %3821 = vperm.xlu0 %5831, %v3719_v0   ;;  %v3726_v7 = vld [vmem:[%s8942_s13 + $0xb8] sm:$0xff]  ;;  %v3725_v0 = vld [vmem:[%s8942_s13 + $0xb0] sm:$0xff] }
 0x172   :  { %v7423_v11 = vpop.permute.xlu1 %1710 }
 0x173   :  { %9029 = vst [vmem:[#allocation54_spill] sm:$0xff] %v7423_v11  ;;  %v7448_v18 = vpop.permute.xlu0 %2410 }
 0x174   :  { %9032 = vst [vmem:[#allocation57_spill] sm:$0xff] %v7448_v18 }
 0x175   :  { %4482 = vperm.xlu1 %5832, %v4384_v33   ;;  %4477 = vperm.xlu0 %5831, %v4383_v14   ;;  %v4390_v33 = vld [vmem:[%s8943_s15 + $0xa8] sm:$0xff]  ;;  %v4389_v14 = vld [vmem:[%s8943_s15 + $0xa0] sm:$0xff] }
 0x176   :  { %5627 = vmatmul.mubr.msk.bf16.gmra.mrb[40].mxu1 %vm1065_vm1, %v5875_v15  ;;  %v5877_v15 = vld [vmem:[%s8940_s2 + $0xb8] sm:$0xff]   ;;  %v7446_v11 = vpop.permute.xlu1 %2415 }
 0x177   :  { %5630 = vmatprep.mubr.msk.bf16.mxu1 %vm1065_vm1, %v5876_v10  ;;  %v5878_v10 = vld [vmem:[%s8940_s2 + $0xc0] sm:$0xff]   ;;  %9031 = vst [vmem:[#allocation56_spill] sm:$0xff] %v7446_v11  ;;  %v5880_v11 = vld [vmem:[%s8940_s2 + $0xd0] sm:$0xff]  }
 0x179   :  { %3856 = vperm.xlu1 %5832, %v3726_v7   ;;  %3851 = vperm.xlu0 %5831, %v3725_v0   ;;  %v4386_v7 = vld [vmem:[%s8943_s15 + $0x88] sm:$0xff]  ;;  %v4385_v0 = vld [vmem:[%s8943_s15 + $0x80] sm:$0xff] }
 0x17a   :  { %v7463_v18 = vpop.permute.xlu1 %1690 }
 0x17b   :  { %9033 = vst [vmem:[#allocation58_spill] sm:$0xff] %v7463_v18  ;;  %v3730_v18 = vld [vmem:[%s8942_s13 + $0xd8] sm:$0xff] }
 0x17d   :  { %4512 = vperm.xlu1 %5832, %v4390_v33   ;;  %4507 = vperm.xlu0 %5831, %v4389_v14   ;;  %v3728_v33 = vld [vmem:[%s8942_s13 + $0xc8] sm:$0xff]  ;;  %v3727_v14 = vld [vmem:[%s8942_s13 + $0xc0] sm:$0xff] }
 0x17e   :  { %5631 = vmatmul.mubr.msk.bf16.gmra.mrb[44].mxu1 %vm1065_vm1, %v5877_v15  ;;  %v5879_v15 = vld [vmem:[%s8940_s2 + $0xc8] sm:$0xff]  }
 0x17f   :  { %5634 = vmatprep.mubr.msk.bf16.mxu1 %vm1065_vm1, %v5878_v10  ;;  %v7465_v10 = vpop.permute.xlu0 %1685 }
 0x180   :  { %9034 = vst [vmem:[#allocation59_spill] sm:$0xff] %v7465_v10 }
 0x181   :  { %4492 = vperm.xlu1 %5832, %v4386_v7   ;;  %4487 = vperm.xlu0 %5831, %v4385_v0   ;;  %v4392_v7 = vld [vmem:[%s8943_s15 + $0xb8] sm:$0xff]  ;;  %v4391_v0 = vld [vmem:[%s8943_s15 + $0xb0] sm:$0xff] }
 0x183   :  { %v7486_v10 = vpop.permute.xlu0 %2390 }
 0x184   :  { %9036 = vst [vmem:[#allocation61_spill] sm:$0xff] %v7486_v10 }
 0x185   :  { %3866 = vperm.xlu1 %5832, %v3728_v33   ;;  %3861 = vperm.xlu0 %5831, %v3727_v14   ;;  %v3729_v33 = vld [vmem:[%s8942_s13 + $0xd0] sm:$0xff]  ;;  %v5881_v14 = vld [vmem:[%s8940_s2 + $0xd8] sm:$0xff]  }
 0x186   :  { %5635 = vmatmul.mubr.msk.bf16.gmra.mrb[48].mxu1 %vm1065_vm1, %v5879_v15  ;;  %v7484_v15 = vpop.permute.xlu1 %2395 }
 0x187   :  { %5638 = vmatprep.mubr.msk.bf16.mxu1 %vm1065_vm1, %v5880_v11  ;;  %9035 = vst [vmem:[#allocation60_spill] sm:$0xff] %v7484_v15  ;;  %v5882_v11 = vld [vmem:[%s8940_s2 + $0xe0] sm:$0xff]   ;;  %v7501_v10 = vpop.permute.xlu0 %1715 }
 0x188   :  { %9038 = vst [vmem:[#allocation63_spill] sm:$0xff] %v7501_v10 }
 0x189   :  { %4522 = vperm.xlu1 %5832, %v4392_v7   ;;  %4517 = vperm.xlu0 %5831, %v4391_v0   ;;  %v4394_v7 = vld [vmem:[%s8943_s15 + $0xc8] sm:$0xff]  ;;  %v4393_v0 = vld [vmem:[%s8943_s15 + $0xc0] sm:$0xff] }
 0x18a   :  { %v7499_v15 = vpop.permute.xlu1 %1720 }
 0x18b   :  { %9037 = vst [vmem:[#allocation62_spill] sm:$0xff] %v7499_v15  ;;  %v7524_v10 = vpop.permute.xlu0 %2420 }
 0x18c   :  { %9040 = vst [vmem:[#allocation65_spill] sm:$0xff] %v7524_v10  ;;  %v4400_v10 = vld [vmem:[%s8943_s15 + $0xf8] sm:$0xff] }
 0x18d   :  { %3876 = vperm.xlu1 %5832, %v3730_v18   ;;  %3871 = vperm.xlu0 %5831, %v3729_v33   ;;  %v3732_v18 = vld [vmem:[%s8942_s13 + $0xe8] sm:$0xff]  ;;  %v3731_v33 = vld [vmem:[%s8942_s13 + $0xe0] sm:$0xff] }
 0x18e   :  { %5639 = vmatmul.mubr.msk.bf16.gmra.mrb[52].mxu1 %vm1065_vm1, %v5881_v14  ;;  %v5883_v14 = vld [vmem:[%s8940_s2 + $0xe8] sm:$0xff]   ;;  %v7522_v15 = vpop.permute.xlu1 %2425 }
 0x18f   :  { %5642 = vmatprep.mubr.msk.bf16.mxu1 %vm1065_vm1, %v5882_v11  ;;  %v5884_v11 = vld [vmem:[%s8940_s2 + $0xf0] sm:$0xff]   ;;  %9039 = vst [vmem:[#allocation64_spill] sm:$0xff] %v7522_v15  ;;  %v7538_v15 = vpop.permute.xlu0 %2400 }
 0x190   :  { %9042 = vst [vmem:[#allocation67_spill] sm:$0xff] %v7538_v15  ;;  %v3738_v15 = vld [vmem:[%s8942_s13 + $0x118] sm:$0xff] }
 0x191   :  { %4532 = vperm.xlu1 %5832, %v4394_v7   ;;  %4527 = vperm.xlu0 %5831, %v4393_v0   ;;  %v4396_v7 = vld [vmem:[%s8943_s15 + $0xd8] sm:$0xff]  ;;  %v4395_v0 = vld [vmem:[%s8943_s15 + $0xd0] sm:$0xff] }
 0x192   :  { %v7536_v57 = vpop.permute.xlu1 %2405 }
 0x193   :  { %9041 = vst [vmem:[#allocation66_spill] sm:$0xff] %v7536_v57 }
 0x195   :  { %3886 = vperm.xlu1 %5832, %v3732_v18   ;;  %3881 = vperm.xlu0 %5831, %v3731_v33   ;;  %v3734_v18 = vld [vmem:[%s8942_s13 + $0xf8] sm:$0xff]  ;;  %v3733_v33 = vld [vmem:[%s8942_s13 + $0xf0] sm:$0xff] }
 0x196   :  { %5643 = vmatmul.mubr.msk.bf16.gmra.mrb[56].mxu1 %vm1065_vm1, %v5883_v14  ;;  %v5885_v14 = vld [vmem:[%s8940_s2 + $0xf8] sm:$0xff]  }
 0x197   :  { %5646 = vmatprep.mubr.msk.bf16.mxu1 %vm1065_vm1, %v5884_v11  ;;  %v4398_v11 = vld [vmem:[%s8943_s15 + $0xe8] sm:$0xff] }
 0x199   :  { %4542 = vperm.xlu1 %5832, %v4396_v7   ;;  %4537 = vperm.xlu0 %5831, %v4395_v0   ;;  %v4397_v7 = vld [vmem:[%s8943_s15 + $0xe0] sm:$0xff]  ;;  %v3736_v0 = vld [vmem:[%s8942_s13 + $0x108] sm:$0xff] }
 0x19d   :  { %3896 = vperm.xlu1 %5832, %v3734_v18   ;;  %3891 = vperm.xlu0 %5831, %v3733_v33   ;;  %v3735_v18 = vld [vmem:[%s8942_s13 + $0x100] sm:$0xff]  ;;  %v7553_v33 = vpop.permute.xlu1 %1730 }
 0x19e   :  { %5647 = vmatmul.mubr.msk.bf16.gmra.mrb[60].mxu1 %vm1065_vm1, %v5885_v14  ;;  %9043 = vst [vmem:[#allocation68_spill] sm:$0xff] %v7553_v33  ;;  %v7555_v14 = vpop.permute.xlu0 %1725 }
 0x19f   :  { %9044 = vst [vmem:[#allocation69_spill] sm:$0xff] %v7555_v14 }
 0x1a1   :  { %4552 = vperm.xlu1 %5832, %v4398_v11   ;;  %4547 = vperm.xlu0 %5831, %v4397_v7   ;;  %v4399_v11 = vld [vmem:[%s8943_s15 + $0xf0] sm:$0xff]  ;;  %v7563_v7 = vpop.permute.xlu1 %2435 }
 0x1a2   :  { %9045 = vst [vmem:[#allocation70_spill] sm:$0xff] %v7563_v7  ;;  %v7565_v57 = vpop.permute.xlu0 %2430  ;;  %v4401_v7 = vld [vmem:[%s8943_s15 + $0x100] sm:$0xff] }
 0x1a3   :  { %9046 = vst [vmem:[#allocation71_spill] sm:$0xff] %v7565_v57  ;;  %v4404_v57 = vld [vmem:[%s8943_s15 + $0x118] sm:$0xff] }
 0x1a5   :  { %3906 = vperm.xlu1 %5832, %v3736_v0   ;;  %3901 = vperm.xlu0 %5831, %v3735_v18   ;;  %v3737_v0 = vld [vmem:[%s8942_s13 + $0x110] sm:$0xff]  ;;  %v4402_v18 = vld [vmem:[%s8943_s15 + $0x108] sm:$0xff] }
 0x1a9   :  { %4562 = vperm.xlu1 %5832, %v4400_v10   ;;  %4557 = vperm.xlu0 %5831, %v4399_v11   ;;  %v7579_v10 = vpop.permute.xlu1 %1740  ;;  %v7581_v11 = vpop.permute.xlu0 %1735 }
 0x1aa   :  { %9047 = vst [vmem:[#allocation72_spill] sm:$0xff] %v7579_v10  ;;  %9048 = vst [vmem:[#allocation73_spill] sm:$0xff] %v7581_v11  ;;  %v5886_v10 = vld [vmem:[%s8975_s26 + $0x34] ss:$8 sps:$4 sm:$0xff]  }
 0x1ab   :  { %5189 = vmatprep.mubr.msk.bf16.mxu0 %vm288_vm0, %v5886_v10  ;;  %v5895_v10 = vld [vmem:[%s8975_s26 + $0x54] ss:$8 sps:$4 sm:$0xff]  }
 0x1ad   :  { %3916 = vperm.xlu1 %5832, %v3738_v15   ;;  %3911 = vperm.xlu0 %5831, %v3737_v0   ;;  %v4403_v15 = vld [vmem:[%s8943_s15 + $0x110] sm:$0xff]  ;;  %v7589_v0 = vpop.permute.xlu1 %2445  ;;  %v7591_v33 = vpop.permute.xlu0 %2440 }
 0x1ae   :  { %9049 = vst [vmem:[#allocation74_spill] sm:$0xff] %v7589_v0  ;;  %9050 = vst [vmem:[#allocation75_spill] sm:$0xff] %v7591_v33 }
 0x1b1   :  { %4572 = vperm.xlu1 %5832, %v4402_v18   ;;  %4567 = vperm.xlu0 %5831, %v4401_v7   ;;  %v5888_v7 = vld [vmem:[%s8975_s26 + $0x30] ss:$8 sps:$4 sm:$0xff]   ;;  %v5889_v18 = vld [vmem:[%s8975_s26 + $0x44] ss:$8 sps:$4 sm:$0xff]  }
 0x1b2   :  { %382 = vmatmul.mubr.bf16.gmra.mrb[12].mxu0 %v5888_v7  ;;  %v5897_v7 = vld [vmem:[%s8975_s26 + $0x50] ss:$8 sps:$4 sm:$0xff]  }
 0x1b3   :  { %5190 = vmatprep.mubr.msk.bf16.mxu0 %vm288_vm0, %v5889_v18  ;;  %v5901_v18 = vld [vmem:[%s8975_s26 + $0x64] ss:$8 sps:$4 sm:$0xff]  }
 0x1b5   :  { %4582 = vperm.xlu1 %5832, %v4404_v57   ;;  %4577 = vperm.xlu0 %5831, %v4403_v15   ;;  %v5891_v57 = vld [vmem:[%s8975_s26 + $0x40] ss:$8 sps:$4 sm:$0xff]   ;;  %v5894_v15 = vld [vmem:[%s8944_s4 + $0x4] ss:$8 sps:$4 sm:$0xff]  }
 0x1b6   :  { %1995 = vmatprep.mubr.bf16.mxu1 %v5894_v15  ;;  %v5907_v15 = vld [vmem:[%s8975_s26 + $0x74] ss:$8 sps:$4 sm:$0xff]  }
 0x1ba   :  { %390 = vmatmul.mubr.bf16.gmra.mrb[16].mxu0 %v5891_v57  ;;  %v5903_v57 = vld [vmem:[%s8975_s26 + $0x60] ss:$8 sps:$4 sm:$0xff]  }
 0x1bb   :  { %5191 = vmatprep.mubr.msk.bf16.mxu0 %vm288_vm0, %v5895_v10  ;;  %v5909_v10 = vld [vmem:[%s8975_s26 + $0x70] ss:$8 sps:$4 sm:$0xff]  }
 0x1c2   :  { %398 = vmatmul.mubr.bf16.gmra.mrb[20].mxu0 %v5897_v7  ;;  %v5913_v7 = vld [vmem:[%s8975_s26 + $0x84] ss:$8 sps:$4 sm:$0xff]  }
 0x1c3   :  { %5192 = vmatprep.mubr.msk.bf16.mxu0 %vm288_vm0, %v5901_v18  ;;  %v5915_v18 = vld [vmem:[%s8975_s26 + $0x80] ss:$8 sps:$4 sm:$0xff]  }
 0x1ca   :  { %406 = vmatmul.mubr.bf16.gmra.mrb[24].mxu0 %v5903_v57  ;;  %v5919_v57 = vld [vmem:[%s8975_s26 + $0x94] ss:$8 sps:$4 sm:$0xff]  }
 0x1cb   :  { %5193 = vmatprep.mubr.msk.bf16.mxu0 %vm288_vm0, %v5907_v15  ;;  %v5921_v15 = vld [vmem:[%s8975_s26 + $0x90] ss:$8 sps:$4 sm:$0xff]  }
 0x1d2   :  { %414 = vmatmul.mubr.bf16.gmra.mrb[28].mxu0 %v5909_v10  ;;  %v5925_v10 = vld [vmem:[%s8975_s26 + $0xa4] ss:$8 sps:$4 sm:$0xff]  }
 0x1d3   :  { %5194 = vmatprep.mubr.msk.bf16.mxu0 %vm288_vm0, %v5913_v7  ;;  %v5927_v7 = vld [vmem:[%s8975_s26 + $0xa0] ss:$8 sps:$4 sm:$0xff]  }
 0x1da   :  { %422 = vmatmul.mubr.bf16.gmra.mrb[32].mxu0 %v5915_v18  ;;  %v5931_v18 = vld [vmem:[%s8975_s26 + $0xb4] ss:$8 sps:$4 sm:$0xff]  }
 0x1db   :  { %5195 = vmatprep.mubr.msk.bf16.mxu0 %vm288_vm0, %v5919_v57  ;;  %v5933_v57 = vld [vmem:[%s8975_s26 + $0xb0] ss:$8 sps:$4 sm:$0xff]  }
 0x1e2   :  { %430 = vmatmul.mubr.bf16.gmra.mrb[36].mxu0 %v5921_v15 }
 0x1e3   :  { %5196 = vmatprep.mubr.msk.bf16.mxu0 %vm288_vm0, %v5925_v10 }
 0x1ea   :  { %438 = vmatmul.mubr.bf16.gmra.mrb[40].mxu0 %v5927_v7 }
 0x1eb   :  { %5197 = vmatprep.mubr.msk.bf16.mxu0 %vm288_vm0, %v5931_v18  ;;  %v5941_v18 = vld [vmem:[%s8945_s6 + $0x4] ss:$8 sps:$4 sm:$0xff]  }
 0x1f2   :  { %446 = vmatmul.mubr.bf16.gmra.mrb[44].mxu0 %v5933_v57 }
 0x1f3   :  { %2710 = vmatprep.mubr.bf16.mxu0 %v5941_v18 }
 0x1f9   :  { %v5588_v15 = vpop.f32.mrb[0].mxu1 }
 0x1fa   :  { %v1205_v0 = vadd.f32 %v5588_v15, %v6766_v22  ;;  %v1196_v33 = vpop.f32.mrb[1].mxu1 }
 0x1fb   :  { %v5589_v11 = vpop.f32.mrb[2].mxu1  ;;  %v1197_v14 = vadd.f32 %v1196_v33, %v6768_v23 }
 0x1fc   :  { %v1208_v10 = vadd.f32 %v5589_v11, %v6776_v26  ;;  %v1199_v7 = vpop.f32.mrb[3].mxu1  ;;  %v1453_v25 = vmax.f32 %v1205_v0, 0.0 }
 0x1fd   :  { %v1200_v44 = vadd.f32 %v1199_v7, %v6778_v27  ;;  %v1451_v58 = vmax.f32 %v1197_v14, 0.0 }
 0x1fe   :  { %v1454_v40 = vmax.f32 %v1208_v10, 0.0 }
 0x1ff   :  { %v1452_v61 = vmax.f32 %v1200_v44, 0.0 }
 0x200   :  { %v1552_v45 = vpack.c.bf16 %v1454_v40, %v1453_v25 }
 0x201   :  { %v5592_v16 = vpop.f32.mrb[4].mxu1  ;;  %v1551_v22 = vpack.c.bf16 %v1452_v61, %v1451_v58 }
 0x202   :  { %v1221_v57 = vadd.f32 %v5592_v16, %v6818_v43  ;;  %v1212_v15 = vpop.f32.mrb[5].mxu1 }
 0x203   :  { %v5593_v23 = vpop.f32.mrb[6].mxu1  ;;  %v1213_v26 = vadd.f32 %v1212_v15, %v6798_v35  ;;  %1964 = vmatpush1.bf16.msra.mxu1 %v1551_v22 }
 0x204   :  { %v1224_v33 = vadd.f32 %v5593_v23, %v6816_v42  ;;  %v1215_v27 = vpop.f32.mrb[7].mxu1  ;;  %1965 = vmatprep.subr.bf16.mxu1 %v9000_v41  ;;  %v1457_v44 = vmax.f32 %v1221_v57, 0.0 }
 0x205   :  { %v1216_v25 = vadd.f32 %v1215_v27, %v6796_v34  ;;  %v1455_v14 = vmax.f32 %v1213_v26, 0.0 }
 0x206   :  { %v1458_v40 = vmax.f32 %v1224_v33, 0.0 }
 0x207   :  { %v1456_v58 = vmax.f32 %v1216_v25, 0.0  ;;  %1966 = vmatpush1.bf16.msra.mxu1 %v1552_v45 }
 0x208   :  { %v1554_v11 = vpack.c.bf16 %v1458_v40, %v1457_v44  ;;  %1967 = vmatprep.subr.bf16.mxu1 %v9000_v41 }
 0x209   :  { %v5596_v43 = vpop.f32.mrb[8].mxu1  ;;  %v1553_v16 = vpack.c.bf16 %v1456_v58, %v1455_v14 }
 0x20a   :  { %v1237_v35 = vadd.f32 %v5596_v43, %v6862_v60  ;;  %v1228_v61 = vpop.f32.mrb[9].mxu1 }
 0x20b   :  { %v5597_v42 = vpop.f32.mrb[10].mxu1  ;;  %v1229_v0 = vadd.f32 %v1228_v61, %v6838_v51  ;;  %1968 = vmatpush1.bf16.msra.mxu1 %v1553_v16 }
 0x20c   :  { %v1240_v10 = vadd.f32 %v5597_v42, %v6860_v59  ;;  %v1231_v7 = vpop.f32.mrb[11].mxu1  ;;  %1969 = vmatprep.subr.bf16.mxu1 %v9000_v41  ;;  %v1461_v34 = vmax.f32 %v1237_v35, 0.0 }
 0x20d   :  { %v1232_v45 = vadd.f32 %v1231_v7, %v6836_v50  ;;  %v1459_v22 = vmax.f32 %v1229_v0, 0.0 }
 0x20e   :  { %v1462_v18 = vmax.f32 %v1240_v10, 0.0 }
 0x20f   :  { %v1460_v15 = vmax.f32 %v1232_v45, 0.0  ;;  %1970 = vmatpush1.bf16.msra.mxu1 %v1554_v11 }
 0x210   :  { %v1556_v57 = vpack.c.bf16 %v1462_v18, %v1461_v34  ;;  %1971 = vmatprep.subr.bf16.mxu1 %v9000_v41 }
 0x211   :  { %v5600_v23 = vpop.f32.mrb[12].mxu1  ;;  %v1555_v60 = vpack.c.bf16 %v1460_v15, %v1459_v22 }
 0x212   :  { %v1253_v51 = vadd.f32 %v5600_v23, %v6902_v13  ;;  %v1244_v26 = vpop.f32.mrb[13].mxu1 }
 0x213   :  { %v5601_v59 = vpop.f32.mrb[14].mxu1  ;;  %v1245_v33 = vadd.f32 %v1244_v26, %v6882_v5  ;;  %1972 = vmatpush1.bf16.msra.mxu1 %v1555_v60 }
 0x214   :  { %v1256_v27 = vadd.f32 %v5601_v59, %v6900_v12  ;;  %v1247_v44 = vpop.f32.mrb[15].mxu1  ;;  %1973 = vmatprep.subr.bf16.mxu1 %v9000_v41  ;;  %v1465_v50 = vmax.f32 %v1253_v51, 0.0 }
 0x215   :  { %v1248_v25 = vadd.f32 %v1247_v44, %v6880_v4  ;;  %v1463_v14 = vmax.f32 %v1245_v33, 0.0 }
 0x216   :  { %v1466_v40 = vmax.f32 %v1256_v27, 0.0 }
 0x217   :  { %v1464_v58 = vmax.f32 %v1248_v25, 0.0  ;;  %1974 = vmatpush1.bf16.msra.mxu1 %v1556_v57 }
 0x218   :  { %v1558_v11 = vpack.c.bf16 %v1466_v40, %v1465_v50  ;;  %1975 = vmatprep.subr.bf16.mxu1 %v9000_v41 }
 0x219   :  { %v5604_v43 = vpop.f32.mrb[16].mxu1  ;;  %v1557_v13 = vpack.c.bf16 %v1464_v58, %v1463_v14 }
 0x21a   :  { %v1269_v5 = vadd.f32 %v5604_v43, %v6942_v37  ;;  %v1260_v16 = vpop.f32.mrb[17].mxu1 }
 0x21b   :  { %v5605_v12 = vpop.f32.mrb[18].mxu1  ;;  %v1261_v35 = vadd.f32 %v1260_v16, %v6922_v21  ;;  %1976 = vmatpush1.bf16.msra.mxu1 %v1557_v13 }
 0x21c   :  { %v1272_v61 = vadd.f32 %v5605_v12, %v6940_v36  ;;  %v1263_v42 = vpop.f32.mrb[19].mxu1  ;;  %1977 = vmatprep.subr.bf16.mxu1 %v9000_v41  ;;  %v1469_v4 = vmax.f32 %v1269_v5, 0.0 }
 0x21d   :  { %v1264_v10 = vadd.f32 %v1263_v42, %v6920_v20  ;;  %v1467_v7 = vmax.f32 %v1261_v35, 0.0 }
 0x21e   :  { %v1470_v0 = vmax.f32 %v1272_v61, 0.0 }
 0x21f   :  { %v1468_v18 = vmax.f32 %v1264_v10, 0.0  ;;  %1978 = vmatpush1.bf16.msra.mxu1 %v1558_v11 }
 0x220   :  { %v1560_v34 = vpack.c.bf16 %v1470_v0, %v1469_v4  ;;  %1979 = vmatprep.subr.bf16.mxu1 %v9000_v41 }
 0x221   :  { %v5608_v45 = vpop.f32.mrb[20].mxu1  ;;  %v1559_v37 = vpack.c.bf16 %v1468_v18, %v1467_v7 }
 0x222   :  { %v1285_v21 = vadd.f32 %v5608_v45, %v6982_v6  ;;  %v1276_v22 = vpop.f32.mrb[21].mxu1 }
 0x223   :  { %v5609_v36 = vpop.f32.mrb[22].mxu1  ;;  %v1277_v57 = vadd.f32 %v1276_v22, %v6962_v53  ;;  %1980 = vmatpush1.bf16.msra.mxu1 %v1559_v37 }
 0x224   :  { %v1288_v15 = vadd.f32 %v5609_v36, %v6980_v3  ;;  %v1279_v23 = vpop.f32.mrb[23].mxu1  ;;  %1981 = vmatprep.subr.bf16.mxu1 %v9000_v41  ;;  %v1473_v20 = vmax.f32 %v1285_v21, 0.0 }
 0x225   :  { %v1280_v51 = vadd.f32 %v1279_v23, %v6960_v52  ;;  %v1471_v26 = vmax.f32 %v1277_v57, 0.0 }
 0x226   :  { %v1474_v60 = vmax.f32 %v1288_v15, 0.0 }
 0x227   :  { %v1472_v33 = vmax.f32 %v1280_v51, 0.0  ;;  %1982 = vmatpush1.bf16.msra.mxu1 %v1560_v34 }
 0x228   :  { %v1562_v59 = vpack.c.bf16 %v1474_v60, %v1473_v20  ;;  %1983 = vmatprep.subr.bf16.mxu1 %v9000_v41 }
 0x229   :  { %v5612_v27 = vpop.f32.mrb[24].mxu1  ;;  %v1561_v6 = vpack.c.bf16 %v1472_v33, %v1471_v26 }
 0x22a   :  { %v1301_v53 = vadd.f32 %v5612_v27, %v7028_v62  ;;  %v1292_v44 = vpop.f32.mrb[25].mxu1 }
 0x22b   :  { %v5613_v3 = vpop.f32.mrb[26].mxu1  ;;  %v1293_v50 = vadd.f32 %v1292_v44, %v7002_v24  ;;  %1984 = vmatpush1.bf16.msra.mxu1 %v1561_v6 }
 0x22c   :  { %v1304_v40 = vadd.f32 %v5613_v3, %v7020_v49  ;;  %v1295_v25 = vpop.f32.mrb[27].mxu1  ;;  %1985 = vmatprep.subr.bf16.mxu1 %v9000_v41  ;;  %v1477_v52 = vmax.f32 %v1301_v53, 0.0 }
 0x22d   :  { %v1296_v11 = vadd.f32 %v1295_v25, %v7000_v19  ;;  %v1475_v58 = vmax.f32 %v1293_v50, 0.0 }
 0x22e   :  { %v1478_v14 = vmax.f32 %v1304_v40, 0.0 }
 0x22f   :  { %v1476_v13 = vmax.f32 %v1296_v11, 0.0  ;;  %1986 = vmatpush1.bf16.msra.mxu1 %v1562_v59 }
 0x230   :  { %v1564_v43 = vpack.c.bf16 %v1478_v14, %v1477_v52  ;;  %1987 = vmatprep.subr.bf16.mxu1 %v9000_v41 }
 0x231   :  { %v5616_v5 = vpop.f32.mrb[28].mxu1  ;;  %v1563_v62 = vpack.c.bf16 %v1476_v13, %v1475_v58 }
 0x232   :  { %v1317_v24 = vadd.f32 %v5616_v5, %v7080_v2  ;;  %v1308_v16 = vpop.f32.mrb[29].mxu1 }
 0x233   :  { %v5617_v49 = vpop.f32.mrb[30].mxu1  ;;  %v1309_v12 = vadd.f32 %v1308_v16, %v7054_v54  ;;  %1988 = vmatpush1.bf16.msra.mxu1 %v1563_v62 }
 0x234   :  { %v1320_v35 = vadd.f32 %v5617_v49, %v7072_v48  ;;  %v1311_v61 = vpop.f32.mrb[31].mxu1  ;;  %1989 = vmatprep.subr.bf16.mxu1 %v9000_v41  ;;  %v1481_v19 = vmax.f32 %v1317_v24, 0.0 }
 0x235   :  { %v1312_v4 = vadd.f32 %v1311_v61, %v7046_v32  ;;  %v1479_v0 = vmax.f32 %v1309_v12, 0.0 }
 0x236   :  { %v1482_v42 = vmax.f32 %v1320_v35, 0.0 }
 0x237   :  { %v1480_v7 = vmax.f32 %v1312_v4, 0.0  ;;  %1990 = vmatpush1.bf16.msra.mxu1 %v1564_v43  ;;  %v9051_v4 = vld [vmem:[#allocation2_spill] sm:$0xff] }
 0x238   :  { %v1566_v10 = vpack.c.bf16 %v1482_v42, %v1481_v19  ;;  %1991 = vmatprep.subr.bf16.mxu1 %v9000_v41 }
 0x239   :  { %v5620_v34 = vpop.f32.mrb[32].mxu1  ;;  %v1565_v2 = vpack.c.bf16 %v1480_v7, %v1479_v0 }
 0x23a   :  { %v1333_v54 = vadd.f32 %v5620_v34, %v6808_v39  ;;  %v1324_v18 = vpop.f32.mrb[33].mxu1  ;;  %v5892_v39 = vld [vmem:[%s8944_s4] ss:$8 sps:$4 sm:$0xff]  }
 0x23b   :  { %v1325_v48 = vadd.f32 %v1324_v18, %v6788_v31  ;;  %v5621_v45 = vpop.f32.mrb[34].mxu1  ;;  %1992 = vmatpush1.bf16.msra.mxu1 %v1565_v2  ;;  %v5898_v31 = vld [vmem:[%s8944_s4 + $0x14] ss:$8 sps:$4 sm:$0xff]  }
 0x23c   :  { %v1336_v37 = vadd.f32 %v5621_v45, %v6806_v38  ;;  %v1327_v21 = vpop.f32.mrb[35].mxu1  ;;  %1993 = vmatprep.subr.bf16.mxu1 %v9000_v41  ;;  %v1485_v22 = vmax.f32 %v1333_v54, 0.0 }
 0x23d   :  { %v1328_v32 = vadd.f32 %v1327_v21, %v6786_v30  ;;  %v1483_v57 = vmax.f32 %v1325_v48, 0.0  ;;  %v9052_v48 = vld [vmem:[#allocation6_spill] sm:$0xff]  ;;  %v9053_v21 = vld [vmem:[#allocation4_spill] sm:$0xff] }
 0x23e   :  { %v1486_v36 = vmax.f32 %v1336_v37, 0.0 }
 0x23f   :  { %v1484_v15 = vmax.f32 %v1328_v32, 0.0  ;;  %1994 = vmatpush1.bf16.msra.mxu1 %v1566_v10 }
 0x240   :  { %v2267_v23 = vpack.c.bf16 %v1486_v36, %v1485_v22  ;;  %3147 = vmatprep.subr.bf16.mxu1 %v9000_v41  ;;  %v9054_v36 = vld [vmem:[#allocation5_spill] sm:$0xff] }
 0x241   :  { %v2266_v38 = vpack.c.bf16 %v1484_v15, %v1483_v57  ;;  %v5624_v20 = vpop.f32.mrb[36].mxu1 }
 0x242   :  { %v1349_v30 = vadd.f32 %v5624_v20, %v6852_v56  ;;  %v1340_v60 = vpop.f32.mrb[37].mxu1  ;;  %1996 = vmatmul.mubr.bf16.vlgmr.msra.gmra.mrb[64].mxu1 %v5892_v39  ;;  %v9055_v39 = vld [vmem:[#allocation3_spill] sm:$0xff] }
 0x243   :  { %v1341_v51 = vadd.f32 %v1340_v60, %v6828_v47  ;;  %v5625_v26 = vpop.f32.mrb[38].mxu1  ;;  %2679 = vmatpush1.bf16.msra.mxu0 %v2266_v38  ;;  %2003 = vmatprep.mubr.bf16.mxu1 %v5898_v31  ;;  %v5900_v47 = vld [vmem:[%s8944_s4 + $0x10] ss:$8 sps:$4 sm:$0xff]   ;;  %v5918_v60 = vld [vmem:[%s8944_s4 + $0x40] ss:$8 sps:$4 sm:$0xff]  }
 0x244   :  { %v1352_v59 = vadd.f32 %v5625_v26, %v6850_v55  ;;  %v1343_v33 = vpop.f32.mrb[39].mxu1  ;;  %2680 = vmatprep.subr.bf16.mxu0 %v9000_v41  ;;  %v1489_v6 = vmax.f32 %v1349_v30, 0.0  ;;  %v5904_v55 = vld [vmem:[%s8944_s4 + $0x24] ss:$8 sps:$4 sm:$0xff]   ;;  %v5922_v26 = vld [vmem:[%s8944_s4 + $0x54] ss:$8 sps:$4 sm:$0xff]  }
 0x245   :  { %v1344_v27 = vadd.f32 %v1343_v33, %v6826_v46  ;;  %v1487_v44 = vmax.f32 %v1341_v51, 0.0 }
 0x246   :  { %v1490_v53 = vmax.f32 %v1352_v59, 0.0 }
 0x247   :  { %v1488_v3 = vmax.f32 %v1344_v27, 0.0  ;;  %2681 = vmatpush1.bf16.msra.mxu0 %v2267_v23  ;;  %v9056_v27 = vld [vmem:[#allocation10_spill] sm:$0xff] }
 0x248   :  { %v2269_v56 = vpack.c.bf16 %v1490_v53, %v1489_v6  ;;  %2682 = vmatprep.subr.bf16.mxu0 %v9000_v41 }
 0x249   :  { %v2268_v50 = vpack.c.bf16 %v1488_v3, %v1487_v44  ;;  %v5628_v40 = vpop.f32.mrb[40].mxu1  ;;  %v9057_v44 = vld [vmem:[#allocation8_spill] sm:$0xff] }
 0x24a   :  { %v1365_v46 = vadd.f32 %v5628_v40, %v6892_v9  ;;  %v1356_v25 = vpop.f32.mrb[41].mxu1  ;;  %2004 = vmatmul.mubr.bf16.gmra.mrb[68].mxu1 %v5900_v47  ;;  %v9059_v40 = vld [vmem:[#allocation7_spill] sm:$0xff] }
 0x24b   :  { %v1357_v52 = vadd.f32 %v1356_v25, %v6872_v1  ;;  %v5629_v14 = vpop.f32.mrb[42].mxu1  ;;  %2683 = vmatpush1.bf16.msra.mxu0 %v2268_v50  ;;  %2011 = vmatprep.mubr.bf16.mxu1 %v5904_v55  ;;  %v5906_v1 = vld [vmem:[%s8944_s4 + $0x20] ss:$8 sps:$4 sm:$0xff]  }
 0x24c   :  { %v1368_v11 = vadd.f32 %v5629_v14, %v6890_v8  ;;  %v1359_v58 = vpop.f32.mrb[43].mxu1  ;;  %2684 = vmatprep.subr.bf16.mxu0 %v9000_v41  ;;  %v1493_v13 = vmax.f32 %v1365_v46, 0.0  ;;  %v5910_v8 = vld [vmem:[%s8944_s4 + $0x34] ss:$8 sps:$4 sm:$0xff]  }
 0x24d   :  { %v1360_v43 = vadd.f32 %v1359_v58, %v6870_v63  ;;  %v1491_v62 = vmax.f32 %v1357_v52, 0.0  ;;  %v5924_v58 = vld [vmem:[%s8944_s4 + $0x50] ss:$8 sps:$4 sm:$0xff]  }
 0x24e   :  { %v1494_v5 = vmax.f32 %v1368_v11, 0.0 }
 0x24f   :  { %v1492_v24 = vmax.f32 %v1360_v43, 0.0  ;;  %2685 = vmatpush1.bf16.msra.mxu0 %v2269_v56  ;;  %v9058_v56 = vld [vmem:[#allocation9_spill] sm:$0xff] }
 0x250   :  { %v2271_v9 = vpack.c.bf16 %v1494_v5, %v1493_v13  ;;  %2686 = vmatprep.subr.bf16.mxu0 %v9000_v41  ;;  %v5928_v13 = vld [vmem:[%s8944_s4 + $0x64] ss:$8 sps:$4 sm:$0xff]  }
 0x251   :  { %v2270_v16 = vpack.c.bf16 %v1492_v24, %v1491_v62  ;;  %v5632_v49 = vpop.f32.mrb[44].mxu1  ;;  %v9060_v24 = vld [vmem:[#allocation14_spill] sm:$0xff] }
 0x252   :  { %v1381_v63 = vadd.f32 %v5632_v49, %v6932_v29  ;;  %v1372_v12 = vpop.f32.mrb[45].mxu1  ;;  %2012 = vmatmul.mubr.bf16.gmra.mrb[72].mxu1 %v5906_v1 }
 0x253   :  { %v1373_v35 = vadd.f32 %v1372_v12, %v6912_v17  ;;  %v5633_v61 = vpop.f32.mrb[46].mxu1  ;;  %2687 = vmatpush1.bf16.msra.mxu0 %v2270_v16  ;;  %2019 = vmatprep.mubr.bf16.mxu1 %v5910_v8  ;;  %v5912_v17 = vld [vmem:[%s8944_s4 + $0x30] ss:$8 sps:$4 sm:$0xff]  }
 0x254   :  { %v1384_v19 = vadd.f32 %v5633_v61, %v6930_v28  ;;  %v1375_v42 = vpop.f32.mrb[47].mxu1  ;;  %2688 = vmatprep.subr.bf16.mxu0 %v9000_v41  ;;  %v1497_v10 = vmax.f32 %v1381_v63, 0.0  ;;  %v5916_v28 = vld [vmem:[%s8944_s4 + $0x44] ss:$8 sps:$4 sm:$0xff]   ;;  %v9061_v8 = vld [vmem:[#allocation12_spill] sm:$0xff]  ;;  %v9062_v63 = vld [vmem:[#allocation13_spill] sm:$0xff] }
 0x255   :  { %v1376_v0 = vadd.f32 %v1375_v42, %v9051_v4  ;;  %v1495_v34 = vmax.f32 %v1373_v35, 0.0  ;;  %v9063_v61 = vld [vmem:[#allocation11_spill] sm:$0xff] }
 0x256   :  { %v1498_v7 = vmax.f32 %v1384_v19, 0.0 }
 0x257   :  { %v1496_v2 = vmax.f32 %v1376_v0, 0.0  ;;  %2689 = vmatpush1.bf16.msra.mxu0 %v2271_v9 }
 0x258   :  { %v2273_v29 = vpack.c.bf16 %v1498_v7, %v1497_v10  ;;  %2690 = vmatprep.subr.bf16.mxu0 %v9000_v41  ;;  %v5930_v7 = vld [vmem:[%s8944_s4 + $0x60] ss:$8 sps:$4 sm:$0xff]  }
 0x259   :  { %v2272_v54 = vpack.c.bf16 %v1496_v2, %v1495_v34  ;;  %v5636_v18 = vpop.f32.mrb[48].mxu1  ;;  %v5934_v2 = vld [vmem:[%s8944_s4 + $0x74] ss:$8 sps:$4 sm:$0xff]  }
 0x25a   :  { %v1397_v45 = vadd.f32 %v5636_v18, %v9052_v48  ;;  %v1388_v37 = vpop.f32.mrb[49].mxu1  ;;  %2020 = vmatmul.mubr.bf16.gmra.mrb[76].mxu1 %v5912_v17  ;;  %v9065_v48 = vld [vmem:[#allocation16_spill] sm:$0xff] }
 0x25b   :  { %v1389_v32 = vadd.f32 %v1388_v37, %v9053_v21  ;;  %v5637_v22 = vpop.f32.mrb[50].mxu1  ;;  %2691 = vmatpush1.bf16.msra.mxu0 %v2272_v54  ;;  %2027 = vmatprep.mubr.bf16.mxu1 %v5916_v28  ;;  %v9064_v28 = vld [vmem:[#allocation19_spill] sm:$0xff]  ;;  %v9066_v21 = vld [vmem:[#allocation18_spill] sm:$0xff] }
 0x25c   :  { %v1400_v57 = vadd.f32 %v5637_v22, %v9054_v36  ;;  %v1391_v15 = vpop.f32.mrb[51].mxu1  ;;  %2692 = vmatprep.subr.bf16.mxu0 %v9000_v41  ;;  %v1501_v31 = vmax.f32 %v1397_v45, 0.0  ;;  %v9067_v36 = vld [vmem:[#allocation15_spill] sm:$0xff] }
 0x25d   :  { %v1392_v23 = vadd.f32 %v1391_v15, %v9055_v39  ;;  %v1499_v20 = vmax.f32 %v1389_v32, 0.0 }
 0x25e   :  { %v1502_v38 = vmax.f32 %v1400_v57, 0.0 }
 0x25f   :  { %v1500_v30 = vmax.f32 %v1392_v23, 0.0  ;;  %2693 = vmatpush1.bf16.msra.mxu0 %v2273_v29 }
 0x260   :  { %v2275_v51 = vpack.c.bf16 %v1502_v38, %v1501_v31  ;;  %2694 = vmatprep.subr.bf16.mxu0 %v9000_v41  ;;  %v5936_v38 = vld [vmem:[%s8944_s4 + $0x70] ss:$8 sps:$4 sm:$0xff]  }
 0x261   :  { %v2274_v59 = vpack.c.bf16 %v1500_v30, %v1499_v20  ;;  %v5640_v33 = vpop.f32.mrb[52].mxu1  ;;  %v5937_v30 = vld [vmem:[%s8944_s4 + $0x84] ss:$8 sps:$4 sm:$0xff]  }
 0x262   :  { %v1413_v6 = vadd.f32 %v5640_v33, %v9056_v27  ;;  %v1404_v53 = vpop.f32.mrb[53].mxu1  ;;  %2028 = vmatmul.mubr.bf16.gmra.mrb[80].mxu1 %v5918_v60  ;;  %v5943_v33 = vld [vmem:[%s8944_s4 + $0x94] ss:$8 sps:$4 sm:$0xff]  }
 0x263   :  { %v1405_v3 = vadd.f32 %v1404_v53, %v9057_v44  ;;  %v5641_v47 = vpop.f32.mrb[54].mxu1  ;;  %2695 = vmatpush1.bf16.msra.mxu0 %v2274_v59  ;;  %2035 = vmatprep.mubr.bf16.mxu1 %v5922_v26  ;;  %v5942_v26 = vld [vmem:[%s8944_s4 + $0x80] ss:$8 sps:$4 sm:$0xff]   ;;  %v9068_v59 = vld [vmem:[#allocation17_spill] sm:$0xff] }
 0x264   :  { %v1416_v55 = vadd.f32 %v5641_v47, %v9058_v56  ;;  %v1407_v50 = vpop.f32.mrb[55].mxu1  ;;  %2696 = vmatprep.subr.bf16.mxu0 %v9000_v41  ;;  %v1505_v25 = vmax.f32 %v1413_v6, 0.0  ;;  %v5945_v27 = vld [vmem:[%s8945_s6 + $0x14] ss:$8 sps:$4 sm:$0xff]   ;;  %v5948_v53 = vld [vmem:[%s8945_s6 + $0x10] ss:$8 sps:$4 sm:$0xff]  }
 0x265   :  { %v1408_v46 = vadd.f32 %v1407_v50, %v9059_v40  ;;  %v1503_v14 = vmax.f32 %v1405_v3, 0.0  ;;  %v9069_v6 = vld [vmem:[#allocation21_spill] sm:$0xff]  ;;  %v5949_v47 = vld [vmem:[%s8944_s4 + $0xa4] ss:$8 sps:$4 sm:$0xff]  }
 0x266   :  { %v1506_v52 = vmax.f32 %v1416_v55, 0.0  ;;  %v5947_v44 = vld [vmem:[%s8944_s4 + $0x90] ss:$8 sps:$4 sm:$0xff]   ;;  %v5951_v56 = vld [vmem:[%s8945_s6 + $0x24] ss:$8 sps:$4 sm:$0xff]  }
 0x267   :  { %v1504_v11 = vmax.f32 %v1408_v46, 0.0  ;;  %2697 = vmatpush1.bf16.msra.mxu0 %v2275_v51  ;;  %v5939_v51 = vld [vmem:[%s8945_s6] ss:$8 sps:$4 sm:$0xff]   ;;  %v9070_v3 = vld [vmem:[#allocation25_spill] sm:$0xff] }
 0x268   :  { %v2277_v43 = vpack.c.bf16 %v1506_v52, %v1505_v25  ;;  %2698 = vmatprep.subr.bf16.mxu0 %v9000_v41  ;;  %v5954_v46 = vld [vmem:[%s8945_s6 + $0x20] ss:$8 sps:$4 sm:$0xff]  }
 0x269   :  { %v2276_v5 = vpack.c.bf16 %v1504_v11, %v1503_v14  ;;  %v5644_v62 = vpop.f32.mrb[56].mxu1  ;;  %v5953_v52 = vld [vmem:[%s8944_s4 + $0xa0] ss:$8 sps:$4 sm:$0xff]   ;;  %v5957_v14 = vld [vmem:[%s8945_s6 + $0x34] ss:$8 sps:$4 sm:$0xff]  }
 0x26a   :  { %v1429_v1 = vadd.f32 %v5644_v62, %v9060_v24  ;;  %v1420_v9 = vpop.f32.mrb[57].mxu1  ;;  %2036 = vmatmul.mubr.bf16.gmra.mrb[84].mxu1 %v5924_v58  ;;  %v5955_v11 = vld [vmem:[%s8944_s4 + $0xb4] ss:$8 sps:$4 sm:$0xff]   ;;  %v5959_v24 = vld [vmem:[%s8944_s4 + $0xb0] ss:$8 sps:$4 sm:$0xff]  }
 0x26b   :  { %v1421_v16 = vadd.f32 %v1420_v9, %v9061_v8  ;;  %v5645_v49 = vpop.f32.mrb[58].mxu1  ;;  %2699 = vmatpush1.bf16.msra.mxu0 %v2276_v5  ;;  %2043 = vmatprep.mubr.bf16.mxu1 %v5928_v13  ;;  %v5960_v5 = vld [vmem:[%s8945_s6 + $0x30] ss:$8 sps:$4 sm:$0xff]   ;;  %v5961_v9 = vld [vmem:[%s8944_s4 + $0xc4] ss:$8 sps:$4 sm:$0xff]  }
 0x26c   :  { %v1432_v12 = vadd.f32 %v5645_v49, %v9062_v63  ;;  %v1423_v35 = vpop.f32.mrb[59].mxu1  ;;  %2700 = vmatprep.subr.bf16.mxu0 %v9000_v41  ;;  %v1509_v42 = vmax.f32 %v1429_v1, 0.0  ;;  %v5963_v1 = vld [vmem:[%s8945_s6 + $0x44] ss:$8 sps:$4 sm:$0xff]   ;;  %v5966_v63 = vld [vmem:[%s8945_s6 + $0x40] ss:$8 sps:$4 sm:$0xff]  }
 0x26d   :  { %v1424_v19 = vadd.f32 %v1423_v35, %v9063_v61  ;;  %v1507_v0 = vmax.f32 %v1421_v16, 0.0  ;;  %v5965_v35 = vld [vmem:[%s8944_s4 + $0xc0] ss:$8 sps:$4 sm:$0xff]   ;;  %v5969_v61 = vld [vmem:[%s8945_s6 + $0x54] ss:$8 sps:$4 sm:$0xff]  }
 0x26e   :  { %v1510_v4 = vmax.f32 %v1432_v12, 0.0 }
 0x26f   :  { %v1508_v10 = vmax.f32 %v1424_v19, 0.0  ;;  %2701 = vmatpush1.bf16.msra.mxu0 %v2277_v43  ;;  %v5967_v19 = vld [vmem:[%s8944_s4 + $0xd4] ss:$8 sps:$4 sm:$0xff]  }
 0x270   :  { %v2279_v34 = vpack.c.bf16 %v1510_v4, %v1509_v42  ;;  %2702 = vmatprep.subr.bf16.mxu0 %v9000_v41 }
 0x271   :  { %v2278_v17 = vpack.c.bf16 %v1508_v10, %v1507_v0  ;;  %v5648_v29 = vpop.f32.mrb[60].mxu1  ;;  %v5972_v10 = vld [vmem:[%s8945_s6 + $0x50] ss:$8 sps:$4 sm:$0xff]  }
 0x272   :  { %v1445_v54 = vadd.f32 %v5648_v29, %v9064_v28  ;;  %v1436_v18 = vpop.f32.mrb[61].mxu1  ;;  %2044 = vmatmul.mubr.bf16.gmra.mrb[88].mxu1 %v5930_v7 }
 0x273   :  { %v1437_v45 = vadd.f32 %v1436_v18, %v9065_v48  ;;  %v5649_v37 = vpop.f32.mrb[62].mxu1  ;;  %2703 = vmatpush1.bf16.msra.mxu0 %v2278_v17  ;;  %2051 = vmatprep.mubr.bf16.mxu1 %v5934_v2  ;;  %v5975_v2 = vld [vmem:[%s8945_s6 + $0x64] ss:$8 sps:$4 sm:$0xff]   ;;  %v5978_v18 = vld [vmem:[%s8945_s6 + $0x60] ss:$8 sps:$4 sm:$0xff]  }
 0x274   :  { %v1448_v32 = vadd.f32 %v5649_v37, %v9066_v21  ;;  %v1439_v22 = vpop.f32.mrb[63].mxu1  ;;  %2704 = vmatprep.subr.bf16.mxu0 %v9000_v41  ;;  %v1513_v15 = vmax.f32 %v1445_v54, 0.0  ;;  %v5973_v17 = vld [vmem:[%s8944_s4 + $0xe4] ss:$8 sps:$4 sm:$0xff]   ;;  %v5981_v37 = vld [vmem:[%s8945_s6 + $0x74] ss:$8 sps:$4 sm:$0xff]  }
 0x275   :  { %v1440_v57 = vadd.f32 %v1439_v22, %v9067_v36  ;;  %v1511_v23 = vmax.f32 %v1437_v45, 0.0  ;;  %v5977_v45 = vld [vmem:[%s8944_s4 + $0xe0] ss:$8 sps:$4 sm:$0xff]   ;;  %v5979_v21 = vld [vmem:[%s8944_s4 + $0xf4] ss:$8 sps:$4 sm:$0xff]  }
 0x276   :  { %v1514_v39 = vmax.f32 %v1448_v32, 0.0 }
 0x277   :  { %v1512_v31 = vmax.f32 %v1440_v57, 0.0  ;;  %2705 = vmatpush1.bf16.msra.mxu0 %v2279_v34  ;;  %v5971_v34 = vld [vmem:[%s8944_s4 + $0xd0] ss:$8 sps:$4 sm:$0xff]  }
 0x278   :  { %v2281_v20 = vpack.c.bf16 %v1514_v39, %v1513_v15  ;;  %2706 = vmatprep.subr.bf16.mxu0 %v9000_v41  ;;  %v5984_v57 = vld [vmem:[%s8945_s6 + $0x70] ss:$8 sps:$4 sm:$0xff]  }
 0x279   :  { %v2280_v60 = vpack.c.bf16 %v1512_v31, %v1511_v23  ;;  %v5983_v39 = vld [vmem:[%s8944_s4 + $0xf0] ss:$8 sps:$4 sm:$0xff]   ;;  %v5987_v23 = vld [vmem:[%s8945_s6 + $0x84] ss:$8 sps:$4 sm:$0xff]  }
 0x27a   :  { %2052 = vmatmul.mubr.bf16.gmra.mrb[92].mxu1 %v5936_v38  ;;  %v5985_v31 = vld [vmem:[%s8944_s4 + $0x104] ss:$8 sps:$4 sm:$0xff]  }
 0x27b   :  { %2707 = vmatpush1.bf16.msra.mxu0 %v2280_v60  ;;  %2059 = vmatprep.mubr.bf16.mxu1 %v5937_v30  ;;  %v5990_v60 = vld [vmem:[%s8945_s6 + $0x80] ss:$8 sps:$4 sm:$0xff]  }
 0x27c   :  { %2708 = vmatprep.subr.bf16.mxu0 %v9000_v41 }
 0x27f   :  { %2709 = vmatpush1.bf16.msra.mxu0 %v2281_v20 }
 0x280   :  { %5650 = vmatprep.subr.bf16.mxu0 %v9068_v59 }
 0x282   :  { %2711 = vmatmul.mubr.bf16.vlgmr.msra.gmra.mrb[48].mxu0 %v5939_v51  ;;  %2060 = vmatmul.mubr.bf16.gmra.mrb[96].mxu1 %v5942_v26  ;;  %v5989_v26 = vld [vmem:[%s8944_s4 + $0x100] ss:$8 sps:$4 sm:$0xff]  }
 0x283   :  { %5651 = vmatpush3.bf16.msra.mxu0 %v9068_v59  ;;  %2067 = vmatprep.mubr.bf16.mxu1 %v5943_v33  ;;  %v5993_v59 = vld [vmem:[%s8945_s6 + $0x94] ss:$8 sps:$4 sm:$0xff]  }
 0x284   :  { %5652 = vmatprep.subr.bf16.mxu0 %v9069_v6  ;;  %2718 = vmatprep.mubr.bf16.mxu0 %v5945_v27  ;;  %v5991_v33 = vld [vmem:[%s8944_s4 + $0x114] ss:$8 sps:$4 sm:$0xff]  }
 0x285   :  { %v7835_v55 = vpop.f32.mrb[12].mxu0 }
 0x286   :  { %v385_v50 = vpop.f32.mrb[13].mxu0 }
 0x287   :  { %5653 = vmatpush3.bf16.msra.mxu0 %v9069_v6  ;;  %v7837_v40 = vpop.f32.mrb[14].mxu0 }
 0x288   :  { %5654 = vmatprep.subr.bf16.mxu0 %v9070_v3  ;;  %v388_v25 = vpop.f32.mrb[15].mxu0 }
 0x28a   :  { %2719 = vmatmul.mubr.bf16.gmra.mrb[52].mxu0 %v5948_v53  ;;  %2068 = vmatmul.mubr.bf16.gmra.mrb[100].mxu1 %v5947_v44  ;;  %v5996_v44 = vld [vmem:[%s8945_s6 + $0x90] ss:$8 sps:$4 sm:$0xff]  }
 0x28b   :  { %5655 = vmatpush3.bf16.msra.mxu0 %v9070_v3  ;;  %2075 = vmatprep.mubr.bf16.mxu1 %v5949_v47  ;;  %v5995_v47 = vld [vmem:[%s8944_s4 + $0x110] ss:$8 sps:$4 sm:$0xff]  }
 0x28c   :  { %2726 = vmatprep.mubr.bf16.mxu0 %v5951_v56  ;;  %v5997_v56 = vld [vmem:[%s8945_s6 + $0xa4] ss:$8 sps:$4 sm:$0xff]  }
 0x28d   :  { %v7851_v58 = vpop.f32.mrb[16].mxu0 }
 0x28e   :  { %v393_v43 = vpop.f32.mrb[17].mxu0 }
 0x28f   :  { %v7853_v13 = vpop.f32.mrb[18].mxu0  ;;  %v6002_v43 = vld [vmem:[%s8945_s6 + $0xb0] ss:$8 sps:$4 sm:$0xff]  }
 0x290   :  { %v396_v62 = vpop.f32.mrb[19].mxu0 }
 0x291   :  { %v6005_v62 = vld [vmem:[%s8945_s6 + $0xc0] ss:$8 sps:$4 sm:$0xff]  }
 0x292   :  { %2727 = vmatmul.mubr.bf16.gmra.mrb[56].mxu0 %v5954_v46  ;;  %2076 = vmatmul.mubr.bf16.gmra.mrb[104].mxu1 %v5953_v52  ;;  %v5999_v52 = vld [vmem:[%s8945_s6 + $0xa0] ss:$8 sps:$4 sm:$0xff]  }
 0x293   :  { %2734 = vmatprep.mubr.bf16.mxu0 %v5957_v14  ;;  %2083 = vmatprep.mubr.bf16.mxu1 %v5955_v11  ;;  %v6000_v11 = vld [vmem:[%s8945_s6 + $0xb4] ss:$8 sps:$4 sm:$0xff]  }
 0x295   :  { %v7867_v8 = vpop.f32.mrb[20].mxu0 }
 0x296   :  { %v401_v16 = vpop.f32.mrb[21].mxu0 }
 0x297   :  { %v7869_v49 = vpop.f32.mrb[22].mxu0  ;;  %v6011_v16 = vld [vmem:[%s8945_s6 + $0xe0] ss:$8 sps:$4 sm:$0xff]  }
 0x298   :  { %v404_v12 = vpop.f32.mrb[23].mxu0 }
 0x299   :  { %v6014_v12 = vld [vmem:[%s8945_s6 + $0xf0] ss:$8 sps:$4 sm:$0xff]  }
 0x29a   :  { %2735 = vmatmul.mubr.bf16.gmra.mrb[60].mxu0 %v5960_v5  ;;  %2084 = vmatmul.mubr.bf16.gmra.mrb[108].mxu1 %v5959_v24  ;;  %v6003_v5 = vld [vmem:[%s8945_s6 + $0xc4] ss:$8 sps:$4 sm:$0xff]   ;;  %v6006_v24 = vld [vmem:[%s8945_s6 + $0xd4] ss:$8 sps:$4 sm:$0xff]  }
 0x29b   :  { %2742 = vmatprep.mubr.bf16.mxu0 %v5963_v1  ;;  %2091 = vmatprep.mubr.bf16.mxu1 %v5961_v9  ;;  %v6008_v1 = vld [vmem:[%s8945_s6 + $0xd0] ss:$8 sps:$4 sm:$0xff]   ;;  %v6009_v9 = vld [vmem:[%s8945_s6 + $0xe4] ss:$8 sps:$4 sm:$0xff]  }
 0x29d   :  { %v7883_v42 = vpop.f32.mrb[24].mxu0 }
 0x29e   :  { %v409_v4 = vpop.f32.mrb[25].mxu0 }
 0x29f   :  { %v7885_v0 = vpop.f32.mrb[26].mxu0  ;;  %v6020_v4 = vld [vmem:[%s8945_s6 + $0x110] ss:$8 sps:$4 sm:$0xff]  }
 0x2a0   :  { %v412_v7 = vpop.f32.mrb[27].mxu0 }
 0x2a1   :  { %v9071_v7 = vld [vmem:[#allocation22_spill] sm:$0xff] }
 0x2a2   :  { %2743 = vmatmul.mubr.bf16.gmra.mrb[64].mxu0 %v5966_v63  ;;  %2092 = vmatmul.mubr.bf16.gmra.mrb[112].mxu1 %v5965_v35  ;;  %v6012_v63 = vld [vmem:[%s8945_s6 + $0xf4] ss:$8 sps:$4 sm:$0xff]   ;;  %v6015_v35 = vld [vmem:[%s8945_s6 + $0x104] ss:$8 sps:$4 sm:$0xff]  }
 0x2a3   :  { %2750 = vmatprep.mubr.bf16.mxu0 %v5969_v61  ;;  %2099 = vmatprep.mubr.bf16.mxu1 %v5967_v19  ;;  %v6017_v61 = vld [vmem:[%s8945_s6 + $0x100] ss:$8 sps:$4 sm:$0xff]   ;;  %v6018_v19 = vld [vmem:[%s8945_s6 + $0x114] ss:$8 sps:$4 sm:$0xff]  }
 0x2a5   :  { %v7899_v29 = vpop.f32.mrb[28].mxu0 }
 0x2a6   :  { %v417_v28 = vpop.f32.mrb[29].mxu0 }
 0x2a7   :  { %v7901_v54 = vpop.f32.mrb[30].mxu0  ;;  %v9072_v28 = vld [vmem:[#allocation20_spill] sm:$0xff] }
 0x2a8   :  { %v420_v48 = vpop.f32.mrb[31].mxu0 }
 0x2aa   :  { %2751 = vmatmul.mubr.bf16.gmra.mrb[68].mxu0 %v5972_v10  ;;  %2100 = vmatmul.mubr.bf16.gmra.mrb[116].mxu1 %v5971_v34 }
 0x2ab   :  { %2758 = vmatprep.mubr.bf16.mxu0 %v5975_v2  ;;  %2107 = vmatprep.mubr.bf16.mxu1 %v5973_v17 }
 0x2ad   :  { %v7915_v32 = vpop.f32.mrb[32].mxu0 }
 0x2ae   :  { %v425_v22 = vpop.f32.mrb[33].mxu0 }
 0x2af   :  { %v7917_v36 = vpop.f32.mrb[34].mxu0 }
 0x2b0   :  { %v428_v15 = vpop.f32.mrb[35].mxu0 }
 0x2b1   :  { %v9074_v15 = vld [vmem:[#allocation23_spill] sm:$0xff] }
 0x2b2   :  { %2759 = vmatmul.mubr.bf16.gmra.mrb[72].mxu0 %v5978_v18  ;;  %2108 = vmatmul.mubr.bf16.gmra.mrb[120].mxu1 %v5977_v45 }
 0x2b3   :  { %2766 = vmatprep.mubr.bf16.mxu0 %v5981_v37  ;;  %2115 = vmatprep.mubr.bf16.mxu1 %v5979_v21  ;;  %v9073_v37 = vld [vmem:[#allocation24_spill] sm:$0xff] }
 0x2b5   :  { %v7931_v38 = vpop.f32.mrb[36].mxu0 }
 0x2b6   :  { %v433_v20 = vpop.f32.mrb[37].mxu0 }
 0x2b7   :  { %v7933_v30 = vpop.f32.mrb[38].mxu0 }
 0x2b8   :  { %v436_v51 = vpop.f32.mrb[39].mxu0 }
 0x2ba   :  { %2767 = vmatmul.mubr.bf16.gmra.mrb[76].mxu0 %v5984_v57  ;;  %2116 = vmatmul.mubr.bf16.gmra.mrb[124].mxu1 %v5983_v39 }
 0x2bb   :  { %2774 = vmatprep.mubr.bf16.mxu0 %v5987_v23  ;;  %2123 = vmatprep.mubr.bf16.mxu1 %v5985_v31 }
 0x2bd   :  { %v7947_v27 = vpop.f32.mrb[40].mxu0 }
 0x2be   :  { %v441_v6 = vpop.f32.mrb[41].mxu0 }
 0x2bf   :  { %v7949_v53 = vpop.f32.mrb[42].mxu0 }
 0x2c0   :  { %v444_v3 = vpop.f32.mrb[43].mxu0 }
 0x2c1   :  { %v9076_v3 = vld [vmem:[#allocation28_spill] sm:$0xff] }
 0x2c2   :  { %2775 = vmatmul.mubr.bf16.gmra.mrb[80].mxu0 %v5990_v60  ;;  %2124 = vmatmul.mubr.bf16.gmra.mrb[128].mxu1 %v5989_v26 }
 0x2c3   :  { %2782 = vmatprep.mubr.bf16.mxu0 %v5993_v59  ;;  %2131 = vmatprep.mubr.bf16.mxu1 %v5991_v33  ;;  %v9075_v59 = vld [vmem:[#allocation29_spill] sm:$0xff] }
 0x2c5   :  { %v7960_v50 = vpop.f32.mrb[44].mxu0 }
 0x2c6   :  { %v449_v46 = vpop.f32.mrb[45].mxu0 }
 0x2c7   :  { %v7962_v25 = vpop.f32.mrb[46].mxu0 }
 0x2c8   :  { %v452_v14 = vpop.f32.mrb[47].mxu0 }
 0x2ca   :  { %2783 = vmatmul.mubr.bf16.gmra.mrb[84].mxu0 %v5996_v44  ;;  %2132 = vmatmul.mubr.bf16.gmra.mrb[132].mxu1 %v5995_v47 }
 0x2cb   :  { %2790 = vmatprep.mubr.bf16.mxu0 %v5997_v56 }
 0x2d2   :  { %2791 = vmatmul.mubr.bf16.gmra.mrb[88].mxu0 %v5999_v52 }
 0x2d3   :  { %2798 = vmatprep.mubr.bf16.mxu0 %v6000_v11 }
 0x2da   :  { %2799 = vmatmul.mubr.bf16.gmra.mrb[92].mxu0 %v6002_v43 }
 0x2db   :  { %2806 = vmatprep.mubr.bf16.mxu0 %v6003_v5  ;;  %v9077_v5 = vld [vmem:[#allocation33_spill] sm:$0xff] }
 0x2e2   :  { %2807 = vmatmul.mubr.bf16.gmra.mrb[96].mxu0 %v6005_v62 }
 0x2e3   :  { %2814 = vmatprep.mubr.bf16.mxu0 %v6006_v24 }
 0x2ea   :  { %2815 = vmatmul.mubr.bf16.gmra.mrb[100].mxu0 %v6008_v1 }
 0x2eb   :  { %2822 = vmatprep.mubr.bf16.mxu0 %v6009_v9 }
 0x2f2   :  { %2823 = vmatmul.mubr.bf16.gmra.mrb[104].mxu0 %v6011_v16  ;;  %v9078_v16 = vld [vmem:[#allocation32_spill] sm:$0xff] }
 0x2f3   :  { %2830 = vmatprep.mubr.bf16.mxu0 %v6012_v63 }
 0x2fa   :  { %2831 = vmatmul.mubr.bf16.gmra.mrb[108].mxu0 %v6014_v12 }
 0x2fb   :  { %2838 = vmatprep.mubr.bf16.mxu0 %v6015_v35 }
 0x302   :  { %2839 = vmatmul.mubr.bf16.gmra.mrb[112].mxu0 %v6017_v61 }
 0x303   :  { %2846 = vmatprep.mubr.bf16.mxu0 %v6018_v19 }
 0x30a   :  { %2847 = vmatmul.mubr.bf16.gmra.mrb[116].mxu0 %v6020_v4 }
 0x315   :  { %v1997_v10 = vpop.f32.mrb[64].mxu1 }
 0x316   :  { %v1998_v34 = vadd.f32 %v1997_v10, %v9071_v7  ;;  %v1999_v2 = vpop.f32.mrb[65].mxu1 }
 0x317   :  { %v2000_v17 = vpop.f32.mrb[66].mxu1 }
 0x318   :  { %6109 = vtanh.f32 %v1998_v34  ;;  %v2001_v18 = vadd.f32 %v2000_v17, %v9072_v28  ;;  %v2002_v48 = vpop.f32.mrb[67].mxu1  ;;  %v9079_v17 = vld [vmem:[#allocation37_spill] sm:$0xff] }
 0x31a   :  { %6111 = vtanh.f32 %v2001_v18 }
 0x31d   :  { %v2005_v45 = vpop.f32.mrb[68].mxu1 }
 0x31e   :  { %v2006_v21 = vadd.f32 %v2005_v45, %v9073_v37  ;;  %v2007_v22 = vpop.f32.mrb[69].mxu1 }
 0x31f   :  { %v2008_v57 = vpop.f32.mrb[70].mxu1 }
 0x320   :  { %6113 = vtanh.f32 %v2006_v21  ;;  %v2009_v39 = vadd.f32 %v2008_v57, %v9074_v15  ;;  %v2010_v23 = vpop.f32.mrb[71].mxu1 }
 0x322   :  { %v6110_v31 = vpop.eup %6109  ;;  %6115 = vtanh.f32 %v2009_v39 }
 0x323   :  { %v2158_v20 = vmul.f32 1.442695, %v6110_v31 }
 0x324   :  { %v6112_v60 = vpop.eup %6111 }
 0x325   :  { %6117 = vpow2.f32 %v2158_v20  ;;  %v2160_v51 = vmul.f32 1.442695, %v6112_v60  ;;  %v2013_v26 = vpop.f32.mrb[72].mxu1  ;;  %v9081_v60 = vld [vmem:[#allocation41_spill] sm:$0xff] }
 0x326   :  { %v2014_v33 = vadd.f32 %v2013_v26, %v9075_v59  ;;  %v2015_v6 = vpop.f32.mrb[73].mxu1 }
 0x327   :  { %6119 = vpow2.f32 %v2160_v51  ;;  %v2016_v44 = vpop.f32.mrb[74].mxu1 }
 0x328   :  { %6121 = vtanh.f32 %v2014_v33  ;;  %v2017_v47 = vadd.f32 %v2016_v44, %v9076_v3  ;;  %v2018_v56 = vpop.f32.mrb[75].mxu1 }
 0x32a   :  { %v6114_v46 = vpop.eup %6113  ;;  %6123 = vtanh.f32 %v2017_v47 }
 0x32b   :  { %v2162_v52 = vmul.f32 1.442695, %v6114_v46 }
 0x32c   :  { %v6116_v14 = vpop.eup %6115 }
 0x32d   :  { %6125 = vpow2.f32 %v2162_v52  ;;  %v2164_v11 = vmul.f32 1.442695, %v6116_v14  ;;  %v2021_v43 = vpop.f32.mrb[76].mxu1 }
 0x32e   :  { %v2022_v62 = vadd.f32 %v2021_v43, %v9077_v5  ;;  %v2023_v24 = vpop.f32.mrb[77].mxu1  ;;  %v9083_v43 = vld [vmem:[#allocation45_spill] sm:$0xff] }
 0x32f   :  { %v6118_v1 = vpop.eup %6117  ;;  %6127 = vpow2.f32 %v2164_v11  ;;  %v2024_v9 = vpop.f32.mrb[78].mxu1 }
 0x330   :  { %6129 = vtanh.f32 %v2022_v62  ;;  %v2025_v63 = vadd.f32 %v2024_v9, %v9078_v16  ;;  %v2026_v12 = vpop.f32.mrb[79].mxu1  ;;  %v8018_v35 = vmul.f32 %v6118_v1, %v7835_v55  ;;  %v9080_v55 = vld [vmem:[#allocation36_spill] sm:$0xff] }
 0x331   :  { %v6120_v61 = vpop.eup %6119 }
 0x332   :  { %v6122_v19 = vpop.eup %6121  ;;  %6131 = vtanh.f32 %v2025_v63  ;;  %v8021_v4 = vmul.f32 %v6120_v61, %v7837_v40 }
 0x333   :  { %v2166_v10 = vmul.f32 1.442695, %v6122_v19 }
 0x334   :  { %v6124_v7 = vpop.eup %6123 }
 0x335   :  { %6133 = vpow2.f32 %v2166_v10  ;;  %v2168_v34 = vmul.f32 1.442695, %v6124_v7  ;;  %v2029_v2 = vpop.f32.mrb[80].mxu1 }
 0x336   :  { %v2030_v28 = vadd.f32 %v2029_v2, %v9079_v17  ;;  %v2031_v18 = vpop.f32.mrb[81].mxu1  ;;  %v9085_v2 = vld [vmem:[#allocation51_spill] sm:$0xff] }
 0x337   :  { %v6126_v48 = vpop.eup %6125  ;;  %6135 = vpow2.f32 %v2168_v34  ;;  %v2032_v45 = vpop.f32.mrb[82].mxu1 }
 0x338   :  { %6137 = vtanh.f32 %v2030_v28  ;;  %v2033_v37 = vadd.f32 %v2032_v45, %v9080_v55  ;;  %v2034_v21 = vpop.f32.mrb[83].mxu1  ;;  %v8026_v22 = vmul.f32 %v6126_v48, %v7851_v58  ;;  %v9082_v58 = vld [vmem:[#allocation40_spill] sm:$0xff] }
 0x339   :  { %v6128_v40 = vpop.eup %6127 }
 0x33a   :  { %v6130_v57 = vpop.eup %6129  ;;  %6139 = vtanh.f32 %v2033_v37  ;;  %v8029_v15 = vmul.f32 %v6128_v40, %v7853_v13 }
 0x33b   :  { %v2170_v39 = vmul.f32 1.442695, %v6130_v57 }
 0x33c   :  { %v6132_v23 = vpop.eup %6131 }
 0x33d   :  { %6141 = vpow2.f32 %v2170_v39  ;;  %v2172_v31 = vmul.f32 1.442695, %v6132_v23  ;;  %v2037_v20 = vpop.f32.mrb[84].mxu1 }
 0x33e   :  { %v2038_v51 = vadd.f32 %v2037_v20, %v9081_v60  ;;  %v2039_v26 = vpop.f32.mrb[85].mxu1  ;;  %v9087_v60 = vld [vmem:[#allocation27_spill] sm:$0xff] }
 0x33f   :  { %v6134_v59 = vpop.eup %6133  ;;  %6143 = vpow2.f32 %v2172_v31  ;;  %v2040_v33 = vpop.f32.mrb[86].mxu1 }
 0x340   :  { %6145 = vtanh.f32 %v2038_v51  ;;  %v2041_v6 = vadd.f32 %v2040_v33, %v9082_v58  ;;  %v2042_v44 = vpop.f32.mrb[87].mxu1  ;;  %v8034_v3 = vmul.f32 %v6134_v59, %v7867_v8  ;;  %v9084_v8 = vld [vmem:[#allocation44_spill] sm:$0xff]  ;;  %v9088_v59 = vld [vmem:[#allocation59_spill] sm:$0xff] }
 0x341   :  { %v6136_v13 = vpop.eup %6135 }
 0x342   :  { %v6138_v47 = vpop.eup %6137  ;;  %6147 = vtanh.f32 %v2041_v6  ;;  %v8037_v56 = vmul.f32 %v6136_v13, %v7869_v49  ;;  %v9089_v13 = vld [vmem:[#allocation26_spill] sm:$0xff] }
 0x343   :  { %v2174_v46 = vmul.f32 1.442695, %v6138_v47 }
 0x344   :  { %v6140_v52 = vpop.eup %6139 }
 0x345   :  { %6149 = vpow2.f32 %v2174_v46  ;;  %v2176_v14 = vmul.f32 1.442695, %v6140_v52  ;;  %v2045_v11 = vpop.f32.mrb[88].mxu1  ;;  %v9090_v46 = vld [vmem:[#allocation58_spill] sm:$0xff] }
 0x346   :  { %v2046_v5 = vadd.f32 %v2045_v11, %v9083_v43  ;;  %v2047_v62 = vpop.f32.mrb[89].mxu1 }
 0x347   :  { %v6142_v24 = vpop.eup %6141  ;;  %6151 = vpow2.f32 %v2176_v14  ;;  %v2048_v1 = vpop.f32.mrb[90].mxu1 }
 0x348   :  { %6153 = vtanh.f32 %v2046_v5  ;;  %v2049_v9 = vadd.f32 %v2048_v1, %v9084_v8  ;;  %v2050_v16 = vpop.f32.mrb[91].mxu1  ;;  %v8042_v63 = vmul.f32 %v6142_v24, %v7883_v42  ;;  %v9086_v42 = vld [vmem:[#allocation50_spill] sm:$0xff] }
 0x349   :  { %v6144_v49 = vpop.eup %6143 }
 0x34a   :  { %v6146_v12 = vpop.eup %6145  ;;  %6155 = vtanh.f32 %v2049_v9  ;;  %v8045_v61 = vmul.f32 %v6144_v49, %v7885_v0  ;;  %v9091_v49 = vld [vmem:[#allocation31_spill] sm:$0xff] }
 0x34b   :  { %v2178_v19 = vmul.f32 1.442695, %v6146_v12 }
 0x34c   :  { %v6148_v10 = vpop.eup %6147 }
 0x34d   :  { %6157 = vpow2.f32 %v2178_v19  ;;  %v2180_v7 = vmul.f32 1.442695, %v6148_v10  ;;  %v2053_v34 = vpop.f32.mrb[92].mxu1  ;;  %v9092_v10 = vld [vmem:[#allocation49_spill] sm:$0xff] }
 0x34e   :  { %v2054_v17 = vadd.f32 %v2053_v34, %v9085_v2  ;;  %v2055_v28 = vpop.f32.mrb[93].mxu1 }
 0x34f   :  { %v6150_v18 = vpop.eup %6149  ;;  %6159 = vpow2.f32 %v2180_v7  ;;  %v2056_v48 = vpop.f32.mrb[94].mxu1  ;;  %v9093_v28 = vld [vmem:[#allocation30_spill] sm:$0xff] }
 0x350   :  { %6161 = vtanh.f32 %v2054_v17  ;;  %v2057_v45 = vadd.f32 %v2056_v48, %v9086_v42  ;;  %v2058_v55 = vpop.f32.mrb[95].mxu1  ;;  %v8050_v37 = vmul.f32 %v6150_v18, %v7899_v29  ;;  %v9094_v42 = vld [vmem:[#allocation48_spill] sm:$0xff] }
 0x351   :  { %v6152_v0 = vpop.eup %6151 }
 0x352   :  { %v6154_v21 = vpop.eup %6153  ;;  %6163 = vtanh.f32 %v2057_v45  ;;  %v8053_v40 = vmul.f32 %v6152_v0, %v7901_v54 }
 0x353   :  { %v2182_v57 = vmul.f32 1.442695, %v6154_v21 }
 0x354   :  { %v6156_v39 = vpop.eup %6155 }
 0x355   :  { %v2712_v23 = vpop.f32.mrb[48].mxu0  ;;  %6165 = vpow2.f32 %v2182_v57  ;;  %v2184_v31 = vmul.f32 1.442695, %v6156_v39  ;;  %v2061_v20 = vpop.f32.mrb[96].mxu1 }
 0x356   :  { %v2713_v51 = vadd.f32 %v2712_v23, %v9087_v60  ;;  %v2714_v26 = vpop.f32.mrb[49].mxu0  ;;  %v2062_v33 = vadd.f32 %v2061_v20, %v9088_v59  ;;  %v2063_v58 = vpop.f32.mrb[97].mxu1 }
 0x357   :  { %v2715_v29 = vpop.f32.mrb[50].mxu0  ;;  %v6158_v6 = vpop.eup %6157  ;;  %6167 = vpow2.f32 %v2184_v31 }
 0x358   :  { %v2064_v44 = vpop.f32.mrb[98].mxu1  ;;  %v2716_v47 = vadd.f32 %v2715_v29, %v9089_v13  ;;  %v2717_v54 = vpop.f32.mrb[51].mxu0  ;;  %6169 = vtanh.f32 %v2062_v33  ;;  %v8060_v11 = vmul.f32 %v6158_v6, %v7915_v32 }
 0x359   :  { %v2065_v52 = vadd.f32 %v2064_v44, %v9090_v46  ;;  %v2066_v14 = vpop.f32.mrb[99].mxu1  ;;  %v6160_v43 = vpop.eup %6159  ;;  %6171 = vtanh.f32 %v2713_v51  ;;  %v9097_v46 = vld [vmem:[#allocation34_spill] sm:$0xff] }
 0x35a   :  { %v6162_v5 = vpop.eup %6161  ;;  %v8063_v62 = vmul.f32 %v6160_v43, %v7917_v36  ;;  %v6021_v43 = vld [vmem:[%s8946_s8] sm:$0xff]  }
 0x35b   :  { %6173 = vtanh.f32 %v2065_v52  ;;  %v2186_v24 = vmul.f32 1.442695, %v6162_v5  ;;  %5656 = vmatprep.mubr.msk.bf16.mxu0 %vm1065_vm1, %v6021_v43  ;;  %v9103_v43 = vld [vmem:[#allocation43_spill] sm:$0xff] }
 0x35c   :  { %6175 = vtanh.f32 %v2716_v47  ;;  %v6164_v1 = vpop.eup %6163 }
 0x35d   :  { %v2720_v8 = vpop.f32.mrb[52].mxu0  ;;  %6177 = vpow2.f32 %v2186_v24  ;;  %v2188_v9 = vmul.f32 1.442695, %v6164_v1  ;;  %v2069_v16 = vpop.f32.mrb[100].mxu1  ;;  %v9098_v24 = vld [vmem:[#allocation54_spill] sm:$0xff] }
 0x35e   :  { %v2721_v12 = vadd.f32 %v2720_v8, %v9091_v49  ;;  %v2722_v19 = vpop.f32.mrb[53].mxu0  ;;  %v2070_v32 = vadd.f32 %v2069_v16, %v9092_v10  ;;  %v2071_v7 = vpop.f32.mrb[101].mxu1  ;;  %v6024_v16 = vld [vmem:[%s8947_s9 + $0x4] ss:$8 sps:$4 sm:$0xff]  }
 0x35f   :  { %v2723_v34 = vpop.f32.mrb[54].mxu0  ;;  %v6166_v2 = vpop.eup %6165  ;;  %6179 = vpow2.f32 %v2188_v9  ;;  %5358 = vmatprep.mubr.msk.bf16.mxu1 %vm3110_vm2, %v6024_v16 }
 0x360   :  { %v2072_v17 = vpop.f32.mrb[102].mxu1  ;;  %v2724_v36 = vadd.f32 %v2723_v34, %v9093_v28  ;;  %v2725_v18 = vpop.f32.mrb[55].mxu0  ;;  %v8069_v48 = vadd.f32 %v8018_v35, %v2070_v32  ;;  %6181 = vtanh.f32 %v2721_v12  ;;  %v8073_v0 = vmul.f32 %v6166_v2, %v7931_v38  ;;  %v9095_v38 = vld [vmem:[#allocation35_spill] sm:$0xff] }
 0x361   :  { %v2073_v45 = vadd.f32 %v2072_v17, %v9094_v42  ;;  %v2074_v55 = vpop.f32.mrb[103].mxu1  ;;  %v6168_v21 = vpop.eup %6167  ;;  %v6025_v12 = vld [vmem:[%s8946_s8 + $0x8] sm:$0xff]  }
 0x362   :  { %6183 = vtanh.f32 %v2724_v36  ;;  %v6170_v57 = vpop.eup %6169  ;;  %v8079_v23 = vmul.f32 %v6168_v21, %v7933_v30  ;;  %v8108_v32 = vpop.permute.xlu1 %1750  ;;  %5657 = vmatmul.mubr.msk.bf16.vlgmr.msra.gmra.mrb[120].mxu0 %vm1065_vm1, %v6025_v12 }
 0x363   :  { %v8076_v39 = vadd.f32 %v8021_v4, %v2073_v45  ;;  %v6172_v31 = vpop.eup %6171  ;;  %v2190_v20 = vmul.f32 1.442695, %v6170_v57  ;;  %v9096_v4 = vld [vmem:[#allocation55_spill] sm:$0xff]  ;;  %v8111_v34 = vpop.permute.xlu0 %1745 }
 0x364   :  { %v2873_v60 = vmul.f32 1.442695, %v6172_v31  ;;  %v9101_v31 = vld [vmem:[#allocation38_spill] sm:$0xff] }
 0x365   :  { %v6174_v35 = vpop.eup %6173  ;;  %v2728_v51 = vpop.f32.mrb[56].mxu0  ;;  %6185 = vpow2.f32 %v2190_v20 }
 0x366   :  { %v6176_v26 = vpop.eup %6175  ;;  %v2192_v59 = vmul.f32 1.442695, %v6174_v35  ;;  %v2077_v33 = vpop.f32.mrb[104].mxu1  ;;  %v2729_v58 = vadd.f32 %v2728_v51, %v9095_v38  ;;  %6187 = vpow2.f32 %v2873_v60 }
 0x367   :  { %v2730_v29 = vpop.f32.mrb[57].mxu0  ;;  %v2875_v6 = vmul.f32 1.442695, %v6176_v26  ;;  %v2078_v44 = vadd.f32 %v2077_v33, %v9096_v4  ;;  %v2079_v13 = vpop.f32.mrb[105].mxu1  ;;  %v9102_v26 = vld [vmem:[#allocation62_spill] sm:$0xff] }
 0x368   :  { %v2731_v30 = vpop.f32.mrb[58].mxu0  ;;  %v6178_v47 = vpop.eup %6177  ;;  %6189 = vpow2.f32 %v2192_v59  ;;  %v6030_v29 = vld [vmem:[%s8946_s8 + $0x18] sm:$0xff]  }
 0x369   :  { %v2080_v54 = vpop.f32.mrb[106].mxu1  ;;  %v2732_v52 = vadd.f32 %v2731_v30, %v9097_v46  ;;  %v2733_v14 = vpop.f32.mrb[59].mxu0  ;;  %6191 = vpow2.f32 %v2875_v6  ;;  %v8088_v5 = vadd.f32 %v8026_v22, %v2078_v44  ;;  %v8092_v9 = vmul.f32 %v6178_v47, %v7947_v27 }
 0x36a   :  { %v2081_v1 = vadd.f32 %v2080_v54, %v9098_v24  ;;  %v2082_v8 = vpop.f32.mrb[107].mxu1  ;;  %v6180_v49 = vpop.eup %6179  ;;  %6193 = vtanh.f32 %v2729_v58  ;;  %v6029_v58 = vld [vmem:[%s8946_s8 + $0x10] sm:$0xff]  }
 0x36b   :  { %v6182_v22 = vpop.eup %6181  ;;  %6195 = vtanh.f32 %v2732_v52  ;;  %v8105_v27 = vmul.f32 %v6180_v49, %v7949_v53  ;;  %v9100_v53 = vld [vmem:[#allocation63_spill] sm:$0xff]  ;;  %5660 = vmatprep.mubr.msk.bf16.mxu0 %vm1065_vm1, %v6029_v58  ;;  %v8137_v30 = vpop.permute.xlu1 %2455 }
 0x36c   :  { %v8102_v19 = vadd.f32 %v8029_v15, %v2081_v1  ;;  %v6184_v10 = vpop.eup %6183  ;;  %v2877_v7 = vmul.f32 1.442695, %v6182_v22  ;;  %v9099_v15 = vld [vmem:[#allocation39_spill] sm:$0xff]  ;;  %5661 = vmatmul.mubr.msk.bf16.gmra.mrb[124].mxu0 %vm1065_vm1, %v6030_v29  ;;  %v8143_v46 = vpop.permute.xlu0 %2450  ;;  %v9104_v1 = vld [vmem:[#allocation69_spill] sm:$0xff]  ;;  %v9105_v22 = vld [vmem:[#allocation42_spill] sm:$0xff] }
 0x36d   :  { %v2879_v2 = vmul.f32 1.442695, %v6184_v10  ;;  %v2736_v17 = vpop.f32.mrb[60].mxu0  ;;  %v2085_v28 = vpop.f32.mrb[108].mxu1 }
 0x36e   :  { %6197 = vpow2.f32 %v2877_v7  ;;  %v2737_v36 = vadd.f32 %v2736_v17, %v9099_v15  ;;  %v2738_v18 = vpop.f32.mrb[61].mxu0  ;;  %v2086_v42 = vadd.f32 %v2085_v28, %v9100_v53  ;;  %v2087_v45 = vpop.f32.mrb[109].mxu1  ;;  %v9106_v28 = vld [vmem:[#allocation68_spill] sm:$0xff] }
 0x36f   :  { %6199 = vpow2.f32 %v2879_v2  ;;  %v2739_v55 = vpop.f32.mrb[62].mxu0  ;;  %v6186_v21 = vpop.eup %6185 }
 0x370   :  { %6201 = vtanh.f32 %v2737_v36  ;;  %v2088_v57 = vpop.f32.mrb[110].mxu1  ;;  %v2740_v20 = vadd.f32 %v2739_v55, %v9101_v31  ;;  %v2741_v35 = vpop.f32.mrb[63].mxu0  ;;  %v8117_v51 = vadd.f32 %v8034_v3, %v2086_v42  ;;  %v8121_v38 = vmul.f32 %v6186_v21, %v7960_v50 }
 0x371   :  { %v6188_v60 = vpop.eup %6187  ;;  %v2089_v59 = vadd.f32 %v2088_v57, %v9102_v26  ;;  %v2090_v33 = vpop.f32.mrb[111].mxu1 }
 0x372   :  { %v6190_v6 = vpop.eup %6189  ;;  %6203 = vtanh.f32 %v2740_v20  ;;  %v8130_v4 = vmul.f32 %v6188_v60, %v8069_v48  ;;  %v8157_v57 = vpop.permute.xlu1 %1760  ;;  %v9107_v60 = vld [vmem:[#allocation47_spill] sm:$0xff] }
 0x373   :  { %v6192_v3 = vpop.eup %6191  ;;  %v2217_v44 = vadd.f32 %v8037_v56, %v2089_v59  ;;  %v8134_v13 = vmul.f32 %v6190_v6, %v7962_v25  ;;  %v8159_v31 = vpop.permute.xlu0 %1755  ;;  %v9108_v59 = vld [vmem:[#allocation73_spill] sm:$0xff] }
 0x374   :  { %v6194_v50 = vpop.eup %6193  ;;  %v8140_v47 = vmul.f32 %v6192_v3, %v8076_v39 }
 0x375   :  { %v6196_v54 = vpop.eup %6195  ;;  %v2881_v48 = vmul.f32 1.442695, %v6194_v50  ;;  %v2744_v52 = vpop.f32.mrb[64].mxu0 }
 0x376   :  { %v2883_v14 = vmul.f32 1.442695, %v6196_v54  ;;  %v2093_v56 = vpop.f32.mrb[112].mxu1  ;;  %v2745_v25 = vadd.f32 %v2744_v52, %v9103_v43  ;;  %v2746_v24 = vpop.f32.mrb[65].mxu0 }
 0x377   :  { %6205 = vpow2.f32 %v2881_v48  ;;  %v2094_v8 = vadd.f32 %v2093_v56, %v9104_v1  ;;  %v2095_v16 = vpop.f32.mrb[113].mxu1  ;;  %v2747_v49 = vpop.f32.mrb[66].mxu0  ;;  %v9110_v48 = vld [vmem:[#allocation72_spill] sm:$0xff] }
 0x378   :  { %v6198_v12 = vpop.eup %6197  ;;  %6207 = vpow2.f32 %v2883_v14  ;;  %v2096_v39 = vpop.f32.mrb[114].mxu1  ;;  %v2748_v10 = vadd.f32 %v2747_v49, %v9105_v22 }
 0x379   :  { %v2749_v7 = vpop.f32.mrb[67].mxu0  ;;  %v6200_v2 = vpop.eup %6199  ;;  %v2218_v17 = vadd.f32 %v8042_v63, %v2094_v8  ;;  %6209 = vtanh.f32 %v2745_v25  ;;  %v2097_v15 = vadd.f32 %v2096_v39, %v9106_v28  ;;  %v8151_v18 = vmul.f32 %v6198_v12, %v8088_v5 }
 0x37a   :  { %v2098_v36 = vpop.f32.mrb[115].mxu1  ;;  %v6202_v53 = vpop.eup %6201  ;;  %6211 = vtanh.f32 %v2748_v10  ;;  %v8154_v42 = vmul.f32 %v6200_v2, %v8102_v19  ;;  %v9111_v10 = vld [vmem:[#allocation53_spill] sm:$0xff] }
 0x37b   :  { %v2885_v45 = vmul.f32 1.442695, %v6202_v53  ;;  %v2219_v55 = vadd.f32 %v8045_v61, %v2097_v15  ;;  %v9109_v61 = vld [vmem:[#allocation46_spill] sm:$0xff]  ;;  %v8172_v16 = vpop.permute.xlu1 %2465  ;;  %v8174_v12 = vpop.permute.xlu0 %2460  ;;  %v9112_v36 = vld [vmem:[#allocation52_spill] sm:$0xff] }
 0x37c   :  { %v6204_v21 = vpop.eup %6203 }
 0x37d   :  { %6213 = vpow2.f32 %v2885_v45  ;;  %v2887_v63 = vmul.f32 1.442695, %v6204_v21  ;;  %v2752_v20 = vpop.f32.mrb[68].mxu0  ;;  %v2101_v35 = vpop.f32.mrb[116].mxu1 }
 0x37e   :  { %v2753_v5 = vadd.f32 %v2752_v20, %v9107_v60  ;;  %v2754_v26 = vpop.f32.mrb[69].mxu0  ;;  %v2102_v33 = vadd.f32 %v2101_v35, %v9108_v59  ;;  %v2103_v19 = vpop.f32.mrb[117].mxu1 }
 0x37f   :  { %6215 = vpow2.f32 %v2887_v63  ;;  %v2755_v58 = vpop.f32.mrb[70].mxu0  ;;  %v2104_v29 = vpop.f32.mrb[118].mxu1 }
 0x380   :  { %6217 = vtanh.f32 %v2753_v5  ;;  %v2756_v6 = vadd.f32 %v2755_v58, %v9109_v61  ;;  %v2757_v3 = vpop.f32.mrb[71].mxu0  ;;  %v2220_v54 = vadd.f32 %v8050_v37, %v2102_v33  ;;  %v2105_v52 = vadd.f32 %v2104_v29, %v9110_v48  ;;  %v2106_v14 = vpop.f32.mrb[119].mxu1 }
 0x381   :  { %v6206_v50 = vpop.eup %6205  ;;  %v1771_v19 = vpop.permute.xlu1 %1770  ;;  %v9114_v14 = vld [vmem:[#allocation60_spill] sm:$0xff] }
 0x382   :  { %v6208_v56 = vpop.eup %6207  ;;  %6219 = vtanh.f32 %v2756_v6  ;;  %v8167_v43 = vmul.f32 %v6206_v50, %v8117_v51  ;;  %v2221_v24 = vadd.f32 %v8053_v40, %v2105_v52  ;;  %v1766_v58 = vpop.permute.xlu0 %1765  ;;  %v9113_v6 = vld [vmem:[#allocation61_spill] sm:$0xff] }
 0x383   :  { %v6210_v25 = vpop.eup %6209  ;;  %v8170_v1 = vmul.f32 %v6208_v56, %v2217_v44 }
 0x384   :  { %v6212_v8 = vpop.eup %6211  ;;  %v2889_v49 = vmul.f32 1.442695, %v6210_v25 }
 0x385   :  { %v2891_v37 = vmul.f32 1.442695, %v6212_v8  ;;  %v2760_v39 = vpop.f32.mrb[72].mxu0  ;;  %v2109_v22 = vpop.f32.mrb[120].mxu1 }
 0x386   :  { %6221 = vpow2.f32 %v2889_v49  ;;  %v2761_v7 = vadd.f32 %v2760_v39, %v9111_v10  ;;  %v2762_v2 = vpop.f32.mrb[73].mxu0  ;;  %v2110_v28 = vadd.f32 %v2109_v22, %v8111_v34  ;;  %v2111_v40 = vpop.f32.mrb[121].mxu1 }
 0x387   :  { %v6214_v51 = vpop.eup %6213  ;;  %6223 = vpow2.f32 %v2891_v37  ;;  %v2763_v44 = vpop.f32.mrb[74].mxu0 }
 0x388   :  { %6225 = vtanh.f32 %v2761_v7  ;;  %v2112_v15 = vpop.f32.mrb[122].mxu1  ;;  %v2764_v53 = vadd.f32 %v2763_v44, %v9112_v36  ;;  %v2765_v45 = vpop.f32.mrb[75].mxu0  ;;  %v8179_v21 = vmul.f32 %v6214_v51, %v2218_v17  ;;  %v2222_v20 = vadd.f32 %v8060_v11, %v2110_v28 }
 0x389   :  { %v6216_v63 = vpop.eup %6215  ;;  %v2113_v35 = vadd.f32 %v2112_v15, %v8108_v32  ;;  %v2114_v60 = vpop.f32.mrb[123].mxu1 }
 0x38a   :  { %v6218_v5 = vpop.eup %6217  ;;  %6227 = vtanh.f32 %v2764_v53  ;;  %v8183_v26 = vmul.f32 %v6216_v63, %v2219_v55  ;;  %v8196_v51 = vpop.permute.xlu1 %2475 }
 0x38b   :  { %v2893_v34 = vmul.f32 1.442695, %v6218_v5  ;;  %v2223_v59 = vadd.f32 %v8063_v62, %v2113_v35  ;;  %v8198_v28 = vpop.permute.xlu0 %2470 }
 0x38c   :  { %v6220_v33 = vpop.eup %6219 }
 0x38d   :  { %6229 = vpow2.f32 %v2893_v34  ;;  %v2895_v29 = vmul.f32 1.442695, %v6220_v33  ;;  %v2768_v17 = vpop.f32.mrb[76].mxu0  ;;  %v2117_v61 = vpop.f32.mrb[124].mxu1 }
 0x38e   :  { %v2769_v3 = vadd.f32 %v2768_v17, %v9113_v6  ;;  %v2770_v11 = vpop.f32.mrb[77].mxu0  ;;  %v2118_v32 = vadd.f32 %v2117_v61, %v8159_v31  ;;  %v2119_v50 = vpop.f32.mrb[125].mxu1 }
 0x38f   :  { %6231 = vpow2.f32 %v2895_v29  ;;  %v2771_v48 = vpop.f32.mrb[78].mxu0  ;;  %v2120_v52 = vpop.f32.mrb[126].mxu1 }
 0x390   :  { %v6222_v55 = vpop.eup %6221  ;;  %6233 = vtanh.f32 %v2769_v3  ;;  %v2772_v62 = vadd.f32 %v2771_v48, %v9114_v14  ;;  %v2773_v56 = vpop.f32.mrb[79].mxu0  ;;  %v2224_v8 = vadd.f32 %v8073_v0, %v2118_v32  ;;  %v2121_v49 = vadd.f32 %v2120_v52, %v8157_v57  ;;  %v9115_v57 = vld [vmem:[#allocation67_spill] sm:$0xff]  ;;  %v9117_v52 = vld [vmem:[#allocation57_spill] sm:$0xff] }
 0x391   :  { %v6224_v25 = vpop.eup %6223  ;;  %v2122_v37 = vpop.f32.mrb[127].mxu1  ;;  %v8191_v39 = vmul.f32 %v6222_v55, %v2220_v54 }
 0x392   :  { %v6226_v22 = vpop.eup %6225  ;;  %6235 = vtanh.f32 %v2772_v62  ;;  %v8193_v10 = vmul.f32 %v6224_v25, %v2221_v24  ;;  %v2225_v7 = vadd.f32 %v8079_v23, %v2121_v49  ;;  %v9116_v23 = vld [vmem:[#allocation66_spill] sm:$0xff]  ;;  %v1781_v32 = vpop.permute.xlu1 %1780  ;;  %v9118_v37 = vld [vmem:[#allocation56_spill] sm:$0xff] }
 0x393   :  { %v2897_v31 = vmul.f32 1.442695, %v6226_v22  ;;  %v1776_v50 = vpop.permute.xlu0 %1775 }
 0x394   :  { %v6228_v2 = vpop.eup %6227 }
 0x395   :  { %6237 = vpow2.f32 %v2897_v31  ;;  %v2899_v40 = vmul.f32 1.442695, %v6228_v2  ;;  %v2776_v0 = vpop.f32.mrb[80].mxu0  ;;  %v2125_v44 = vpop.f32.mrb[128].mxu1 }
 0x396   :  { %v2777_v15 = vadd.f32 %v2776_v0, %v9115_v57  ;;  %v2778_v54 = vpop.f32.mrb[81].mxu0  ;;  %v2126_v53 = vadd.f32 %v2125_v44, %v1766_v58  ;;  %v2127_v24 = vpop.f32.mrb[129].mxu1  ;;  %v6049_v57 = vld [vmem:[%s8946_s8 + $0x20] sm:$0xff]  }
 0x397   :  { %v6230_v36 = vpop.eup %6229  ;;  %6239 = vpow2.f32 %v2899_v40  ;;  %v2779_v45 = vpop.f32.mrb[82].mxu0  ;;  %5664 = vmatprep.mubr.msk.bf16.mxu0 %vm1065_vm1, %v6049_v57 }
 0x398   :  { %6241 = vtanh.f32 %v2777_v15  ;;  %v2128_v63 = vpop.f32.mrb[130].mxu1  ;;  %v2780_v35 = vadd.f32 %v2779_v45, %v9116_v23  ;;  %v2781_v60 = vpop.f32.mrb[83].mxu0  ;;  %v8202_v5 = vmul.f32 %v6230_v36, %v2222_v20  ;;  %v2226_v33 = vadd.f32 %v8092_v9, %v2126_v53  ;;  %v9119_v23 = vld [vmem:[#allocation65_spill] sm:$0xff] }
 0x399   :  { %v6232_v34 = vpop.eup %6231  ;;  %v2129_v29 = vadd.f32 %v2128_v63, %v1771_v19  ;;  %v2130_v17 = vpop.f32.mrb[131].mxu1 }
 0x39a   :  { %v6234_v61 = vpop.eup %6233  ;;  %6243 = vtanh.f32 %v2780_v35  ;;  %v8205_v6 = vmul.f32 %v6232_v34, %v2223_v59  ;;  %v9120_v34 = vld [vmem:[#allocation64_spill] sm:$0xff] }
 0x39b   :  { %v2901_v3 = vmul.f32 1.442695, %v6234_v61  ;;  %v2227_v58 = vadd.f32 %v8105_v27, %v2129_v29 }
 0x39c   :  { %v6236_v11 = vpop.eup %6235 }
 0x39d   :  { %6245 = vpow2.f32 %v2901_v3  ;;  %v2903_v48 = vmul.f32 1.442695, %v6236_v11  ;;  %v2784_v55 = vpop.f32.mrb[84].mxu0  ;;  %v2133_v20 = vpop.f32.mrb[132].mxu1 }
 0x39e   :  { %v2785_v14 = vadd.f32 %v2784_v55, %v9117_v52  ;;  %v2786_v62 = vpop.f32.mrb[85].mxu0  ;;  %v2134_v19 = vadd.f32 %v2133_v20, %v1776_v50  ;;  %v2135_v56 = vpop.f32.mrb[133].mxu1  ;;  %v9121_v55 = vld [vmem:[#allocation71_spill] sm:$0xff] }
 0x39f   :  { %v6238_v9 = vpop.eup %6237  ;;  %6247 = vpow2.f32 %v2903_v48  ;;  %v2787_v25 = vpop.f32.mrb[86].mxu0 }
 0x3a0   :  { %v2927_v59 = vadd.f32 %v8130_v4, %v2785_v14  ;;  %v2136_v49 = vpop.f32.mrb[134].mxu1  ;;  %v2788_v27 = vadd.f32 %v2787_v25, %v9118_v37  ;;  %v2789_v22 = vpop.f32.mrb[87].mxu0  ;;  %v8211_v31 = vmul.f32 %v6238_v9, %v2224_v8  ;;  %v2228_v40 = vadd.f32 %v8121_v38, %v2134_v19  ;;  %v6052_v4 = vld [vmem:[%s8946_s8 + $0x28] sm:$0xff]   ;;  %v9122_v9 = vld [vmem:[#allocation70_spill] sm:$0xff] }
 0x3a1   :  { %v6240_v2 = vpop.eup %6239  ;;  %v2137_v0 = vadd.f32 %v2136_v49, %v1781_v32  ;;  %v2138_v44 = vpop.f32.mrb[135].mxu1  ;;  %5665 = vmatmul.mubr.msk.bf16.gmra.mrb[128].mxu0 %vm1065_vm1, %v6052_v4  ;;  %v9123_v37 = vld [vmem:[#allocation75_spill] sm:$0xff] }
 0x3a2   :  { %v6242_v15 = vpop.eup %6241  ;;  %v2928_v54 = vadd.f32 %v8140_v47, %v2788_v27  ;;  %v8218_v36 = vmul.f32 %v6240_v2, %v2225_v7 }
 0x3a3   :  { %v2905_v8 = vmul.f32 1.442695, %v6242_v15  ;;  %v2229_v53 = vadd.f32 %v8134_v13, %v2137_v0  ;;  %v9124_v0 = vld [vmem:[#allocation74_spill] sm:$0xff] }
 0x3a4   :  { %v6244_v38 = vpop.eup %6243  ;;  %v2993_v24 = vpack.c.bf16 %v2928_v54, %v2927_v59 }
 0x3a5   :  { %6249 = vpow2.f32 %v2905_v8  ;;  %v2907_v45 = vmul.f32 1.442695, %v6244_v38  ;;  %v2792_v63 = vpop.f32.mrb[88].mxu0 }
 0x3a6   :  { %v2793_v47 = vadd.f32 %v2792_v63, %v9119_v23  ;;  %v2794_v7 = vpop.f32.mrb[89].mxu0  ;;  %3148 = vmatpush1.bf16.msra.mxu1 %v2993_v24 }
 0x3a7   :  { %v6246_v35 = vpop.eup %6245  ;;  %6251 = vpow2.f32 %v2907_v45  ;;  %v2795_v60 = vpop.f32.mrb[90].mxu0  ;;  %3149 = vmatprep.subr.bf16.mxu1 %v9000_v41 }
 0x3a8   :  { %v2929_v13 = vadd.f32 %v8151_v18, %v2793_v47  ;;  %v2796_v29 = vadd.f32 %v2795_v60, %v9120_v34  ;;  %v2797_v17 = vpop.f32.mrb[91].mxu0  ;;  %v8230_v61 = vmul.f32 %v6246_v35, %v2226_v33 }
 0x3a9   :  { %v6248_v3 = vpop.eup %6247 }
 0x3aa   :  { %v2930_v11 = vadd.f32 %v8154_v42, %v2796_v29  ;;  %v8233_v32 = vmul.f32 %v6248_v3, %v2227_v58 }
 0x3ac   :  { %v2994_v50 = vpack.c.bf16 %v2930_v11, %v2929_v13  ;;  %v2481_v11 = vpop.permute.xlu0 %2480 }
 0x3ad   :  { %v2800_v48 = vpop.f32.mrb[92].mxu0 }
 0x3ae   :  { %v2801_v20 = vadd.f32 %v2800_v48, %v9121_v55  ;;  %v2802_v52 = vpop.f32.mrb[93].mxu0  ;;  %3150 = vmatpush1.bf16.msra.mxu1 %v2994_v50  ;;  %v2486_v55 = vpop.permute.xlu1 %2485 }
 0x3af   :  { %v6250_v14 = vpop.eup %6249  ;;  %v2803_v62 = vpop.f32.mrb[94].mxu0  ;;  %3151 = vmatprep.subr.bf16.mxu1 %v9000_v41 }
 0x3b0   :  { %v2931_v18 = vadd.f32 %v8167_v43, %v2801_v20  ;;  %v2804_v33 = vadd.f32 %v2803_v62, %v9122_v9  ;;  %v2805_v19 = vpop.f32.mrb[95].mxu0  ;;  %v8239_v56 = vmul.f32 %v6250_v14, %v2228_v40  ;;  %v2491_v62 = vpop.permute.xlu0 %2490 }
 0x3b1   :  { %v6252_v42 = vpop.eup %6251 }
 0x3b2   :  { %v2932_v58 = vadd.f32 %v8170_v1, %v2804_v33  ;;  %v8242_v25 = vmul.f32 %v6252_v42, %v2229_v53  ;;  %v6054_v53 = vld [vmem:[%s8946_s8 + $0x30] sm:$0xff]   ;;  %v2496_v33 = vpop.permute.xlu1 %2495 }
 0x3b3   :  { %5668 = vmatprep.mubr.msk.bf16.mxu0 %vm1065_vm1, %v6054_v53  ;;  %v6057_v53 = vld [vmem:[%s8946_s8 + $0x38] sm:$0xff]  }
 0x3b4   :  { %v2995_v59 = vpack.c.bf16 %v2932_v58, %v2931_v18  ;;  %5669 = vmatmul.mubr.msk.bf16.gmra.mrb[132].mxu0 %vm1065_vm1, %v6057_v53 }
 0x3b5   :  { %v2808_v49 = vpop.f32.mrb[96].mxu0 }
 0x3b6   :  { %v2809_v27 = vadd.f32 %v2808_v49, %v9123_v37  ;;  %v2810_v22 = vpop.f32.mrb[97].mxu0  ;;  %3152 = vmatpush1.bf16.msra.mxu1 %v2995_v59  ;;  %v6026_v37 = vld [vmem:[%s8947_s9 + $0x14] ss:$8 sps:$4 sm:$0xff]  }
 0x3b7   :  { %v2811_v2 = vpop.f32.mrb[98].mxu0  ;;  %3153 = vmatprep.subr.bf16.mxu1 %v9000_v41  ;;  %v6036_v22 = vld [vmem:[%s8947_s9 + $0x30] ss:$8 sps:$4 sm:$0xff]  }
 0x3b8   :  { %v2933_v43 = vadd.f32 %v8179_v21, %v2809_v27  ;;  %v2812_v44 = vadd.f32 %v2811_v2, %v9124_v0  ;;  %v2813_v40 = vpop.f32.mrb[99].mxu0  ;;  %v6034_v27 = vld [vmem:[%s8947_s9 + $0x34] ss:$8 sps:$4 sm:$0xff]   ;;  %v6037_v2 = vld [vmem:[%s8947_s9 + $0x44] ss:$8 sps:$4 sm:$0xff]  }
 0x3b9   :  { %v6040_v0 = vld [vmem:[%s8947_s9 + $0x54] ss:$8 sps:$4 sm:$0xff]   ;;  %v6043_v40 = vld [vmem:[%s8947_s9 + $0x64] ss:$8 sps:$4 sm:$0xff]  }
 0x3ba   :  { %v2934_v57 = vadd.f32 %v8183_v26, %v2812_v44  ;;  %v6042_v44 = vld [vmem:[%s8947_s9 + $0x50] ss:$8 sps:$4 sm:$0xff]  }
 0x3bc   :  { %v2996_v15 = vpack.c.bf16 %v2934_v57, %v2933_v43  ;;  %v6039_v43 = vld [vmem:[%s8947_s9 + $0x40] ss:$8 sps:$4 sm:$0xff]  }
 0x3bd   :  { %v2816_v1 = vpop.f32.mrb[100].mxu0  ;;  %v6045_v57 = vld [vmem:[%s8947_s9 + $0x60] ss:$8 sps:$4 sm:$0xff]  }
 0x3be   :  { %v2817_v54 = vadd.f32 %v2816_v1, %v8143_v46  ;;  %v2818_v4 = vpop.f32.mrb[101].mxu0  ;;  %3154 = vmatpush1.bf16.msra.mxu1 %v2996_v15  ;;  %v6046_v15 = vld [vmem:[%s8947_s9 + $0x74] ss:$8 sps:$4 sm:$0xff]   ;;  %v6048_v1 = vld [vmem:[%s8947_s9 + $0x70] ss:$8 sps:$4 sm:$0xff]  }
 0x3bf   :  { %v2819_v8 = vpop.f32.mrb[102].mxu0  ;;  %3155 = vmatprep.subr.bf16.mxu1 %v9000_v41  ;;  %v6053_v4 = vld [vmem:[%s8947_s9 + $0x80] ss:$8 sps:$4 sm:$0xff]  }
 0x3c0   :  { %v2935_v21 = vadd.f32 %v8191_v39, %v2817_v54  ;;  %v2820_v38 = vadd.f32 %v2819_v8, %v8137_v30  ;;  %v2821_v24 = vpop.f32.mrb[103].mxu0  ;;  %v6050_v54 = vld [vmem:[%s8947_s9 + $0x84] ss:$8 sps:$4 sm:$0xff]   ;;  %v6055_v8 = vld [vmem:[%s8947_s9 + $0x94] ss:$8 sps:$4 sm:$0xff]  }
 0x3c2   :  { %v2936_v26 = vadd.f32 %v8193_v10, %v2820_v38 }
 0x3c4   :  { %v2997_v45 = vpack.c.bf16 %v2936_v26, %v2935_v21  ;;  %v6058_v21 = vld [vmem:[%s8947_s9 + $0x90] ss:$8 sps:$4 sm:$0xff]  }
 0x3c5   :  { %v2824_v46 = vpop.f32.mrb[104].mxu0 }
 0x3c6   :  { %v2825_v63 = vadd.f32 %v2824_v46, %v8174_v12  ;;  %v2826_v23 = vpop.f32.mrb[105].mxu0  ;;  %3156 = vmatpush1.bf16.msra.mxu1 %v2997_v45  ;;  %v6059_v45 = vld [vmem:[%s8946_s8 + $0x40] sm:$0xff]  }
 0x3c7   :  { %v2827_v47 = vpop.f32.mrb[106].mxu0  ;;  %3157 = vmatprep.subr.bf16.mxu1 %v9000_v41  ;;  %5672 = vmatprep.mubr.msk.bf16.mxu0 %vm1065_vm1, %v6059_v45  ;;  %v6062_v23 = vld [vmem:[%s8946_s8 + $0x48] sm:$0xff]  }
 0x3c8   :  { %v2937_v7 = vadd.f32 %v8202_v5, %v2825_v63  ;;  %v2828_v39 = vadd.f32 %v2827_v47, %v8172_v16  ;;  %v2829_v35 = vpop.f32.mrb[107].mxu0  ;;  %v6060_v63 = vld [vmem:[%s8947_s9 + $0xa4] ss:$8 sps:$4 sm:$0xff]   ;;  %v6063_v47 = vld [vmem:[%s8947_s9 + $0xa0] ss:$8 sps:$4 sm:$0xff]   ;;  %5673 = vmatmul.mubr.msk.bf16.gmra.mrb[136].mxu0 %vm1065_vm1, %v6062_v23 }
 0x3ca   :  { %v2938_v30 = vadd.f32 %v8205_v6, %v2828_v39  ;;  %v6064_v39 = vld [vmem:[%s8946_s8 + $0x50] sm:$0xff]  }
 0x3cb   :  { %5676 = vmatprep.mubr.msk.bf16.mxu0 %vm1065_vm1, %v6064_v39 }
 0x3cc   :  { %v2998_v60 = vpack.c.bf16 %v2938_v30, %v2937_v7 }
 0x3cd   :  { %v2832_v13 = vpop.f32.mrb[108].mxu0 }
 0x3ce   :  { %v2833_v10 = vadd.f32 %v2832_v13, %v8198_v28  ;;  %v2834_v34 = vpop.f32.mrb[109].mxu0  ;;  %3158 = vmatpush1.bf16.msra.mxu1 %v2998_v60  ;;  %v6065_v13 = vld [vmem:[%s8947_s9 + $0xb4] ss:$8 sps:$4 sm:$0xff]  }
 0x3cf   :  { %v2835_v29 = vpop.f32.mrb[110].mxu0  ;;  %3159 = vmatprep.subr.bf16.mxu1 %v9000_v41  ;;  %v6068_v34 = vld [vmem:[%s8947_s9 + $0xb0] ss:$8 sps:$4 sm:$0xff]  }
 0x3d0   :  { %v2939_v12 = vadd.f32 %v8211_v31, %v2833_v10  ;;  %v2836_v17 = vadd.f32 %v2835_v29, %v8196_v51  ;;  %v2837_v3 = vpop.f32.mrb[111].mxu0  ;;  %v6067_v10 = vld [vmem:[%s8946_s8 + $0x58] sm:$0xff]   ;;  %v6069_v29 = vld [vmem:[%s8948_s10] sm:$0xff]  }
 0x3d1   :  { %5677 = vmatmul.mubr.msk.bf16.gmra.mrb[140].mxu0 %vm1065_vm1, %v6067_v10 }
 0x3d2   :  { %v2940_v5 = vadd.f32 %v8218_v36, %v2836_v17  ;;  %5686 = vmatprep.mubr.msk.bf16.mxu0 %vm1065_vm1, %v6069_v29 }
 0x3d4   :  { %v2999_v16 = vpack.c.bf16 %v2940_v5, %v2939_v12 }
 0x3d5   :  { %v2840_v50 = vpop.f32.mrb[112].mxu0 }
 0x3d6   :  { %v2841_v6 = vadd.f32 %v2840_v50, %v2481_v11  ;;  %v2842_v48 = vpop.f32.mrb[113].mxu0  ;;  %3160 = vmatpush1.bf16.msra.mxu1 %v2999_v16 }
 0x3d7   :  { %v2843_v28 = vpop.f32.mrb[114].mxu0  ;;  %3161 = vmatprep.subr.bf16.mxu1 %v9000_v41 }
 0x3d8   :  { %v2941_v20 = vadd.f32 %v8230_v61, %v2841_v6  ;;  %v2844_v52 = vadd.f32 %v2843_v28, %v2486_v55  ;;  %v2845_v14 = vpop.f32.mrb[115].mxu0 }
 0x3da   :  { %v2942_v31 = vadd.f32 %v8233_v32, %v2844_v52  ;;  %v6022_v32 = vld [vmem:[%s8947_s9] ss:$8 sps:$4 sm:$0xff]  }
 0x3dc   :  { %v3000_v51 = vpack.c.bf16 %v2942_v31, %v2941_v20 }
 0x3dd   :  { %v2848_v18 = vpop.f32.mrb[116].mxu0 }
 0x3de   :  { %v2849_v36 = vadd.f32 %v2848_v18, %v2491_v62  ;;  %v2850_v9 = vpop.f32.mrb[117].mxu0  ;;  %3162 = vmatpush1.bf16.msra.mxu1 %v3000_v51 }
 0x3df   :  { %v2851_v19 = vpop.f32.mrb[118].mxu0  ;;  %3163 = vmatprep.subr.bf16.mxu1 %v9000_v41  ;;  %v6028_v41 = vld [vmem:[%s8947_s9 + $0x10] ss:$8 sps:$4 sm:$0xff]  }
 0x3e0   :  { %v2943_v42 = vadd.f32 %v8239_v56, %v2849_v36  ;;  %v2852_v58 = vadd.f32 %v2851_v19, %v2496_v33  ;;  %v2853_v59 = vpop.f32.mrb[119].mxu0  ;;  %v6031_v56 = vld [vmem:[%s8947_s9 + $0x24] ss:$8 sps:$4 sm:$0xff]  }
 0x3e2   :  { %v2944_v61 = vadd.f32 %v8242_v25, %v2852_v58  ;;  %v6033_v25 = vld [vmem:[%s8947_s9 + $0x20] ss:$8 sps:$4 sm:$0xff]  }
 0x3e4   :  { %v3001_v49 = vpack.c.bf16 %v2944_v61, %v2943_v42  ;;  %v6070_v61 = vld [vmem:[%s8948_s10 + $0x8] sm:$0xff]  }
 0x3e6   :  { %3164 = vmatpush1.bf16.msra.mxu1 %v3001_v49 }
 0x3e9   :  { %3180 = vmatmul.mubr.bf16.vlgmr.msra.gmra.mrb[136].mxu1 %v6022_v32  ;;  %v6071_v32 = vld [vmem:[%s8948_s10 + $0x10] sm:$0xff]  }
 0x3ea   :  { %5359 = vmatprep.mubr.msk.bf16.mxu1 %vm3110_vm2, %v6026_v37 }
 0x3f1   :  { %3188 = vmatmul.mubr.bf16.gmra.mrb[140].mxu1 %v6028_v41 }
 0x3f2   :  { %5360 = vmatprep.mubr.msk.bf16.mxu1 %vm3110_vm2, %v6031_v56 }
 0x3f9   :  { %3196 = vmatmul.mubr.bf16.gmra.mrb[144].mxu1 %v6033_v25 }
 0x3fa   :  { %5361 = vmatprep.mubr.msk.bf16.mxu1 %vm3110_vm2, %v6034_v27 }
 0x401   :  { %3204 = vmatmul.mubr.bf16.gmra.mrb[148].mxu1 %v6036_v22  ;;  %v6072_v22 = vld [vmem:[%s8948_s10 + $0x18] sm:$0xff]  }
 0x402   :  { %5362 = vmatprep.mubr.msk.bf16.mxu1 %vm3110_vm2, %v6037_v2 }
 0x409   :  { %3212 = vmatmul.mubr.bf16.gmra.mrb[152].mxu1 %v6039_v43 }
 0x40a   :  { %5363 = vmatprep.mubr.msk.bf16.mxu1 %vm3110_vm2, %v6040_v0 }
 0x411   :  { %3220 = vmatmul.mubr.bf16.gmra.mrb[156].mxu1 %v6042_v44 }
 0x412   :  { %5364 = vmatprep.mubr.msk.bf16.mxu1 %vm3110_vm2, %v6043_v40 }
 0x419   :  { %3228 = vmatmul.mubr.bf16.gmra.mrb[160].mxu1 %v6045_v57 }
 0x41a   :  { %5365 = vmatprep.mubr.msk.bf16.mxu1 %vm3110_vm2, %v6046_v15 }
 0x421   :  { %3236 = vmatmul.mubr.bf16.gmra.mrb[164].mxu1 %v6048_v1 }
 0x422   :  { %5366 = vmatprep.mubr.msk.bf16.mxu1 %vm3110_vm2, %v6050_v54 }
 0x429   :  { %3244 = vmatmul.mubr.bf16.gmra.mrb[168].mxu1 %v6053_v4 }
 0x42a   :  { %5367 = vmatprep.mubr.msk.bf16.mxu1 %vm3110_vm2, %v6055_v8 }
 0x431   :  { %3252 = vmatmul.mubr.bf16.gmra.mrb[172].mxu1 %v6058_v21 }
 0x432   :  { %5368 = vmatprep.mubr.msk.bf16.mxu1 %vm3110_vm2, %v6060_v63 }
 0x435   :  { %v5658_v38 = vpop.f32.mrb[120].mxu0 }
 0x436   :  { %v3406_v24 = vpop.f32.mrb[121].mxu0 }
 0x437   :  { %v5659_v26 = vpop.f32.mrb[122].mxu0 }
 0x438   :  { %v3409_v46 = vpop.f32.mrb[123].mxu0 }
 0x439   :  { %3260 = vmatmul.mubr.bf16.gmra.mrb[176].mxu1 %v6063_v47 }
 0x43a   :  { %5369 = vmatprep.mubr.msk.bf16.mxu1 %vm3110_vm2, %v6065_v13 }
 0x43f   :  { %v5662_v7 = vpop.f32.mrb[124].mxu0 }
 0x440   :  { %v3422_v35 = vpop.f32.mrb[125].mxu0 }
 0x441   :  { %v5663_v30 = vpop.f32.mrb[126].mxu0  ;;  %3268 = vmatmul.mubr.bf16.gmra.mrb[180].mxu1 %v6068_v34 }
 0x442   :  { %v3425_v60 = vpop.f32.mrb[127].mxu0 }
 0x474   :  { %v5666_v12 = vpop.f32.mrb[128].mxu0 }
 0x475   :  { %v3438_v17 = vpop.f32.mrb[129].mxu0 }
 0x476   :  { %v5667_v3 = vpop.f32.mrb[130].mxu0 }
 0x477   :  { %v3441_v5 = vpop.f32.mrb[131].mxu0 }
 0x4bc   :  { %v3181_v16 = vpop.f32.mrb[136].mxu1 }
 0x4bd   :  { %v3407_v11 = vadd.f32 %v3406_v24, %v3181_v16  ;;  %v3183_v50 = vpop.f32.mrb[137].mxu1 }
 0x4be   :  { %v3184_v6 = vpop.f32.mrb[138].mxu1 }
 0x4bf   :  { %v3410_v48 = vadd.f32 %v3409_v46, %v3184_v6  ;;  %v3186_v55 = vpop.f32.mrb[139].mxu1 }
 0x4c1   :  { %v8378_v28 = vpack.c.bf16 %v3410_v48, %v3407_v11 }
 0x4c3   :  { %9125 = vst [vmem:[#allocation2_spill] sm:$0xff] %v8378_v28  ;;  %5680 = vmatprep.subr.bf16.mxu0 %v8378_v28 }
 0x4c4   :  { %v3189_v20 = vpop.f32.mrb[140].mxu1  ;;  %5681 = vmatpush3.bf16.msra.mxu0 %v8378_v28 }
 0x4c5   :  { %v3415_v52 = vadd.f32 %v5658_v38, %v3189_v20  ;;  %v3191_v14 = vpop.f32.mrb[141].mxu1 }
 0x4c6   :  { %v3192_v31 = vpop.f32.mrb[142].mxu1 }
 0x4c7   :  { %v3418_v51 = vadd.f32 %v5659_v26, %v3192_v31  ;;  %v3194_v62 = vpop.f32.mrb[143].mxu1 }
 0x4c9   :  { %v8382_v18 = vpack.c.bf16 %v3418_v51, %v3415_v52 }
 0x4cb   :  { %9126 = vst [vmem:[#allocation6_spill] sm:$0xff] %v8382_v18  ;;  %5682 = vmatprep.subr.bf16.mxu0 %v8382_v18 }
 0x4cc   :  { %v3197_v36 = vpop.f32.mrb[144].mxu1  ;;  %5683 = vmatpush3.bf16.msra.mxu0 %v8382_v18 }
 0x4cd   :  { %v3423_v9 = vadd.f32 %v3422_v35, %v3197_v36  ;;  %v3199_v33 = vpop.f32.mrb[145].mxu1 }
 0x4ce   :  { %v3200_v19 = vpop.f32.mrb[146].mxu1 }
 0x4cf   :  { %v3426_v42 = vadd.f32 %v3425_v60, %v3200_v19  ;;  %v3202_v58 = vpop.f32.mrb[147].mxu1 }
 0x4d1   :  { %v8386_v59 = vpack.c.bf16 %v3426_v42, %v3423_v9 }
 0x4d3   :  { %9127 = vst [vmem:[#allocation4_spill] sm:$0xff] %v8386_v59  ;;  %5684 = vmatprep.subr.bf16.mxu0 %v8386_v59 }
 0x4d4   :  { %v3205_v49 = vpop.f32.mrb[148].mxu1  ;;  %5685 = vmatpush3.bf16.msra.mxu0 %v8386_v59 }
 0x4d5   :  { %v8396_v37 = vadd.f32 %v5662_v7, %v3205_v49  ;;  %v3207_v41 = vpop.f32.mrb[149].mxu1 }
 0x4d6   :  { %v3208_v56 = vpop.f32.mrb[150].mxu1 }
 0x4d7   :  { %v8398_v25 = vadd.f32 %v5663_v30, %v3208_v56  ;;  %5687 = vmatmul.mubr.msk.bf16.vlgmr.msra.gmra.mrb[144].mxu0 %vm1065_vm1, %v6070_v61  ;;  %v3210_v27 = vpop.f32.mrb[151].mxu1  ;;  %v5670_v30 = vpop.f32.mrb[132].mxu0 }
 0x4d8   :  { %5690 = vmatprep.mubr.msk.bf16.mxu0 %vm1065_vm1, %v6071_v32  ;;  %v3454_v13 = vpop.f32.mrb[133].mxu0 }
 0x4d9   :  { %v5671_v29 = vpop.f32.mrb[134].mxu0 }
 0x4dc   :  { %v3213_v2 = vpop.f32.mrb[152].mxu1 }
 0x4dd   :  { %v3215_v43 = vpop.f32.mrb[153].mxu1  ;;  %v8405_v0 = vadd.f32 %v3438_v17, %v3213_v2 }
 0x4de   :  { %v3216_v44 = vpop.f32.mrb[154].mxu1  ;;  %v6073_v43 = vld [vmem:[%s8949_s12] sm:$0xff]  }
 0x4df   :  { %5691 = vmatmul.mubr.msk.bf16.gmra.mrb[148].mxu0 %vm1065_vm1, %v6072_v22  ;;  %v3218_v40 = vpop.f32.mrb[155].mxu1  ;;  %v8408_v57 = vadd.f32 %v3441_v5, %v3216_v44  ;;  %v6076_v44 = vld [vmem:[%s8950_s14] sm:$0xff]  }
 0x4e0   :  { %5698 = vmatprep.mubr.msk.bf16.mxu0 %vm4009_vm3, %v6073_v43  ;;  %5738 = vmatprep.mubr.msk.bf16.mxu1 %vm4009_vm3, %v6076_v44  ;;  %v3523_v40 = vpop.permute.xlu0 %3522  ;;  %v6080_v43 = vld [vmem:[%s8950_s14 + $0x10] sm:$0xff]   ;;  %v6081_v44 = vld [vmem:[%s8949_s12 + $0x28] sm:$0xff]  }
 0x4e4   :  { %v3221_v15 = vpop.f32.mrb[156].mxu1 }
 0x4e5   :  { %v8410_v1 = vadd.f32 %v5666_v12, %v3221_v15  ;;  %v3223_v54 = vpop.f32.mrb[157].mxu1  ;;  %v3528_v15 = vpop.permute.xlu1 %3527 }
 0x4e6   :  { %v3224_v4 = vpop.f32.mrb[158].mxu1  ;;  %v3533_v54 = vpop.permute.xlu0 %3532 }
 0x4e7   :  { %v8412_v8 = vadd.f32 %v5667_v3, %v3224_v4  ;;  %v3226_v53 = vpop.f32.mrb[159].mxu1  ;;  %v3457_v3 = vpop.f32.mrb[135].mxu0 }
 0x4e8   :  { %v5674_v50 = vpop.f32.mrb[136].mxu0 }
 0x4e9   :  { %v3470_v48 = vpop.f32.mrb[137].mxu0  ;;  %v3538_v4 = vpop.permute.xlu1 %3537 }
 0x4ea   :  { %v5675_v52 = vpop.f32.mrb[138].mxu0 }
 0x4eb   :  { %v3473_v51 = vpop.f32.mrb[139].mxu0 }
 0x4ec   :  { %v3229_v21 = vpop.f32.mrb[160].mxu1  ;;  %v5678_v33 = vpop.f32.mrb[140].mxu0 }
 0x4ed   :  { %v3231_v38 = vpop.f32.mrb[161].mxu1  ;;  %v8416_v34 = vadd.f32 %v3454_v13, %v3229_v21  ;;  %v3486_v42 = vpop.f32.mrb[141].mxu0 }
 0x4ee   :  { %v3232_v24 = vpop.f32.mrb[162].mxu1  ;;  %v5679_v32 = vpop.f32.mrb[142].mxu0 }
 0x4ef   :  { %v3234_v26 = vpop.f32.mrb[163].mxu1  ;;  %v8420_v16 = vadd.f32 %v3457_v3, %v3232_v24  ;;  %v3489_v56 = vpop.f32.mrb[143].mxu0 }
 0x4f0   :  { %v3543_v24 = vpop.permute.xlu0 %3542 }
 0x4f4   :  { %v3237_v45 = vpop.f32.mrb[164].mxu1 }
 0x4f5   :  { %v3239_v46 = vpop.f32.mrb[165].mxu1  ;;  %v8414_v60 = vadd.f32 %v5670_v30, %v3237_v45 }
 0x4f6   :  { %v3240_v63 = vpop.f32.mrb[166].mxu1 }
 0x4f7   :  { %v3242_v23 = vpop.f32.mrb[167].mxu1  ;;  %9128 = vst [vmem:[#allocation5_spill] sm:$0xff] %v8414_v60  ;;  %v8418_v17 = vadd.f32 %v5671_v29, %v3240_v63 }
 0x4f8   :  { %v3548_v23 = vpop.permute.xlu1 %3547 }
 0x4f9   :  { %9129 = vst [vmem:[#allocation3_spill] sm:$0xff] %v8418_v17 }
 0x4fc   :  { %v3245_v47 = vpop.f32.mrb[168].mxu1 }
 0x4fd   :  { %v3247_v7 = vpop.f32.mrb[169].mxu1  ;;  %v8424_v20 = vadd.f32 %v3470_v48, %v3245_v47 }
 0x4fe   :  { %v3248_v39 = vpop.f32.mrb[170].mxu1 }
 0x4ff   :  { %v3250_v35 = vpop.f32.mrb[171].mxu1  ;;  %v8428_v36 = vadd.f32 %v3473_v51, %v3248_v39 }
 0x501   :  { %9132 = vst [vmem:[#allocation9_spill] sm:$0xff] %v8428_v36 }
 0x504   :  { %v3253_v10 = vpop.f32.mrb[172].mxu1 }
 0x505   :  { %v3255_v12 = vpop.f32.mrb[173].mxu1  ;;  %v8422_v6 = vadd.f32 %v5674_v50, %v3253_v10  ;;  %v3553_v10 = vpop.permute.xlu0 %3552 }
 0x506   :  { %v3256_v5 = vpop.f32.mrb[174].mxu1 }
 0x507   :  { %v3258_v11 = vpop.f32.mrb[175].mxu1  ;;  %9130 = vst [vmem:[#allocation10_spill] sm:$0xff] %v8422_v6  ;;  %v8426_v31 = vadd.f32 %v5675_v52, %v3256_v5 }
 0x508   :  { %v3558_v11 = vpop.permute.xlu1 %3557 }
 0x509   :  { %9131 = vst [vmem:[#allocation8_spill] sm:$0xff] %v8426_v31 }
 0x50c   :  { %v3261_v55 = vpop.f32.mrb[176].mxu1 }
 0x50d   :  { %v3263_v14 = vpop.f32.mrb[177].mxu1  ;;  %v8432_v61 = vadd.f32 %v3486_v42, %v3261_v55 }
 0x50e   :  { %v3264_v62 = vpop.f32.mrb[178].mxu1 }
 0x50f   :  { %v3266_v9 = vpop.f32.mrb[179].mxu1  ;;  %9134 = vst [vmem:[#allocation14_spill] sm:$0xff] %v8432_v61  ;;  %v8436_v22 = vadd.f32 %v3489_v56, %v3264_v62  ;;  %v6078_v56 = vld [vmem:[%s8950_s14 + $0x8] sm:$0xff]  }
 0x511   :  { %9136 = vst [vmem:[#allocation13_spill] sm:$0xff] %v8436_v22 }
 0x514   :  { %v3269_v19 = vpop.f32.mrb[180].mxu1 }
 0x515   :  { %v8430_v58 = vadd.f32 %v5678_v33, %v3269_v19  ;;  %v3271_v49 = vpop.f32.mrb[181].mxu1  ;;  %v6074_v19 = vld [vmem:[%s8949_s12 + $0x8] sm:$0xff]  }
 0x516   :  { %v3272_v41 = vpop.f32.mrb[182].mxu1  ;;  %v6075_v49 = vld [vmem:[%s8949_s12 + $0x10] sm:$0xff]  }
 0x517   :  { %9133 = vst [vmem:[#allocation7_spill] sm:$0xff] %v8430_v58  ;;  %v8434_v27 = vadd.f32 %v5679_v32, %v3272_v41  ;;  %v3274_v2 = vpop.f32.mrb[183].mxu1  ;;  %v6077_v41 = vld [vmem:[%s8949_s12 + $0x18] sm:$0xff]  }
 0x518   :  { %v6079_v2 = vld [vmem:[%s8949_s12 + $0x20] sm:$0xff]  }
 0x519   :  { %9135 = vst [vmem:[#allocation12_spill] sm:$0xff] %v8434_v27 }
 0x5aa   :  { %v5688_v53 = vpop.f32.mrb[144].mxu0 }
 0x5ab   :  { %v3635_v21 = vadd.f32 %v5688_v53, %v3533_v54  ;;  %v3626_v38 = vpop.f32.mrb[145].mxu0  ;;  %v6084_v54 = vld [vmem:[%s8950_s14 + $0x20] sm:$0xff]   ;;  %v6086_v53 = vld [vmem:[%s8950_s14 + $0x28] sm:$0xff]  }
 0x5ac   :  { %v3627_v26 = vadd.f32 %v3626_v38, %v3523_v40  ;;  %v5689_v45 = vpop.f32.mrb[146].mxu0  ;;  %v6082_v40 = vld [vmem:[%s8950_s14 + $0x18] sm:$0xff]   ;;  %v6088_v38 = vld [vmem:[%s8950_s14 + $0x30] sm:$0xff]  }
 0x5ad   :  { %v3638_v46 = vadd.f32 %v5689_v45, %v3538_v4  ;;  %v3629_v63 = vpop.f32.mrb[147].mxu0  ;;  %v3659_v7 = vmax.f32 %v3635_v21, 0.0  ;;  %v6085_v4 = vld [vmem:[%s8949_s12 + $0x38] sm:$0xff]   ;;  %v6087_v21 = vld [vmem:[%s8949_s12 + $0x40] sm:$0xff]   ;;  %v6091_v45 = vld [vmem:[%s8949_s12 + $0x50] sm:$0xff]  }
 0x5ae   :  { %v3630_v47 = vadd.f32 %v3629_v63, %v3528_v15  ;;  %v3657_v35 = vmax.f32 %v3627_v26, 0.0  ;;  %v6083_v15 = vld [vmem:[%s8949_s12 + $0x30] sm:$0xff]   ;;  %v6090_v26 = vld [vmem:[%s8950_s14 + $0x38] sm:$0xff]  }
 0x5af   :  { %v3660_v39 = vmax.f32 %v3638_v46, 0.0  ;;  %v6092_v46 = vld [vmem:[%s8950_s14 + $0x40] sm:$0xff]   ;;  %v6093_v63 = vld [vmem:[%s8949_s12 + $0x58] sm:$0xff]  }
 0x5b0   :  { %v3658_v30 = vmax.f32 %v3630_v47, 0.0  ;;  %v6095_v47 = vld [vmem:[%s8949_s12 + $0x60] sm:$0xff]  }
 0x5b1   :  { %v3702_v13 = vpack.c.bf16 %v3660_v39, %v3659_v7  ;;  %v6096_v7 = vld [vmem:[%s8950_s14 + $0x50] sm:$0xff]   ;;  %v6097_v39 = vld [vmem:[%s8949_s12 + $0x68] sm:$0xff]  }
 0x5b2   :  { %v3701_v29 = vpack.c.bf16 %v3658_v30, %v3657_v35  ;;  %v5692_v12 = vpop.f32.mrb[148].mxu0  ;;  %v6098_v35 = vld [vmem:[%s8950_s14 + $0x58] sm:$0xff]   ;;  %v6099_v30 = vld [vmem:[%s8949_s12 + $0x70] sm:$0xff]  }
 0x5b3   :  { %v3651_v3 = vadd.f32 %v5692_v12, %v3553_v10  ;;  %v3642_v5 = vpop.f32.mrb[149].mxu0  ;;  %v6101_v10 = vld [vmem:[%s8949_s12 + $0x78] sm:$0xff]   ;;  %v6103_v12 = vld [vmem:[%s8949_s12 + $0x80] sm:$0xff]  }
 0x5b4   :  { %v3643_v50 = vadd.f32 %v3642_v5, %v3543_v24  ;;  %v5693_v48 = vpop.f32.mrb[150].mxu0  ;;  %5694 = vmatprep.subr.bf16.mxu0 %v3701_v29  ;;  %v6089_v24 = vld [vmem:[%s8949_s12 + $0x48] sm:$0xff]  }
 0x5b5   :  { %v3654_v55 = vadd.f32 %v5693_v48, %v3558_v11  ;;  %v3645_v52 = vpop.f32.mrb[151].mxu0  ;;  %5695 = vmatpush3.bf16.msra.mxu0 %v3701_v29  ;;  %v3663_v51 = vmax.f32 %v3651_v3, 0.0  ;;  %v6102_v29 = vld [vmem:[%s8950_s14 + $0x68] sm:$0xff]   ;;  %v6104_v3 = vld [vmem:[%s8950_s14 + $0x70] sm:$0xff]   ;;  %v6106_v11 = vld [vmem:[%s8950_s14 + $0x78] sm:$0xff]   ;;  %v3742_v48 = vpop.permute.xlu0 %3741 }
 0x5b6   :  { %v3646_v14 = vadd.f32 %v3645_v52, %v3548_v23  ;;  %5696 = vmatprep.subr.bf16.mxu0 %v3702_v13  ;;  %v3661_v9 = vmax.f32 %v3643_v50, 0.0  ;;  %v6094_v23 = vld [vmem:[%s8950_s14 + $0x48] sm:$0xff]   ;;  %v6107_v50 = vld [vmem:[%s8950_s14 + $0x80] sm:$0xff]   ;;  %v3747_v52 = vpop.permute.xlu1 %3746 }
 0x5b7   :  { %v3664_v62 = vmax.f32 %v3654_v55, 0.0  ;;  %v6105_v5 = vld [vmem:[%s8949_s12 + $0x88] sm:$0xff]  }
 0x5b8   :  { %v3662_v33 = vmax.f32 %v3646_v14, 0.0  ;;  %v6108_v55 = vld [vmem:[%s8950_s14 + $0x88] sm:$0xff]  }
 0x5b9   :  { %v4368_v42 = vpack.c.bf16 %v3664_v62, %v3663_v51  ;;  %5697 = vmatpush3.bf16.msra.mxu0 %v3702_v13  ;;  %v6100_v13 = vld [vmem:[%s8950_s14 + $0x60] sm:$0xff]   ;;  %v3752_v14 = vpop.permute.xlu0 %3751 }
 0x5ba   :  { %v4367_v32 = vpack.c.bf16 %v3662_v33, %v3661_v9  ;;  %v3757_v51 = vpop.permute.xlu1 %3756 }
 0x5bc   :  { %5699 = vmatmul.mubr.msk.bf16.vlgmr.msra.gmra.mrb[152].mxu0 %vm4009_vm3, %v6074_v19  ;;  %5734 = vmatprep.subr.bf16.mxu1 %v4367_v32 }
 0x5bd   :  { %5735 = vmatpush3.bf16.msra.mxu1 %v4367_v32  ;;  %5702 = vmatprep.mubr.msk.bf16.mxu0 %vm4009_vm3, %v6075_v49  ;;  %v8582_v62 = vpop.permute.xlu0 %4407 }
 0x5be   :  { %5736 = vmatprep.subr.bf16.mxu1 %v4368_v42  ;;  %v8584_v9 = vpop.permute.xlu1 %4412 }
 0x5c1   :  { %5737 = vmatpush3.bf16.msra.mxu1 %v4368_v42  ;;  %v8586_v33 = vpop.permute.xlu0 %3761 }
 0x5c2   :  { %v8588_v19 = vpop.permute.xlu1 %3766 }
 0x5c4   :  { %5703 = vmatmul.mubr.msk.bf16.gmra.mrb[156].mxu0 %vm4009_vm3, %v6077_v41  ;;  %5739 = vmatmul.mubr.msk.bf16.vlgmr.msra.gmra.mrb[184].mxu1 %vm4009_vm3, %v6078_v56 }
 0x5c5   :  { %5706 = vmatprep.mubr.msk.bf16.mxu0 %vm4009_vm3, %v6079_v2  ;;  %5742 = vmatprep.mubr.msk.bf16.mxu1 %vm4009_vm3, %v6080_v43  ;;  %v8590_v42 = vpop.permute.xlu0 %4417 }
 0x5c6   :  { %v8592_v49 = vpop.permute.xlu1 %4422 }
 0x5c9   :  { %v3772_v32 = vpop.permute.xlu0 %3771 }
 0x5ca   :  { %v8594_v41 = vpop.permute.xlu1 %3776 }
 0x5cc   :  { %5707 = vmatmul.mubr.msk.bf16.gmra.mrb[160].mxu0 %vm4009_vm3, %v6081_v44  ;;  %5743 = vmatmul.mubr.msk.bf16.gmra.mrb[188].mxu1 %vm4009_vm3, %v6082_v40 }
 0x5cd   :  { %5710 = vmatprep.mubr.msk.bf16.mxu0 %vm4009_vm3, %v6083_v15  ;;  %5746 = vmatprep.mubr.msk.bf16.mxu1 %vm4009_vm3, %v6084_v54  ;;  %v8596_v56 = vpop.permute.xlu0 %4427 }
 0x5ce   :  { %v8598_v2 = vpop.permute.xlu1 %4432 }
 0x5d1   :  { %v8600_v43 = vpop.permute.xlu0 %3781 }
 0x5d2   :  { %v8602_v44 = vpop.permute.xlu1 %3786 }
 0x5d4   :  { %5711 = vmatmul.mubr.msk.bf16.gmra.mrb[164].mxu0 %vm4009_vm3, %v6085_v4  ;;  %5747 = vmatmul.mubr.msk.bf16.gmra.mrb[192].mxu1 %vm4009_vm3, %v6086_v53 }
 0x5d5   :  { %5714 = vmatprep.mubr.msk.bf16.mxu0 %vm4009_vm3, %v6087_v21  ;;  %5750 = vmatprep.mubr.msk.bf16.mxu1 %vm4009_vm3, %v6088_v38  ;;  %v8604_v40 = vpop.permute.xlu0 %4437 }
 0x5d6   :  { %v8606_v15 = vpop.permute.xlu1 %4442 }
 0x5d9   :  { %v8608_v54 = vpop.permute.xlu0 %3791 }
 0x5da   :  { %v8610_v4 = vpop.permute.xlu1 %3796 }
 0x5dc   :  { %5715 = vmatmul.mubr.msk.bf16.gmra.mrb[168].mxu0 %vm4009_vm3, %v6089_v24  ;;  %5751 = vmatmul.mubr.msk.bf16.gmra.mrb[196].mxu1 %vm4009_vm3, %v6090_v26 }
 0x5dd   :  { %5718 = vmatprep.mubr.msk.bf16.mxu0 %vm4009_vm3, %v6091_v45  ;;  %5754 = vmatprep.mubr.msk.bf16.mxu1 %vm4009_vm3, %v6092_v46  ;;  %v8612_v53 = vpop.permute.xlu0 %4447 }
 0x5de   :  { %v8614_v21 = vpop.permute.xlu1 %4452 }
 0x5e1   :  { %v8616_v38 = vpop.permute.xlu0 %3801 }
 0x5e2   :  { %v8618_v24 = vpop.permute.xlu1 %3806 }
 0x5e4   :  { %5719 = vmatmul.mubr.msk.bf16.gmra.mrb[172].mxu0 %vm4009_vm3, %v6093_v63  ;;  %5755 = vmatmul.mubr.msk.bf16.gmra.mrb[200].mxu1 %vm4009_vm3, %v6094_v23 }
 0x5e5   :  { %5722 = vmatprep.mubr.msk.bf16.mxu0 %vm4009_vm3, %v6095_v47  ;;  %5758 = vmatprep.mubr.msk.bf16.mxu1 %vm4009_vm3, %v6096_v7  ;;  %v8620_v26 = vpop.permute.xlu0 %4457 }
 0x5e6   :  { %v8622_v45 = vpop.permute.xlu1 %4462 }
 0x5e9   :  { %v8624_v46 = vpop.permute.xlu0 %3831 }
 0x5ea   :  { %v8626_v63 = vpop.permute.xlu1 %3836 }
 0x5ec   :  { %5723 = vmatmul.mubr.msk.bf16.gmra.mrb[176].mxu0 %vm4009_vm3, %v6097_v39  ;;  %5759 = vmatmul.mubr.msk.bf16.gmra.mrb[204].mxu1 %vm4009_vm3, %v6098_v35  ;;  %v8965_v39 = vmov 0.0|0.0  }
 0x5ed   :  { %5726 = vmatprep.mubr.msk.bf16.mxu0 %vm4009_vm3, %v6099_v30  ;;  %5762 = vmatprep.mubr.msk.bf16.mxu1 %vm4009_vm3, %v6100_v13  ;;  %v8628_v23 = vpop.permute.xlu0 %3811 }
 0x5ee   :  { %v8630_v47 = vpop.permute.xlu1 %3816  ;;  %5789 = vmatprep.subr.bf16.mxu0 %v8965_v39 }
 0x5f1   :  { %v8632_v7 = vpop.permute.xlu0 %4467 }
 0x5f2   :  { %v8635_v35 = vpop.permute.xlu1 %4472 }
 0x5f3   :  { %9137 = vst [vmem:[#allocation11_spill] sm:$0xff] %v8635_v35 }
 0x5f4   :  { %5727 = vmatmul.mubr.msk.bf16.gmra.mrb[180].mxu0 %vm4009_vm3, %v6101_v10  ;;  %5763 = vmatmul.mubr.msk.bf16.gmra.mrb[208].mxu1 %vm4009_vm3, %v6102_v29 }
 0x5f5   :  { %5730 = vmatprep.mubr.msk.bf16.mxu0 %vm4009_vm3, %v6103_v12  ;;  %5766 = vmatprep.mubr.msk.bf16.mxu1 %vm4009_vm3, %v6104_v3  ;;  %v8637_v30 = vpop.permute.xlu0 %3841 }
 0x5f6   :  { %v8639_v13 = vpop.permute.xlu1 %3846 }
 0x5f9   :  { %v8641_v10 = vpop.permute.xlu0 %4497 }
 0x5fa   :  { %v8643_v29 = vpop.permute.xlu1 %4502 }
 0x5fc   :  { %5731 = vmatmul.mubr.msk.bf16.gmra.mrb[184].mxu0 %vm4009_vm3, %v6105_v5  ;;  %5767 = vmatmul.mubr.msk.bf16.gmra.mrb[212].mxu1 %vm4009_vm3, %v6106_v11 }
 0x5fd   :  { %5770 = vmatprep.mubr.msk.bf16.mxu1 %vm4009_vm3, %v6107_v50  ;;  %v8645_v12 = vpop.permute.xlu0 %3821 }
 0x5fe   :  { %v8647_v3 = vpop.permute.xlu1 %3826 }
 0x5ff   :  { %9138 = vst [vmem:[#allocation19_spill] sm:$0xff] %v8647_v3 }
 0x601   :  { %v8649_v5 = vpop.permute.xlu0 %4477 }
 0x602   :  { %v8651_v11 = vpop.permute.xlu1 %4482 }
 0x603   :  { %9139 = vst [vmem:[#allocation16_spill] sm:$0xff] %v8651_v11 }
 0x604   :  { %5771 = vmatmul.mubr.msk.bf16.gmra.mrb[216].mxu1 %vm4009_vm3, %v6108_v55  ;;  %v4998_v55 = vld [vmem:[%s8951_s17 + $0x8] sm:$0xff] }
 0x605   :  { %v8653_v50 = vpop.permute.xlu0 %3851  ;;  %5474 = vmatprep.mubr.msk.f32.mxu0 %vm3110_vm2, %v4998_v55 }
 0x606   :  { %v8659_v39 = vpop.permute.xlu1 %3856 }
 0x609   :  { %v8661_v59 = vpop.permute.xlu0 %4507 }
 0x60a   :  { %v8663_v18 = vpop.permute.xlu1 %4512 }
 0x60b   :  { %9140 = vst [vmem:[#allocation18_spill] sm:$0xff] %v8663_v18 }
 0x60d   :  { %v8665_v28 = vpop.permute.xlu0 %4487 }
 0x60e   :  { %9141 = vst [vmem:[#allocation15_spill] sm:$0xff] %v8665_v28  ;;  %v8667_v27 = vpop.permute.xlu1 %4492 }
 0x60f   :  { %9142 = vst [vmem:[#allocation17_spill] sm:$0xff] %v8667_v27 }
 0x611   :  { %v8669_v58 = vpop.permute.xlu0 %3861 }
 0x612   :  { %v8671_v31 = vpop.permute.xlu1 %3866 }
 0x613   :  { %9143 = vst [vmem:[#allocation21_spill] sm:$0xff] %v8671_v31 }
 0x615   :  { %v8673_v6 = vpop.permute.xlu0 %4517 }
 0x616   :  { %9144 = vst [vmem:[#allocation25_spill] sm:$0xff] %v8673_v6  ;;  %v8675_v28 = vpop.permute.xlu1 %4522 }
 0x617   :  { %9145 = vst [vmem:[#allocation22_spill] sm:$0xff] %v8675_v28 }
 0x619   :  { %v8677_v27 = vpop.permute.xlu0 %3871 }
 0x68f   :  { %v5700_v22 = vpop.f32.mrb[152].mxu0 }
 0x690   :  { %v4107_v61 = vadd.f32 %v5700_v22, %v3752_v14  ;;  %v4098_v17 = vpop.f32.mrb[153].mxu0 }
 0x691   :  { %v4099_v55 = vadd.f32 %v4098_v17, %v3742_v48  ;;  %v5701_v35 = vpop.f32.mrb[154].mxu0 }
 0x692   :  { %6253 = vtanh.f32 %v4107_v61  ;;  %v4110_v3 = vadd.f32 %v5701_v35, %v3757_v51  ;;  %v4101_v36 = vpop.f32.mrb[155].mxu0 }
 0x693   :  { %6255 = vtanh.f32 %v4099_v55  ;;  %v4102_v11 = vadd.f32 %v4101_v36, %v3747_v52 }
 0x694   :  { %6257 = vtanh.f32 %v4110_v3 }
 0x695   :  { %6259 = vtanh.f32 %v4102_v11 }
 0x697   :  { %v5704_v60 = vpop.f32.mrb[156].mxu0  ;;  %v5740_v18 = vpop.f32.mrb[184].mxu1 }
 0x698   :  { %v4123_v31 = vadd.f32 %v5704_v60, %v3772_v32  ;;  %v4772_v6 = vadd.f32 %v5740_v18, %v8590_v42  ;;  %v4114_v22 = vpop.f32.mrb[157].mxu0  ;;  %v4763_v14 = vpop.f32.mrb[185].mxu1 }
 0x699   :  { %v4115_v17 = vadd.f32 %v4114_v22, %v8586_v33  ;;  %v4764_v61 = vadd.f32 %v4763_v14, %v8582_v62  ;;  %v5705_v48 = vpop.f32.mrb[158].mxu0  ;;  %v5741_v51 = vpop.f32.mrb[186].mxu1 }
 0x69a   :  { %6261 = vtanh.f32 %v4123_v31  ;;  %v4126_v36 = vadd.f32 %v5705_v48, %v8594_v41  ;;  %v4117_v52 = vpop.f32.mrb[159].mxu0  ;;  %v4766_v35 = vpop.f32.mrb[187].mxu1  ;;  %v4775_v41 = vadd.f32 %v5741_v51, %v8592_v49 }
 0x69b   :  { %6263 = vtanh.f32 %v4772_v6  ;;  %v8683_v42 = vpop.permute.xlu1 %3876  ;;  %v8685_v32 = vpop.permute.xlu0 %4527  ;;  %v4118_v14 = vadd.f32 %v4117_v52, %v8588_v19  ;;  %v4767_v48 = vadd.f32 %v4766_v35, %v8584_v9 }
 0x69c   :  { %v6254_v3 = vpop.eup %6253  ;;  %6265 = vtanh.f32 %v4115_v17  ;;  %9146 = vst [vmem:[#allocation20_spill] sm:$0xff] %v8683_v42 }
 0x69d   :  { %v6256_v11 = vpop.eup %6255  ;;  %v4263_v60 = vmul.f32 1.442695, %v6254_v3  ;;  %6267 = vtanh.f32 %v4764_v61 }
 0x69e   :  { %v6258_v18 = vpop.eup %6257  ;;  %v4259_v33 = vmul.f32 1.442695, %v6256_v11  ;;  %6269 = vtanh.f32 %v4126_v36 }
 0x69f   :  { %v6260_v62 = vpop.eup %6259  ;;  %6271 = vpow2.f32 %v4263_v60  ;;  %v4265_v31 = vmul.f32 1.442695, %v6258_v18  ;;  %v5708_v55 = vpop.f32.mrb[160].mxu0 }
 0x6a0   :  { %v5744_v22 = vpop.f32.mrb[188].mxu1  ;;  %6273 = vpow2.f32 %v4259_v33  ;;  %v4261_v6 = vmul.f32 1.442695, %v6260_v62  ;;  %v4130_v17 = vpop.f32.mrb[161].mxu0  ;;  %v4139_v60 = vadd.f32 %v5708_v55, %v8608_v54 }
 0x6a1   :  { %v4779_v61 = vpop.f32.mrb[189].mxu1  ;;  %6275 = vpow2.f32 %v4265_v31  ;;  %v4131_v3 = vadd.f32 %v4130_v17, %v8600_v43  ;;  %v5709_v11 = vpop.f32.mrb[162].mxu0 }
 0x6a2   :  { %v5745_v36 = vpop.f32.mrb[190].mxu1  ;;  %6277 = vpow2.f32 %v4261_v6  ;;  %v4133_v18 = vpop.f32.mrb[163].mxu0 }
 0x6a3   :  { %v8692_v49 = vpop.f32.mrb[191].mxu1  ;;  %6279 = vtanh.f32 %v4775_v41  ;;  %v8695_v51 = vadd.f32 %v4133_v18, %v8602_v44  ;;  %v8697_v35 = vpop.permute.xlu1 %4532 }
 0x6a4   :  { %v6262_v19 = vpop.eup %6261  ;;  %6281 = vtanh.f32 %v4118_v14  ;;  %9147 = vst [vmem:[#allocation24_spill] sm:$0xff] %v8697_v35  ;;  %v8699_v43 = vpop.permute.xlu0 %3881  ;;  %v4788_v14 = vadd.f32 %v5744_v22, %v8604_v40 }
 0x6a5   :  { %v6264_v52 = vpop.eup %6263  ;;  %v4271_v33 = vmul.f32 1.442695, %v6262_v19  ;;  %6283 = vtanh.f32 %v4767_v48 }
 0x6a6   :  { %v6266_v9 = vpop.eup %6265  ;;  %v4928_v62 = vmul.f32 1.442695, %v6264_v52  ;;  %6285 = vtanh.f32 %v4139_v60 }
 0x6a7   :  { %v6268_v54 = vpop.eup %6267  ;;  %6287 = vpow2.f32 %v4271_v33  ;;  %v4267_v31 = vmul.f32 1.442695, %v6266_v9  ;;  %v5712_v55 = vpop.f32.mrb[164].mxu0  ;;  %v4780_v9 = vadd.f32 %v4779_v61, %v8596_v56 }
 0x6a8   :  { %v8701_v41 = vpop.f32.mrb[192].mxu1  ;;  %v6270_v44 = vpop.eup %6269  ;;  %6289 = vpow2.f32 %v4928_v62  ;;  %v4924_v6 = vmul.f32 1.442695, %v6268_v54  ;;  %v4142_v54 = vadd.f32 %v5709_v11, %v8610_v4 }
 0x6a9   :  { %v8704_v17 = vpop.f32.mrb[165].mxu0  ;;  %v8706_v48 = vpop.f32.mrb[193].mxu1  ;;  %6291 = vpow2.f32 %v4267_v31  ;;  %v4273_v19 = vmul.f32 1.442695, %v6270_v44 }
 0x6aa   :  { %v6272_v18 = vpop.eup %6271  ;;  %v8708_v52 = vpop.f32.mrb[166].mxu0  ;;  %6293 = vpow2.f32 %v4924_v6 }
 0x6ab   :  { %v8710_v60 = vpop.f32.mrb[194].mxu1  ;;  %v6274_v33 = vpop.eup %6273  ;;  %v8718_v40 = vmul.f32 %v6272_v18, %v8405_v0  ;;  %6295 = vpow2.f32 %v4273_v19 }
 0x6ac   :  { %v8713_v35 = vpop.f32.mrb[167].mxu0  ;;  %v8715_v62 = vpop.f32.mrb[195].mxu1  ;;  %v4295_v31 = vmul.f32 %v6274_v33, %v8396_v37  ;;  %6297 = vtanh.f32 %v4788_v14 }
 0x6ad   :  { %v6276_v22 = vpop.eup %6275  ;;  %6299 = vtanh.f32 %v4131_v3  ;;  %v8726_v42 = vpop.permute.xlu1 %3886  ;;  %v4791_v3 = vadd.f32 %v5745_v36, %v8606_v15 }
 0x6ae   :  { %v6278_v44 = vpop.eup %6277  ;;  %v8723_v28 = vmul.f32 %v6276_v22, %v8408_v57  ;;  %v8728_v0 = vpop.permute.xlu0 %4537  ;;  %6301 = vtanh.f32 %v4780_v9 }
 0x6af   :  { %v6280_v6 = vpop.eup %6279  ;;  %v4296_v56 = vmul.f32 %v6278_v44, %v8398_v25  ;;  %9148 = vst [vmem:[#allocation23_spill] sm:$0xff] %v8728_v0  ;;  %6303 = vtanh.f32 %v4142_v54  ;;  %v5716_v37 = vpop.f32.mrb[168].mxu0 }
 0x6b0   :  { %v6282_v61 = vpop.eup %6281  ;;  %v4930_v18 = vmul.f32 1.442695, %v6280_v6  ;;  %v8730_v11 = vpop.f32.mrb[196].mxu1  ;;  %v4171_v25 = vadd.f32 %v5716_v37, %v8624_v46 }
 0x6b1   :  { %v6284_v19 = vpop.eup %6283  ;;  %v4269_v4 = vmul.f32 1.442695, %v6282_v61  ;;  %v8734_v33 = vpop.f32.mrb[169].mxu0 }
 0x6b2   :  { %v6286_v14 = vpop.eup %6285  ;;  %6305 = vpow2.f32 %v4930_v18  ;;  %v4926_v57 = vmul.f32 1.442695, %v6284_v19  ;;  %v8736_v22 = vpop.f32.mrb[197].mxu1  ;;  %v4783_v18 = vadd.f32 %v8692_v49, %v8598_v2  ;;  %v4313_v19 = vadd.f32 %v4295_v31, %v4171_v25 }
 0x6b3   :  { %v6288_v44 = vpop.eup %6287  ;;  %6307 = vpow2.f32 %v4269_v4  ;;  %v4279_v9 = vmul.f32 1.442695, %v6286_v14  ;;  %v5717_v6 = vpop.f32.mrb[170].mxu0  ;;  %v4155_v4 = vadd.f32 %v5712_v55, %v8628_v23 }
 0x6b4   :  { %v8738_v61 = vpop.f32.mrb[198].mxu1  ;;  %v8740_v54 = vpop.eup %6289  ;;  %6309 = vpow2.f32 %v4926_v57  ;;  %v4174_v15 = vadd.f32 %v5717_v6, %v8626_v63  ;;  %v8751_v14 = vmul.f32 %v6288_v44, %v8416_v34  ;;  %v4804_v57 = vadd.f32 %v8701_v41, %v8620_v26 }
 0x6b5   :  { %v8745_v46 = vpop.f32.mrb[171].mxu0  ;;  %v8747_v36 = vpop.f32.mrb[199].mxu1  ;;  %6311 = vpow2.f32 %v4279_v9  ;;  %v4147_v34 = vadd.f32 %v8704_v17, %v8616_v38 }
 0x6b6   :  { %v6292_v37 = vpop.eup %6291  ;;  %6313 = vtanh.f32 %v4791_v3  ;;  %v4314_v2 = vadd.f32 %v4296_v56, %v4174_v15  ;;  %v8757_v6 = vpop.permute.xlu1 %4542 }
 0x6b7   :  { %v6294_v0 = vpop.eup %6293  ;;  %v4299_v49 = vmul.f32 %v6292_v37, %v8410_v1  ;;  %6315 = vtanh.f32 %v8695_v51  ;;  %v8759_v9 = vpop.permute.xlu0 %3891  ;;  %v4796_v1 = vadd.f32 %v8706_v48, %v8612_v53  ;;  %v4158_v51 = vadd.f32 %v8708_v52, %v8630_v47 }
 0x6b8   :  { %v6296_v63 = vpop.eup %6295  ;;  %v4960_v31 = vmul.f32 %v6294_v0, %v4313_v19  ;;  %6317 = vtanh.f32 %v4783_v18  ;;  %v5720_v41 = vpop.f32.mrb[172].mxu0  ;;  %v4807_v53 = vadd.f32 %v8710_v60, %v8622_v45 }
 0x6b9   :  { %v6298_v25 = vpop.eup %6297  ;;  %v8764_v23 = vmul.f32 %v6296_v63, %v8420_v16  ;;  %6319 = vtanh.f32 %v4155_v4  ;;  %v5756_v56 = vpop.f32.mrb[200].mxu1  ;;  %v4187_v44 = vadd.f32 %v5720_v41, %v8653_v50  ;;  %v4799_v41 = vadd.f32 %v8715_v62, %v8614_v21 }
 0x6ba   :  { %v6300_v26 = vpop.eup %6299  ;;  %v4936_v55 = vmul.f32 1.442695, %v6298_v25  ;;  %6321 = vtanh.f32 %v4804_v57  ;;  %v4836_v38 = vadd.f32 %v5756_v56, %v8641_v10  ;;  %v4178_v16 = vpop.f32.mrb[173].mxu0  ;;  %v4820_v21 = vadd.f32 %v8730_v11, %v8649_v5 }
 0x6bb   :  { %v6302_v0 = vpop.eup %6301  ;;  %v4275_v3 = vmul.f32 1.442695, %v6300_v26  ;;  %v8772_v17 = vpop.f32.mrb[201].mxu1  ;;  %v4179_v47 = vadd.f32 %v4178_v16, %v8637_v30  ;;  %v8779_v50 = vadd.f32 %v4299_v49, %v4187_v44  ;;  %v4150_v26 = vadd.f32 %v8713_v35, %v8618_v24 }
 0x6bc   :  { %v6304_v18 = vpop.eup %6303  ;;  %6323 = vpow2.f32 %v4936_v55  ;;  %v4932_v19 = vmul.f32 1.442695, %v6302_v0  ;;  %v5721_v48 = vpop.f32.mrb[174].mxu0  ;;  %v4978_v10 = vadd.f32 %v4960_v31, %v4836_v38 }
 0x6bd   :  { %v5757_v52 = vpop.f32.mrb[202].mxu1  ;;  %v8777_v15 = vpop.eup %6305  ;;  %6325 = vpow2.f32 %v4275_v3  ;;  %v4281_v37 = vmul.f32 1.442695, %v6304_v18  ;;  %v4315_v25 = vadd.f32 %v8718_v40, %v4179_v47  ;;  %v4190_v45 = vadd.f32 %v5721_v48, %v8659_v39 }
 0x6be   :  { %v4181_v4 = vpop.f32.mrb[175].mxu0  ;;  %v8781_v57 = vpop.f32.mrb[203].mxu1  ;;  %6327 = vpow2.f32 %v4932_v19  ;;  %v4839_v30 = vadd.f32 %v5757_v52, %v8643_v29 }
 0x6bf   :  { %v6308_v63 = vpop.eup %6307  ;;  %6329 = vpow2.f32 %v4281_v37  ;;  %v4182_v31 = vadd.f32 %v4181_v4, %v8639_v13  ;;  %v4962_v40 = vmul.f32 %v8740_v54, %v4315_v25  ;;  %v8793_v0 = vpop.permute.xlu1 %3896  ;;  %v9149_v37 = vld [vmem:[#allocation25_spill] sm:$0xff] }
 0x6c0   :  { %v6310_v60 = vpop.eup %6309  ;;  %v4300_v49 = vmul.f32 %v6308_v63, %v8412_v8  ;;  %6331 = vtanh.f32 %v4147_v34  ;;  %v8795_v29 = vpop.permute.xlu0 %4547  ;;  %v9150_v25 = vld [vmem:[#allocation21_spill] sm:$0xff] }
 0x6c1   :  { %v6312_v55 = vpop.eup %6311  ;;  %v4961_v56 = vmul.f32 %v6310_v60, %v4314_v2  ;;  %6333 = vtanh.f32 %v4796_v1  ;;  %v4316_v8 = vadd.f32 %v8723_v28, %v4182_v31  ;;  %v5724_v54 = vpop.f32.mrb[176].mxu0  ;;  %v4163_v1 = vadd.f32 %v8734_v33, %v8645_v12 }
 0x6c2   :  { %v6314_v39 = vpop.eup %6313  ;;  %v8797_v3 = vadd.f32 %v4300_v49, %v4190_v45  ;;  %v8801_v24 = vmul.f32 %v6312_v55, %v8424_v20  ;;  %6335 = vtanh.f32 %v4158_v51  ;;  %v5760_v2 = vpop.f32.mrb[204].mxu1  ;;  %v8809_v28 = vadd.f32 %v8736_v22, %v8632_v7  ;;  %v9153_v49 = vld [vmem:[#allocation5_spill] sm:$0xff] }
 0x6c3   :  { %v6316_v13 = vpop.eup %6315  ;;  %v4938_v35 = vmul.f32 1.442695, %v6314_v39  ;;  %v4979_v62 = vadd.f32 %v4961_v56, %v4839_v30  ;;  %6337 = vtanh.f32 %v4807_v53  ;;  %v4194_v20 = vpop.f32.mrb[177].mxu0  ;;  %v4203_v12 = vadd.f32 %v5724_v54, %v8677_v27  ;;  %v9151_v30 = vld [vmem:[#allocation18_spill] sm:$0xff] }
 0x6c4   :  { %v6318_v34 = vpop.eup %6317  ;;  %v4277_v44 = vmul.f32 1.442695, %v6316_v13  ;;  %v4843_v38 = vpop.f32.mrb[205].mxu1  ;;  %v4195_v5 = vadd.f32 %v4194_v20, %v8669_v58  ;;  %v9152_v27 = vmov 0.0|0.0   ;;  %v4963_v55 = vmul.f32 %v8777_v15, %v4316_v8  ;;  %v9155_v20 = vld [vmem:[#allocation9_spill] sm:$0xff] }
 0x6c5   :  { %v6320_v16 = vpop.eup %6319  ;;  %6339 = vpow2.f32 %v4938_v35  ;;  %v4934_v51 = vmul.f32 1.442695, %v6318_v34  ;;  %v5790_v18 = vpack.c.bf16 %v4979_v62, %v4978_v10  ;;  %v8812_v11 = vpop.f32.mrb[178].mxu0  ;;  %v4844_v7 = vadd.f32 %v4843_v38, %v8661_v59 }
 0x6c6   :  { %v8814_v19 = vpop.f32.mrb[206].mxu1  ;;  %v6322_v53 = vpop.eup %6321  ;;  %6341 = vpow2.f32 %v4277_v44  ;;  %v4287_v47 = vmul.f32 1.442695, %v6320_v16  ;;  %v4852_v10 = vadd.f32 %v5760_v2, %v9149_v37  ;;  %v4319_v58 = vadd.f32 %v8751_v14, %v4195_v5 }
 0x6c7   :  { %v4197_v33 = vpop.f32.mrb[179].mxu0  ;;  %v4846_v22 = vpop.f32.mrb[207].mxu1  ;;  %6343 = vpow2.f32 %v4934_v51  ;;  %v4944_v52 = vmul.f32 1.442695, %v6322_v53  ;;  %5791 = vmatpush1.bf16.msra.mxu0 %v5790_v18  ;;  %v4980_v63 = vadd.f32 %v4962_v40, %v4844_v7  ;;  %v9154_v40 = vld [vmem:[#allocation16_spill] sm:$0xff]  ;;  %v9157_v53 = vld [vmem:[#allocation11_spill] sm:$0xff] }
 0x6c8   :  { %v6324_v48 = vpop.eup %6323  ;;  %6345 = vpow2.f32 %v4287_v47  ;;  %v4198_v45 = vadd.f32 %v4197_v33, %v9150_v25  ;;  %v4847_v60 = vadd.f32 %v4846_v22, %v9151_v30  ;;  %5792 = vmatprep.subr.bf16.mxu0 %v9152_v27  ;;  %v8825_v13 = vpop.permute.xlu1 %4552  ;;  %v4823_v35 = vadd.f32 %v8738_v61, %v9154_v40 }
 0x6c9   :  { %v6326_v4 = vpop.eup %6325  ;;  %6347 = vpow2.f32 %v4944_v52  ;;  %v4966_v56 = vmul.f32 %v6324_v48, %v4319_v58  ;;  %v8827_v14 = vpop.permute.xlu0 %3901  ;;  %v4815_v47 = vadd.f32 %v8747_v36, %v9157_v53  ;;  %v9158_v58 = vld [vmem:[#allocation20_spill] sm:$0xff] }
 0x6ca   :  { %v6328_v59 = vpop.eup %6327  ;;  %v4303_v31 = vmul.f32 %v6326_v4, %v9153_v49  ;;  %6349 = vtanh.f32 %v4150_v26  ;;  %v4320_v54 = vadd.f32 %v8764_v23, %v4198_v45  ;;  %v4981_v44 = vadd.f32 %v4963_v55, %v4847_v60  ;;  %v5728_v15 = vpop.f32.mrb[180].mxu0  ;;  %v9156_v26 = vld [vmem:[#allocation19_spill] sm:$0xff]  ;;  %v9159_v4 = vld [vmem:[#allocation22_spill] sm:$0xff]  ;;  %v9161_v49 = vld [vmem:[#allocation24_spill] sm:$0xff] }
 0x6cb   :  { %v6330_v39 = vpop.eup %6329  ;;  %v4964_v62 = vmul.f32 %v6328_v59, %v8779_v50  ;;  %6351 = vtanh.f32 %v4799_v41  ;;  %v8835_v8 = vpop.f32.mrb[208].mxu1  ;;  %v4166_v61 = vadd.f32 %v8745_v46, %v9156_v26  ;;  %v4206_v36 = vadd.f32 %v8812_v11, %v9158_v58  ;;  %v9160_v60 = vld [vmem:[#allocation3_spill] sm:$0xff] }
 0x6cc   :  { %v6332_v2 = vpop.eup %6331  ;;  %v8833_v34 = vadd.f32 %v4303_v31, %v4203_v12  ;;  %v4306_v38 = vmul.f32 %v6330_v39, %v9155_v20  ;;  %6353 = vtanh.f32 %v4820_v21  ;;  %v4210_v50 = vpop.f32.mrb[181].mxu0  ;;  %v5793_v12 = vpack.c.bf16 %v4981_v44, %v4980_v63 }
 0x6cd   :  { %v6334_v16 = vpop.eup %6333  ;;  %v4283_v51 = vmul.f32 1.442695, %v6332_v2  ;;  %v8840_v18 = vadd.f32 %v4964_v62, %v4852_v10  ;;  %v4859_v23 = vpop.f32.mrb[209].mxu1  ;;  %6355 = vtanh.f32 %v4163_v1  ;;  %v4211_v46 = vadd.f32 %v4210_v50, %v8699_v43 }
 0x6ce   :  { %v6336_v5 = vpop.eup %6335  ;;  %v4940_v41 = vmul.f32 1.442695, %v6334_v16  ;;  %v8844_v7 = vpop.f32.mrb[182].mxu0  ;;  %v4860_v48 = vadd.f32 %v4859_v23, %v8685_v32  ;;  %v4855_v63 = vadd.f32 %v8814_v19, %v9159_v4  ;;  %5794 = vmatpush1.bf16.msra.mxu0 %v5793_v12  ;;  %v9163_v16 = vld [vmem:[#allocation14_spill] sm:$0xff] }
 0x6cf   :  { %v8846_v33 = vpop.f32.mrb[210].mxu1  ;;  %v6338_v22 = vpop.eup %6337  ;;  %6357 = vpow2.f32 %v4283_v51  ;;  %v4289_v21 = vmul.f32 1.442695, %v6336_v5  ;;  %v4323_v45 = vadd.f32 %v8801_v24, %v4211_v46  ;;  %5795 = vmatprep.subr.bf16.mxu0 %v9152_v27  ;;  %v9162_v24 = vld [vmem:[#allocation15_spill] sm:$0xff]  ;;  %v9166_v4 = vld [vmem:[#allocation10_spill] sm:$0xff] }
 0x6d0   :  { %v4213_v52 = vpop.f32.mrb[183].mxu0  ;;  %v4862_v37 = vpop.f32.mrb[211].mxu1  ;;  %6359 = vpow2.f32 %v4940_v41  ;;  %v4946_v1 = vmul.f32 1.442695, %v6338_v22  ;;  %v8855_v30 = vadd.f32 %v4966_v56, %v4860_v48  ;;  %v4828_v56 = vadd.f32 %v8772_v17, %v9162_v24 }
 0x6d1   :  { %v6340_v10 = vpop.eup %6339  ;;  %6361 = vpow2.f32 %v4289_v21  ;;  %v4214_v32 = vadd.f32 %v4213_v52, %v8726_v42  ;;  %v4863_v11 = vadd.f32 %v4862_v37, %v9161_v49  ;;  %v3907_v19 = vpop.permute.xlu1 %3906 }
 0x6d2   :  { %v6342_v25 = vpop.eup %6341  ;;  %6363 = vpow2.f32 %v4946_v1  ;;  %v4967_v31 = vmul.f32 %v6340_v10, %v4320_v54  ;;  %v8861_v39 = vpop.permute.xlu0 %4557  ;;  %v9165_v1 = vld [vmem:[#allocation23_spill] sm:$0xff] }
 0x6d3   :  { %v6344_v43 = vpop.eup %6343  ;;  %v4304_v59 = vmul.f32 %v6342_v25, %v9160_v60  ;;  %6365 = vtanh.f32 %v8809_v28  ;;  %v4324_v40 = vadd.f32 %v4306_v38, %v4214_v32  ;;  %v8869_v20 = vpop.f32.mrb[184].mxu0  ;;  %v9164_v28 = vld [vmem:[#allocation17_spill] sm:$0xff]  ;;  %v4868_v58 = vadd.f32 %v8835_v8, %v9165_v1 }
 0x6d4   :  { %v6346_v55 = vpop.eup %6345  ;;  %v4965_v42 = vmul.f32 %v6344_v43, %v8797_v3  ;;  %6367 = vtanh.f32 %v4823_v35  ;;  %v4985_v44 = vadd.f32 %v4967_v31, %v4863_v11  ;;  %v8871_v54 = vpop.f32.mrb[212].mxu1  ;;  %v4831_v50 = vadd.f32 %v8781_v57, %v9164_v28  ;;  %v9167_v60 = vld [vmem:[#allocation13_spill] sm:$0xff] }
 0x6d5   :  { %v6348_v62 = vpop.eup %6347  ;;  %v8867_v2 = vadd.f32 %v4304_v59, %v4206_v36  ;;  %v4309_v51 = vmul.f32 %v6346_v55, %v9163_v16  ;;  %6369 = vtanh.f32 %v4166_v61  ;;  %v4219_v3 = vadd.f32 %v5728_v15, %v8759_v9  ;;  %v4226_v38 = vpop.f32.mrb[185].mxu0 }
 0x6d6   :  { %v6350_v26 = vpop.eup %6349  ;;  %v4983_v17 = vadd.f32 %v4965_v42, %v4855_v63  ;;  %v4875_v23 = vpop.f32.mrb[213].mxu1  ;;  %6371 = vtanh.f32 %v4815_v47  ;;  %v5799_v41 = vpack.c.bf16 %v4985_v44, %v8855_v30  ;;  %v4227_v53 = vadd.f32 %v4226_v38, %v8827_v14 }
 0x6d7   :  { %v6352_v35 = vpop.eup %6351  ;;  %v4285_v5 = vmul.f32 1.442695, %v6350_v26  ;;  %v8879_v12 = vpop.f32.mrb[186].mxu0  ;;  %6373 = vtanh.f32 %v4828_v56  ;;  %v4876_v9 = vadd.f32 %v4875_v23, %v8795_v29  ;;  %v4970_v37 = vmul.f32 %v6348_v62, %v4323_v45 }
 0x6d8   :  { %v8881_v22 = vpop.f32.mrb[214].mxu1  ;;  %v6354_v61 = vpop.eup %6353  ;;  %v4942_v21 = vmul.f32 1.442695, %v6352_v35  ;;  %v5796_v57 = vpack.c.bf16 %v4983_v17, %v8840_v18  ;;  %v4327_v52 = vadd.f32 %v4309_v51, %v4227_v53 }
 0x6d9   :  { %v4229_v15 = vpop.f32.mrb[187].mxu0  ;;  %v4878_v46 = vpop.f32.mrb[215].mxu1  ;;  %6375 = vpow2.f32 %v4285_v5  ;;  %v4952_v47 = vmul.f32 1.442695, %v6354_v61  ;;  %v8888_v63 = vadd.f32 %v4970_v37, %v4876_v9  ;;  %v4871_v5 = vadd.f32 %v8846_v33, %v8757_v6  ;;  %v9168_v61 = vld [vmem:[#allocation8_spill] sm:$0xff] }
 0x6da   :  { %v6356_v48 = vpop.eup %6355  ;;  %6377 = vpow2.f32 %v4942_v21  ;;  %5797 = vmatpush1.bf16.msra.mxu0 %v5796_v57  ;;  %v4230_v29 = vadd.f32 %v4229_v15, %v3907_v19  ;;  %v4879_v30 = vadd.f32 %v4878_v46, %v8825_v13  ;;  %v3912_v43 = vpop.permute.xlu0 %3911 }
 0x6db   :  { %v6358_v10 = vpop.eup %6357  ;;  %v4291_v14 = vmul.f32 1.442695, %v6356_v48  ;;  %6379 = vpow2.f32 %v4952_v47  ;;  %5798 = vmatprep.subr.bf16.mxu0 %v9152_v27  ;;  %v8894_v49 = vpop.f32.mrb[216].mxu1 }
 0x6dc   :  { %v6360_v36 = vpop.eup %6359  ;;  %v4307_v18 = vmul.f32 %v6358_v10, %v9166_v4  ;;  %v4563_v31 = vpop.permute.xlu1 %4562  ;;  %v9169_v10 = vld [vmem:[#allocation7_spill] sm:$0xff]  ;;  %v4884_v4 = vadd.f32 %v8871_v54, %v8861_v39 }
 0x6dd   :  { %v6362_v25 = vpop.eup %6361  ;;  %6381 = vpow2.f32 %v4291_v14  ;;  %v4968_v45 = vmul.f32 %v6360_v36, %v8833_v34  ;;  %v4891_v19 = vpop.f32.mrb[217].mxu1 }
 0x6de   :  { %v6364_v32 = vpop.eup %6363  ;;  %6383 = vtanh.f32 %v4831_v50  ;;  %v4325_v8 = vadd.f32 %v4307_v18, %v4219_v3  ;;  %v4310_v59 = vmul.f32 %v6362_v25, %v9167_v60  ;;  %5800 = vmatpush1.bf16.msra.mxu0 %v5799_v41  ;;  %v8897_v13 = vpop.f32.mrb[218].mxu1  ;;  %v9170_v60 = vld [vmem:[#allocation12_spill] sm:$0xff] }
 0x6df   :  { %v6366_v11 = vpop.eup %6365  ;;  %v4986_v55 = vadd.f32 %v4968_v45, %v4868_v58  ;;  %v4971_v24 = vmul.f32 %v6364_v32, %v4324_v40  ;;  %5801 = vmatprep.subr.bf16.mxu0 %v9152_v27  ;;  %v4894_v51 = vpop.f32.mrb[219].mxu1  ;;  %v4222_v40 = vadd.f32 %v8844_v7, %v8793_v0  ;;  %v4235_v0 = vadd.f32 %v8869_v20, %v3912_v43 }
 0x6e0   :  { %v6368_v56 = vpop.eup %6367  ;;  %v4948_v42 = vmul.f32 1.442695, %v6366_v11  ;;  %v4328_v62 = vadd.f32 %v4310_v59, %v4230_v29  ;;  %v4568_v23 = vpop.permute.xlu0 %4567  ;;  %v4887_v45 = vadd.f32 %v8881_v22, %v4563_v31 }
 0x6e1   :  { %v6370_v34 = vpop.eup %6369  ;;  %v4954_v44 = vmul.f32 1.442695, %v6368_v56  ;;  %v4989_v16 = vadd.f32 %v4971_v24, %v4879_v30  ;;  %v3917_v53 = vpop.permute.xlu1 %3916  ;;  %v4892_v57 = vadd.f32 %v4891_v19, %v4568_v23 }
 0x6e2   :  { %v6372_v26 = vpop.eup %6371  ;;  %6385 = vpow2.f32 %v4948_v42  ;;  %v4293_v28 = vmul.f32 1.442695, %v6370_v34 }
 0x6e3   :  { %v6374_v50 = vpop.eup %6373  ;;  %6387 = vpow2.f32 %v4954_v44  ;;  %v4950_v17 = vmul.f32 1.442695, %v6372_v26  ;;  %v5805_v3 = vpack.c.bf16 %v4989_v16, %v8888_v63  ;;  %v4997_v16 = vld [vmem:[%s8951_s17] sm:$0xff] }
 0x6e4   :  { %v6376_v38 = vpop.eup %6375  ;;  %6389 = vpow2.f32 %v4293_v28  ;;  %v4956_v35 = vmul.f32 1.442695, %v6374_v50  ;;  %v4578_v25 = vpop.permute.xlu0 %4577  ;;  %v9172_v26 = vld [vmem:[#allocation6_spill] sm:$0xff]  ;;  %v9173_v28 = vld [vmem:[#allocation4_spill] sm:$0xff] }
 0x6e5   :  { %v6378_v41 = vpop.eup %6377  ;;  %6391 = vpow2.f32 %v4950_v17  ;;  %v4308_v21 = vmul.f32 %v6376_v38, %v9168_v61  ;;  %v4573_v36 = vpop.permute.xlu1 %4572  ;;  %v4900_v39 = vadd.f32 %v8894_v49, %v4578_v25  ;;  %v4996_v50 = vld [vmem:[%s8952_s16] sm:$0xff] }
 0x6e6   :  { %v6380_v9 = vpop.eup %6379  ;;  %6393 = vpow2.f32 %v4956_v35  ;;  %v4969_v15 = vmul.f32 %v6378_v41, %v8867_v2  ;;  %v4895_v2 = vadd.f32 %v4894_v51, %v4573_v36  ;;  %v9171_v51 = vld [vmem:[#allocation2_spill] sm:$0xff] }
 0x6e7   :  { %v6382_v7 = vpop.eup %6381  ;;  %v4326_v46 = vadd.f32 %v4308_v21, %v4222_v40  ;;  %v4974_v48 = vmul.f32 %v6380_v9, %v4327_v52  ;;  %v4238_v52 = vadd.f32 %v8879_v12, %v3917_v53 }
 0x6e8   :  { %v6384_v47 = vpop.eup %6383  ;;  %v4987_v37 = vadd.f32 %v4969_v15, %v4871_v5  ;;  %v4311_v14 = vmul.f32 %v6382_v7, %v9169_v10 }
 0x6e9   :  { %v4958_v6 = vmul.f32 1.442695, %v6384_v47  ;;  %v4992_v33 = vadd.f32 %v4974_v48, %v4892_v57  ;;  %v4583_v56 = vpop.permute.xlu1 %4582 }
 0x6ea   :  { %v5802_v1 = vpack.c.bf16 %v4987_v37, %v4986_v55  ;;  %v4329_v58 = vadd.f32 %v4311_v14, %v4235_v0  ;;  %v4903_v31 = vadd.f32 %v8897_v13, %v4583_v56  ;;  %v6400_v13 = vmov 0.0  }
 0x6eb   :  { %6395 = vpow2.f32 %v4958_v6 }
 0x6ec   :  { %v6386_v18 = vpop.eup %6385  ;;  %5803 = vmatpush1.bf16.msra.mxu0 %v5802_v1 }
 0x6ed   :  { %v6388_v20 = vpop.eup %6387  ;;  %v4972_v63 = vmul.f32 %v6386_v18, %v4325_v8  ;;  %5804 = vmatprep.subr.bf16.mxu0 %v9152_v27 }
 0x6ee   :  { %v6390_v29 = vpop.eup %6389  ;;  %v4975_v30 = vmul.f32 %v6388_v20, %v4328_v62 }
 0x6ef   :  { %v6392_v32 = vpop.eup %6391  ;;  %v4990_v43 = vadd.f32 %v4972_v63, %v4884_v4  ;;  %v4312_v59 = vmul.f32 %v6390_v29, %v9170_v60 }
 0x6f0   :  { %v6394_v54 = vpop.eup %6393  ;;  %v4973_v11 = vmul.f32 %v6392_v32, %v4326_v46  ;;  %5806 = vmatpush1.bf16.msra.mxu0 %v5805_v3  ;;  %v4993_v55 = vadd.f32 %v4975_v30, %v4895_v2 }
 0x6f1   :  { %v4330_v8 = vadd.f32 %v4312_v59, %v4238_v52  ;;  %v4976_v24 = vmul.f32 %v6394_v54, %v4329_v58  ;;  %5807 = vmatprep.subr.bf16.mxu0 %v9152_v27 }
 0x6f2   :  { %v4991_v12 = vadd.f32 %v4973_v11, %v4887_v45  ;;  %v5811_v19 = vpack.c.bf16 %v4993_v55, %v4992_v33 }
 0x6f3   :  { %v4994_v42 = vadd.f32 %v4976_v24, %v4900_v39 }
 0x6f4   :  { %v5808_v22 = vpack.c.bf16 %v4991_v12, %v4990_v43 }
 0x6f5   :  { %v6396_v62 = vpop.eup %6395 }
 0x6f6   :  { %v4977_v34 = vmul.f32 %v6396_v62, %v4330_v8  ;;  %5809 = vmatpush1.bf16.msra.mxu0 %v5808_v22 }
 0x6f7   :  { %5810 = vmatprep.subr.bf16.mxu0 %v9152_v27 }
 0x6f8   :  { %v4995_v49 = vadd.f32 %v4977_v34, %v4903_v31 }
 0x6fa   :  { %v5814_v44 = vpack.c.bf16 %v4995_v49, %v4994_v42  ;;  %5812 = vmatpush1.bf16.msra.mxu0 %v5811_v19 }
 0x6fb   :  { %5813 = vmatprep.subr.bf16.mxu0 %v9152_v27 }
 0x6fe   :  { %5815 = vmatpush1.bf16.msra.mxu0 %v5814_v44 }
 0x6ff   :  { %5816 = vmatprep.subr.bf16.mxu0 %v9152_v27 }
 0x701   :  { %5067 = vmatmul.mubr.f32.vlgmr.msra.gmra.mrb[188].mxu0 %v4997_v16 }
 0x702   :  { %5818 = vmatpush3.bf16.msra.mxu0 %v9171_v51  ;;  %5786 = vmatprep.mubr.msk.f32.mxu0 %vm6399_vm4, %v6400_v13 }
 0x703   :  { %5819 = vmatprep.subr.bf16.mxu0 %v9152_v27 }
 0x706   :  { %5821 = vmatpush3.bf16.msra.mxu0 %v9172_v26 }
 0x707   :  { %5822 = vmatprep.subr.bf16.mxu0 %v9152_v27 }
 0x70a   :  { %5824 = vmatpush3.bf16.msra.mxu0 %v9173_v28 }
 0x70d   :  { %5787 = vmatmul.mubr.msk.f32.vlgmr.msra.gmra.mrb[188].mxu0 %vm1065_vm1, %v4996_v50 }
 0x7e0   :  { %v5141_v17 = vpop.f32.mrb[188].mxu0 }
 0x7e1   :  { %5145 = vst [vmem:[%s8953_s18] sm:$0xff] %v5141_v17  ;;  %v5788_v40 = vpop.f32.mrb[189].mxu0 }

</bundles_post_ra>
